<compile_context>
chip_gen: v7x
topology: tpu7x:2x2x1
jax: 0.10.0
libtpu: 0.0.40
codegen_flags: <defaults>
</compile_context>

<pallas_src>
import math

import numpy as np
import jax
import jax.numpy as jnp
from jax import lax
from jax.experimental import pallas as pl
from jax.experimental.pallas import tpu as pltpu


# Padded operand widths (multiples of 128 on the lane dim).
_K1 = 28 * 28          # 784 input pixels per image
_N1 = 1536             # 10*12*12 = 1440 pooled-conv1 features, padded
_N2 = 384              # 20*4*4   = 320  pooled-conv2 features (NCHW flat), padded
_NF1 = 128             # fc1 width 120, padded
_NF2 = 128             # fc2 width 84, padded
_NOUT = 128            # fc3 width 27, padded

# Constant-1 "bias carrier" lanes (first pad lane of each stage's output).
_C1 = 1440             # stage-1 output const lane (driven by f32 b1; 1.0**2 == 1.0)
_C2 = 320              # stage-2 output const lane
_C3 = 120              # fc1 output const lane (ReLU(1.0) == 1.0)
_C4 = 84               # fc2 output const lane


# ----------------------------- fused Pallas kernel ---------------------------

def _fused_forward_kernel(x_ref, w1_ref, b1_ref, w2_ref,
                          wf1_ref, wf2_ref, wf3_ref, o_ref):
    """Whole SplitEMNISTNet forward for one batch tile; everything VMEM-resident."""
    f32 = jnp.float32
    bf16 = jnp.bfloat16
    # conv1 + avgpool2 folded into one dense bf16 matrix; explicit f32 bias (also drives
    # the constant-1 lane at column _C1), then square.
    h = jnp.dot(x_ref[...].astype(bf16), w1_ref[...],
                preferred_element_type=f32) + b1_ref[...]
    h = h * h                                              # (tb, 1536); pad lanes >1440 stay 0
    # conv2 + avgpool2 folded (bias folded into row _C1); columns already NCHW-flat order.
    h = jnp.dot(h.astype(bf16), w2_ref[...], preferred_element_type=f32)
    h = h * h                                              # (tb, 384); pad lanes >320 stay 0
    # fc1+ReLU, fc2+ReLU, fc3 — biases folded into the const-lane rows of each weight.
    h = jnp.maximum(jnp.dot(h.astype(bf16), wf1_ref[...], preferred_element_type=f32), 0.0)
    h = jnp.maximum(jnp.dot(h.astype(bf16), wf2_ref[...], preferred_element_type=f32), 0.0)
    o_ref[...] = jnp.dot(h.astype(bf16), wf3_ref[...], preferred_element_type=f32)


def _batch_tile(B):
    """Device-aware batch-tile size (rows), 8-aligned."""
    rup8 = lambda n: ((n + 7) // 8) * 8
    try:
        kind = jax.devices()[0].device_kind.lower()
    except Exception:
        kind = ""
    if "v5" in kind:
        return min(128, rup8(B))                 # 128 rows already fill v5e's 4x128x128 MXU
    if "v7" in kind or "7x" in kind:
        # 256-wide MXU, but keep >=2 batch tiles when possible so both TensorCores get work.
        return min(256, rup8(max(1, -(-B // 2))))
    return min(256, rup8(B))                     # v6e (and default): fill the 2x256x256 MXU


def _const_spec(shape):
    """Grid-invariant block; single-buffered (fetched once, never re-fetched)."""
    idx = lambda i: (0, 0)
    try:
        return pl.BlockSpec(shape, idx, pipeline_mode=pl.Buffered(1))
    except Exception:                            # older jax without pipeline_mode support
        return pl.BlockSpec(shape, idx)


def split_emnist_forward(x_nchw, params):
    """Forward matching SplitEMNISTNet.forward (WorkMode.normal). x_nchw: (B, 1, 28, 28) f32."""
    B = x_nchw.shape[0]
    tb = _batch_tile(B)
    Bp = ((B + tb - 1) // tb) * tb
    x2d = x_nchw.astype(jnp.float32).reshape(B, _K1)
    if Bp != B:
        x2d = jnp.pad(x2d, ((0, Bp - B), (0, 0)))

    weight_elems = _K1 * _N1 + _N1 * _N2 + _N2 * _NF1 + _NF1 * _NF2 + _NF2 * _NOUT
    flops = 2 * Bp * weight_elems

    out = pl.pallas_call(
        _fused_forward_kernel,
        out_shape=jax.ShapeDtypeStruct((Bp, _NOUT), jnp.float32),
        grid_spec=pltpu.PrefetchScalarGridSpec(
            num_scalar_prefetch=0,
            grid=(Bp // tb,),
            in_specs=[
                pl.BlockSpec((tb, _K1), lambda i: (i, 0)),   # input tile (only per-step DMA)
                _const_spec((_K1, _N1)),                     # conv1+pool matrix (bf16)
                _const_spec((1, _N1)),                       # conv1 bias + const-1 lane (f32)
                _const_spec((_N1, _N2)),                     # conv2+pool matrix, b2 folded
                _const_spec((_N2, _NF1)),                    # fc1 (bias folded)
                _const_spec((_NF1, _NF2)),                   # fc2 (bias folded)
                _const_spec((_NF2, _NOUT)),                  # fc3 (bias folded)
            ],
            out_specs=pl.BlockSpec((tb, _NOUT), lambda i: (i, 0)),
        ),
        compiler_params=pltpu.CompilerParams(
            dimension_semantics=("parallel",),               # batch tiles across TCs (v7x)
            vmem_limit_bytes=24 * 1024 * 1024),
        cost_estimate=pl.CostEstimate(
            flops=flops,
            transcendentals=0,
            bytes_accessed=4 * (Bp * _K1 + Bp * _NOUT + _N1) + 2 * weight_elems),
    )(x2d, params["w1"], params["b1"], params["w2"],
      params["fc1w"], params["fc2w"], params["fc3w"])
    return out[:B, :27]


# -------------------------- parameter packing (init time) --------------------

def _conv_pool(x, w):
    """x: (N,Cin,H,W), w: (Cout,Cin,5,5) -> VALID conv (no bias) then 2x2 average pool."""
    y = lax.conv_general_dilated(x, w, (1, 1), "VALID",
                                 dimension_numbers=("NCHW", "OIHW", "NCHW"))
    N, C, H, W = y.shape
    return y.reshape(N, C, H // 2, 2, W // 2, 2).mean(axis=(3, 5))


def prepare_params(raw):
    """Pack raw PyTorch-layout weights into fused-kernel operands (done once offline)."""
    # Exact linearization of (conv1 + avgpool2): push an identity basis through it.
    eye1 = jnp.eye(_K1, dtype=jnp.float32).reshape(-1, 1, 28, 28)
    w1g = np.asarray(_conv_pool(eye1, raw["conv1_w"]).reshape(_K1, 10 * 12 * 12))   # (784,1440)
    b1f = np.asarray(jnp.repeat(raw["conv1_b"], 12 * 12))                            # NCHW-flat
    # Exact linearization of (conv2 + avgpool2); columns are in NCHW flatten order, which
    # is exactly the fc1 input order used by the PyTorch model's reshape.
    eye2 = jnp.eye(10 * 12 * 12, dtype=jnp.float32).reshape(-1, 10, 12, 12)
    w2g = np.asarray(_conv_pool(eye2, raw["conv2_w"]).reshape(10 * 12 * 12, 20 * 4 * 4))
    b2f = np.asarray(jnp.repeat(raw["conv2_b"], 4 * 4))

    # Stage 1: dense matrix padded to (784, 1536); explicit f32 bias whose pad lane _C1 is
    # set to 1.0 (it squares to 1.0) and then carries all downstream biases.
    w1 = np.zeros((_K1, _N1), np.float32); w1[:, :1440] = w1g
    b1 = np.zeros((1, _N1), np.float32);   b1[0, :1440] = b1f
    b1[0, _C1] = 1.0

    # Stage 2: conv2 bias folded into row _C1; column _C2 propagates the constant 1.
    w2 = np.zeros((_N1, _N2), np.float32)
    w2[:1440, :320] = w2g
    w2[_C1, :320] = b2f
    w2[_C1, _C2] = 1.0

    fc1 = np.zeros((_N2, _NF1), np.float32)
    fc1[:320, :120] = np.asarray(raw["fc1_w"], np.float32).T
    fc1[_C2, :120] = np.asarray(raw["fc1_b"], np.float32)
    fc1[_C2, _C3] = 1.0

    fc2 = np.zeros((_NF1, _NF2), np.float32)
    fc2[:120, :84] = np.asarray(raw["fc2_w"], np.float32).T
    fc2[_C3, :84] = np.asarray(raw["fc2_b"], np.float32)
    fc2[_C3, _C4] = 1.0

    fc3 = np.zeros((_NF2, _NOUT), np.float32)
    fc3[:84, :27] = np.asarray(raw["fc3_w"], np.float32).T
    fc3[_C4, :27] = np.asarray(raw["fc3_b"], np.float32)

    return {
        "w1": jnp.asarray(w1, jnp.bfloat16),
        "b1": jnp.asarray(b1, jnp.float32),
        "w2": jnp.asarray(w2, jnp.bfloat16),
        "fc1w": jnp.asarray(fc1, jnp.bfloat16),
        "fc2w": jnp.asarray(fc2, jnp.bfloat16),
        "fc3w": jnp.asarray(fc3, jnp.bfloat16),
    }


# -------------------------- references (plain JAX) ----------------------------

def reference_forward(x, raw):
    """Exact f32 conv/pool/fc reference (module semantics)."""
    def conv(x, w, b):
        y = lax.conv_general_dilated(x, w, (1, 1), "VALID",
                                     dimension_numbers=("NCHW", "OIHW", "NCHW"))
        return y + b[None, :, None, None]

    def avgpool2(y):
        N, C, H, W = y.shape
        return y.reshape(N, C, H // 2, 2, W // 2, 2).mean(axis=(3, 5))

    y = jnp.square(avgpool2(conv(x, raw["conv1_w"], raw["conv1_b"])))
    y = jnp.square(avgpool2(conv(y, raw["conv2_w"], raw["conv2_b"])))
    y = y.reshape(y.shape[0], -1)
    y = jnp.maximum(y @ raw["fc1_w"].T + raw["fc1_b"], 0.0)
    y = jnp.maximum(y @ raw["fc2_w"].T + raw["fc2_b"], 0.0)
    return y @ raw["fc3_w"].T + raw["fc3_b"]


def packed_forward(x2d, params):
    """Same bf16-weight math as the kernel, done by XLA (implementation-equivalence check)."""
    f32, bf16 = jnp.float32, jnp.bfloat16
    h = jnp.dot(x2d.astype(bf16), params["w1"], preferred_element_type=f32) + params["b1"]
    h = h * h
    h = jnp.dot(h.astype(bf16), params["w2"], preferred_element_type=f32)
    h = h * h
    h = jnp.maximum(jnp.dot(h.astype(bf16), params["fc1w"], preferred_element_type=f32), 0.0)
    h = jnp.maximum(jnp.dot(h.astype(bf16), params["fc2w"], preferred_element_type=f32), 0.0)
    return jnp.dot(h.astype(bf16), params["fc3w"], preferred_element_type=f32)[:, :27]


# ----------------------------------- main -------------------------------------

def _init_raw(key):
    # Deterministic PyTorch-style init: U(-1/sqrt(fan_in), 1/sqrt(fan_in)).
    ks = jax.random.split(key, 10)

    def u(k, shape, fan_in):
        bound = 1.0 / math.sqrt(fan_in)
        return jax.random.uniform(k, shape, jnp.float32, -bound, bound)

    return {
        "conv1_w": u(ks[0], (10, 1, 5, 5), 25),   "conv1_b": u(ks[1], (10,), 25),
        "conv2_w": u(ks[2], (20, 10, 5, 5), 250), "conv2_b": u(ks[3], (20,), 250),
        "fc1_w": u(ks[4], (120, 320), 320),       "fc1_b": u(ks[5], (120,), 320),
        "fc2_w": u(ks[6], (84, 120), 120),        "fc2_b": u(ks[7], (84,), 120),
        "fc3_w": u(ks[8], (27, 84), 84),          "fc3_b": u(ks[9], (27,), 84),
    }


if __name__ == "__main__":
    key = jax.random.PRNGKey(0)
    k_param, k_x = jax.random.split(key)
    raw = _init_raw(k_param)
    params = prepare_params(raw)

    # EMNIST-shaped input (28x28 is required so that fc1 in_features == 320), small batch.
    x = jax.random.normal(k_x, (2, 1, 28, 28), dtype=jnp.float32)

    out = jax.block_until_ready(jax.jit(split_emnist_forward)(x, params))
    assert out.shape == (2, 27) and out.dtype == jnp.float32

    # Tight check: kernel matches the identical bf16-weight computation done by XLA.
    sim = jax.block_until_ready(packed_forward(x.reshape(2, -1), params))
    np.testing.assert_allclose(np.asarray(out), np.asarray(sim), rtol=5e-3, atol=1e-3)

    # Semantics check against the exact f32 conv/pool/fc reference (bf16-weight tolerance).
    ref = jax.block_until_ready(reference_forward(x, raw))
    np.testing.assert_allclose(np.asarray(out), np.asarray(ref), rtol=5e-2, atol=5e-3)

    print("KERNEL_OK")
</pallas_src>

<mosaic_0001>
module attributes {stable_mosaic.version = 11 : i64} {
  func.func @_fused_forward_kernel(%arg0: i32, %arg1: memref<8x784xf32, #tpu.memory_space<vmem>>, %arg2: memref<784x1536xbf16, #tpu.memory_space<vmem>>, %arg3: memref<1x1536xf32, #tpu.memory_space<vmem>>, %arg4: memref<1536x384xbf16, #tpu.memory_space<vmem>>, %arg5: memref<384x128xbf16, #tpu.memory_space<vmem>>, %arg6: memref<128x128xbf16, #tpu.memory_space<vmem>>, %arg7: memref<128x128xbf16, #tpu.memory_space<vmem>>, %arg8: memref<8x128xf32, #tpu.memory_space<vmem>>) attributes {dimension_semantics = [#tpu.dimension_semantics<parallel>], iteration_bounds = array<i64: 1>, scalar_prefetch = 0 : i64, scratch_operands = 0 : i64, tpu.core_type = #tpu.core_type<tc>, window_params = [{transform_indices = @transform_0, window_bounds = array<i64: 8, 784>}, {pipeline_mode = #tpu.pipeline_mode<synchronous>, transform_indices = @transform_1, window_bounds = array<i64: 784, 1536>}, {pipeline_mode = #tpu.pipeline_mode<synchronous>, transform_indices = @transform_2, window_bounds = array<i64: 1, 1536>}, {pipeline_mode = #tpu.pipeline_mode<synchronous>, transform_indices = @transform_3, window_bounds = array<i64: 1536, 384>}, {pipeline_mode = #tpu.pipeline_mode<synchronous>, transform_indices = @transform_4, window_bounds = array<i64: 384, 128>}, {pipeline_mode = #tpu.pipeline_mode<synchronous>, transform_indices = @transform_5, window_bounds = array<i64: 128, 128>}, {pipeline_mode = #tpu.pipeline_mode<synchronous>, transform_indices = @transform_6, window_bounds = array<i64: 128, 128>}, {transform_indices = @transform_7, window_bounds = array<i64: 8, 128>}]} {
    %c0 = arith.constant 0 : index
    %c0_0 = arith.constant 0 : index
    %0 = vector.load %arg1[%c0, %c0_0] : memref<8x784xf32, #tpu.memory_space<vmem>>, vector<8x784xf32>
    %1 = arith.truncf %0 : vector<8x784xf32> to vector<8x784xbf16>
    %c0_1 = arith.constant 0 : index
    %c0_2 = arith.constant 0 : index
    %2 = vector.load %arg2[%c0_1, %c0_2] : memref<784x1536xbf16, #tpu.memory_space<vmem>>, vector<784x1536xbf16>
    %cst = arith.constant dense<0.000000e+00> : vector<8x1536xf32>
    %3 = tpu.matmul %1, %2, %cst {dimension_numbers = #tpu.dot_dimension_numbers<[1], [0], [0], [1], [0, 0, 1, 1], [], []>} : vector<8x784xbf16>, vector<784x1536xbf16>, vector<8x1536xf32> -> vector<8x1536xf32>
    %c0_3 = arith.constant 0 : index
    %c0_4 = arith.constant 0 : index
    %4 = vector.load %arg3[%c0_3, %c0_4] : memref<1x1536xf32, #tpu.memory_space<vmem>>, vector<1x1536xf32>
    %5 = vector.broadcast %4 : vector<1x1536xf32> to vector<8x1536xf32>
    %6 = arith.addf %3, %5 : vector<8x1536xf32>
    %7 = arith.mulf %6, %6 : vector<8x1536xf32>
    %8 = arith.truncf %7 : vector<8x1536xf32> to vector<8x1536xbf16>
    %c0_5 = arith.constant 0 : index
    %c0_6 = arith.constant 0 : index
    %9 = vector.load %arg4[%c0_5, %c0_6] : memref<1536x384xbf16, #tpu.memory_space<vmem>>, vector<1536x384xbf16>
    %cst_7 = arith.constant dense<0.000000e+00> : vector<8x384xf32>
    %10 = tpu.matmul %8, %9, %cst_7 {dimension_numbers = #tpu.dot_dimension_numbers<[1], [0], [0], [1], [0, 0, 1, 1], [], []>} : vector<8x1536xbf16>, vector<1536x384xbf16>, vector<8x384xf32> -> vector<8x384xf32>
    %11 = arith.mulf %10, %10 : vector<8x384xf32>
    %12 = arith.truncf %11 : vector<8x384xf32> to vector<8x384xbf16>
    %c0_8 = arith.constant 0 : index
    %c0_9 = arith.constant 0 : index
    %13 = vector.load %arg5[%c0_8, %c0_9] : memref<384x128xbf16, #tpu.memory_space<vmem>>, vector<384x128xbf16>
    %cst_10 = arith.constant dense<0.000000e+00> : vector<8x128xf32>
    %14 = tpu.matmul %12, %13, %cst_10 {dimension_numbers = #tpu.dot_dimension_numbers<[1], [0], [0], [1], [0, 0, 1, 1], [], []>} : vector<8x384xbf16>, vector<384x128xbf16>, vector<8x128xf32> -> vector<8x128xf32>
    %cst_11 = arith.constant 0.000000e+00 : f32
    %15 = vector.broadcast %cst_11 : f32 to vector<8x128xf32>
    %16 = arith.maximumf %14, %15 : vector<8x128xf32>
    %17 = arith.truncf %16 : vector<8x128xf32> to vector<8x128xbf16>
    %c0_12 = arith.constant 0 : index
    %c0_13 = arith.constant 0 : index
    %18 = vector.load %arg6[%c0_12, %c0_13] : memref<128x128xbf16, #tpu.memory_space<vmem>>, vector<128x128xbf16>
    %cst_14 = arith.constant dense<0.000000e+00> : vector<8x128xf32>
    %19 = tpu.matmul %17, %18, %cst_14 {dimension_numbers = #tpu.dot_dimension_numbers<[1], [0], [0], [1], [0, 0, 1, 1], [], []>} : vector<8x128xbf16>, vector<128x128xbf16>, vector<8x128xf32> -> vector<8x128xf32>
    %cst_15 = arith.constant 0.000000e+00 : f32
    %20 = vector.broadcast %cst_15 : f32 to vector<8x128xf32>
    %21 = arith.maximumf %19, %20 : vector<8x128xf32>
    %22 = arith.truncf %21 : vector<8x128xf32> to vector<8x128xbf16>
    %c0_16 = arith.constant 0 : index
    %c0_17 = arith.constant 0 : index
    %23 = vector.load %arg7[%c0_16, %c0_17] : memref<128x128xbf16, #tpu.memory_space<vmem>>, vector<128x128xbf16>
    %cst_18 = arith.constant dense<0.000000e+00> : vector<8x128xf32>
    %24 = tpu.matmul %22, %23, %cst_18 {dimension_numbers = #tpu.dot_dimension_numbers<[1], [0], [0], [1], [0, 0, 1, 1], [], []>} : vector<8x128xbf16>, vector<128x128xbf16>, vector<8x128xf32> -> vector<8x128xf32>
    %c0_19 = arith.constant 0 : index
    %c0_20 = arith.constant 0 : index
    %25 = vector.load %arg8[%c0_19, %c0_20] : memref<8x128xf32, #tpu.memory_space<vmem>>, vector<8x128xf32>
    tpu.vector_store %arg8[%c0_19, %c0_20], %24 {strides = array<i32>} : memref<8x128xf32, #tpu.memory_space<vmem>>, vector<8x128xf32>,
    return
  }
  func.func @transform_0(%arg0: i32) -> (i32, i32) {
    %c0_i32 = arith.constant 0 : i32
    %c0_i32_0 = arith.constant 0 : i32
    return %arg0, %c0_i32 : i32, i32
  }
  func.func @transform_1(%arg0: i32) -> (i32, i32) {
    %c0_i32 = arith.constant 0 : i32
    %c0_i32_0 = arith.constant 0 : i32
    %c0_i32_1 = arith.constant 0 : i32
    return %c0_i32, %c0_i32_0 : i32, i32
  }
  func.func @transform_2(%arg0: i32) -> (i32, i32) {
    %c0_i32 = arith.constant 0 : i32
    %c0_i32_0 = arith.constant 0 : i32
    %c0_i32_1 = arith.constant 0 : i32
    return %c0_i32, %c0_i32_0 : i32, i32
  }
  func.func @transform_3(%arg0: i32) -> (i32, i32) {
    %c0_i32 = arith.constant 0 : i32
    %c0_i32_0 = arith.constant 0 : i32
    %c0_i32_1 = arith.constant 0 : i32
    return %c0_i32, %c0_i32_0 : i32, i32
  }
  func.func @transform_4(%arg0: i32) -> (i32, i32) {
    %c0_i32 = arith.constant 0 : i32
    %c0_i32_0 = arith.constant 0 : i32
    %c0_i32_1 = arith.constant 0 : i32
    return %c0_i32, %c0_i32_0 : i32, i32
  }
  func.func @transform_5(%arg0: i32) -> (i32, i32) {
    %c0_i32 = arith.constant 0 : i32
    %c0_i32_0 = arith.constant 0 : i32
    %c0_i32_1 = arith.constant 0 : i32
    return %c0_i32, %c0_i32_0 : i32, i32
  }
  func.func @transform_6(%arg0: i32) -> (i32, i32) {
    %c0_i32 = arith.constant 0 : i32
    %c0_i32_0 = arith.constant 0 : i32
    %c0_i32_1 = arith.constant 0 : i32
    return %c0_i32, %c0_i32_0 : i32, i32
  }
  func.func @transform_7(%arg0: i32) -> (i32, i32) {
    %c0_i32 = arith.constant 0 : i32
    %c0_i32_0 = arith.constant 0 : i32
    return %arg0, %c0_i32 : i32, i32
  }
}

</mosaic_0001>

<bundles_post_ra>
// kernel: split_emnist_forward.1
= control target key start
LH: loop header
LB: loop body
LE: loop exit
PB: predicated region body
PF: predicated region fallthrough
CT: control target
= control target key end

     0   :  { %12 = vsyncpa [#allocation3], 0  ;;  %s10739_s0 = inlined_call_operand.vmem [shape: f32[8,784], index: 0, kind: input, shape index: {}]   ;;  %s10740_s1 = inlined_call_operand.hbm [shape: bf16[784,1536], index: 1, kind: input, shape index: {}]   ;;  %s10741_s2 = inlined_call_operand.hbm [shape: f32[1,1536], index: 2, kind: input, shape index: {}]   ;;  %s10742_s3 = inlined_call_operand.hbm [shape: bf16[1536,384], index: 3, kind: input, shape index: {}]   ;;  %s10743_s4 = inlined_call_operand.hbm [shape: bf16[384,128], index: 4, kind: input, shape index: {}]   ;;  %s10744_s5 = inlined_call_operand.hbm [shape: bf16[128,128], index: 5, kind: input, shape index: {}]   ;;  %s10745_s6 = inlined_call_operand.hbm [shape: bf16[128,128], index: 6, kind: input, shape index: {}]   ;;  %s10746_s7 = inlined_call_operand.vmem [shape: f32[8,128], index: 7, kind: output, shape index: {}]  }
   0x1   :  { %13 = vsyncpa [#allocation5], 0 }
   0x2   :  { %14 = vsyncpa [#allocation8], 0 }
   0x3   :  { %15 = vsyncpa [#allocation11], 0  ;;  %s10353_s24 = smov [#allocation4]   ;;  %s10354_s26 = smov [#allocation7]  }
   0x4   :  { %s36_s25 = sshll.u32 %s10353_s24, 4  ;;  %s57_s27 = sshll.u32 %s10354_s26, 4  ;;  %s37_s25 = int_to_ptr.vmem [resolvable:$true] %s36_s25  ;;  %s10408_s27 = int_to_ptr.vmem [resolvable:$true] %s57_s27 }
   0x5   :  { %s10213_s30 = scalar_lea.hbm %s10741_s2, 192 }
   0x6   :  { %p10214_p0 = scmp.ne.s32.totalorder %s10741_s2, %s10213_s30  ;;  %p10217_p1 = scmp.lt.u32.totalorder %s10213_s30, %s10741_s2 }
   0x8   :  { %p10219_p2 = pnand %p10217_p1, %p10214_p0 }
   0xa   :  { %10222 = shalt.err (!%p10219_p2)
}
   0xb   :  { %s10223_s12 = scalar_lea.vmem %s37_s25, 192  ;;  %p10228_p4 = scmp.lt.s32.totalorder %s37_s25, %s37_s25 }
   0xc   :  { %p10224_p3 = scmp.ne.s32.totalorder %s37_s25, %s10223_s12  ;;  %p10229_p5 = scmp.lt.s32.totalorder %s10223_s12, %s10223_s12 }
   0xe   :  { %p10230_p6 = por %p10229_p5, %p10228_p4 }
  0x10   :  { %p10231_p7 = pnand %p10230_p6, %p10224_p3 }
  0x12   :  { %10234 = shalt.err (!%p10231_p7)
}
  0x13   :  { %39 = dma.hbm_to_vmem [thread:$0]  %s10741_s2, 192, %s37_s25, [#allocation5]  }
  0x14   :  { %s10235_s17 = scalar_lea.hbm %s10743_s4, 3072 }
  0x15   :  { %p10236_p8 = scmp.ne.s32.totalorder %s10743_s4, %s10235_s17  ;;  %p10239_p9 = scmp.lt.u32.totalorder %s10235_s17, %s10743_s4 }
  0x17   :  { %p10241_p10 = pnand %p10239_p9, %p10236_p8 }
  0x19   :  { %10244 = shalt.err (!%p10241_p10)
}
  0x1a   :  { %s10245_s22 = scalar_lea.vmem %s10408_s27, 3072  ;;  %p10250_p12 = scmp.lt.s32.totalorder %s10408_s27, %s10408_s27 }
  0x1b   :  { %p10246_p11 = scmp.ne.s32.totalorder %s10408_s27, %s10245_s22  ;;  %p10251_p13 = scmp.lt.s32.totalorder %s10245_s22, %s10245_s22 }
  0x1d   :  { %p10252_p0 = por %p10251_p13, %p10250_p12 }
  0x1f   :  { %p10253_p1 = pnand %p10252_p0, %p10246_p11 }
  0x21   :  { %10256 = shalt.err (!%p10253_p1)
}
  0x22   :  { %s10355_s2 = smov 64   ;;  %s10356_s23 = smov 4  }
  0x23   :  { %63 = dma.hbm_to_vmem [thread:$0]  %s10743_s4, 3072, %s10408_s27, [#allocation8], %s10355_s2, %s10355_s2, %s10356_s23  }
  0x24   :  { %s10357_s26 = smov [#allocation2]   ;;  %s10257_s8 = scalar_lea.hbm %s10740_s1, 75264 }
  0x25   :  { %s23_s28 = sshll.u32 %s10357_s26, 4  ;;  %p10258_p2 = scmp.ne.s32.totalorder %s10740_s1, %s10257_s8  ;;  %s24_s28 = int_to_ptr.vmem [resolvable:$true] %s23_s28 }
  0x26   :  { %p10261_p3 = scmp.lt.u32.totalorder %s10257_s8, %s10740_s1 }
  0x28   :  { %p10263_p4 = pnand %p10261_p3, %p10258_p2 }
  0x2a   :  { %10266 = shalt.err (!%p10263_p4)
}
  0x2b   :  { %s10267_s13 = scalar_lea.vmem %s24_s28, 75264  ;;  %p10272_p6 = scmp.lt.s32.totalorder %s24_s28, %s24_s28 }
  0x2c   :  { %p10268_p5 = scmp.ne.s32.totalorder %s24_s28, %s10267_s13  ;;  %p10273_p7 = scmp.lt.s32.totalorder %s10267_s13, %s10267_s13 }
  0x2e   :  { %p10274_p8 = por %p10273_p7, %p10272_p6 }
  0x30   :  { %p10275_p9 = pnand %p10274_p8, %p10268_p5 }
  0x32   :  { %10278 = shalt.err (!%p10275_p9)
}
  0x33   :  { %s10358_s4 = smov 768   ;;  %s10359_s27 = smov 48  }
  0x34   :  { %29 = dma.hbm_to_vmem [thread:$0]  %s10740_s1, 75264, %s24_s28, [#allocation3], %s10358_s4, %s10358_s4, %s10359_s27  }
  0x35   :  { %s10360_s16 = smov [#allocation6]   ;;  %s10279_s20 = scalar_lea.hbm %s10742_s3, 36864 }
  0x36   :  { %s45_s17 = sshll.u32 %s10360_s16, 4  ;;  %p10280_p10 = scmp.ne.s32.totalorder %s10742_s3, %s10279_s20  ;;  %s46_s17 = int_to_ptr.vmem [resolvable:$true] %s45_s17 }
  0x37   :  { %p10283_p11 = scmp.lt.u32.totalorder %s10279_s20, %s10742_s3 }
  0x39   :  { %p10285_p12 = pnand %p10283_p11, %p10280_p10 }
  0x3b   :  { %10288 = shalt.err (!%p10285_p12)
}
  0x3c   :  { %s10289_s26 = scalar_lea.vmem %s46_s17, 36864  ;;  %p10294_p0 = scmp.lt.s32.totalorder %s46_s17, %s46_s17 }
  0x3d   :  { %p10290_p13 = scmp.ne.s32.totalorder %s46_s17, %s10289_s26  ;;  %p10295_p1 = scmp.lt.s32.totalorder %s10289_s26, %s10289_s26 }
  0x3f   :  { %p10296_p2 = por %p10295_p1, %p10294_p0 }
  0x41   :  { %p10297_p3 = pnand %p10296_p2, %p10290_p13 }
  0x43   :  { %10300 = shalt.err (!%p10297_p3)
}
  0x44   :  { %s10361_s1 = smov 192   ;;  %s10362_s28 = smov 12  }
  0x45   :  { %51 = dma.hbm_to_vmem [thread:$0]  %s10742_s3, 36864, %s46_s17, [#allocation5], %s10361_s1, %s10361_s1, %s10362_s28  }
  0x46   :  { %s10363_s8 = smov [#allocation9]   ;;  %s10364_s10 = smov [#allocation10]  }
  0x47   :  { %s69_s9 = sshll.u32 %s10363_s8, 4  ;;  %s81_s11 = sshll.u32 %s10364_s10, 4  ;;  %s70_s9 = int_to_ptr.vmem [resolvable:$true] %s69_s9  ;;  %s10466_s11 = int_to_ptr.vmem [resolvable:$true] %s81_s11 }
  0x48   :  { %s10301_s4 = scalar_lea.hbm %s10744_s5, 1024 }
  0x49   :  { %p10302_p4 = scmp.ne.s32.totalorder %s10744_s5, %s10301_s4  ;;  %p10305_p5 = scmp.lt.u32.totalorder %s10301_s4, %s10744_s5 }
  0x4b   :  { %p10307_p6 = pnand %p10305_p5, %p10302_p4 }
  0x4d   :  { %10310 = shalt.err (!%p10307_p6)
}
  0x4e   :  { %s10311_s3 = scalar_lea.vmem %s70_s9, 1024  ;;  %p10316_p8 = scmp.lt.s32.totalorder %s70_s9, %s70_s9 }
  0x4f   :  { %p10312_p7 = scmp.ne.s32.totalorder %s70_s9, %s10311_s3  ;;  %p10317_p9 = scmp.lt.s32.totalorder %s10311_s3, %s10311_s3 }
  0x51   :  { %p10318_p10 = por %p10317_p9, %p10316_p8 }
  0x53   :  { %p10319_p11 = pnand %p10318_p10, %p10312_p7 }
  0x55   :  { %10322 = shalt.err (!%p10319_p11)
}
  0x56   :  { %75 = dma.hbm_to_vmem [thread:$0]  %s10744_s5, 1024, %s70_s9, [#allocation8], %s10355_s2, %s10355_s2, %s10356_s23  }
  0x57   :  { %s10323_s21 = scalar_lea.hbm %s10745_s6, 1024 }
  0x58   :  { %p10324_p12 = scmp.ne.s32.totalorder %s10745_s6, %s10323_s21  ;;  %p10327_p13 = scmp.lt.u32.totalorder %s10323_s21, %s10745_s6 }
  0x5a   :  { %p10329_p0 = pnand %p10327_p13, %p10324_p12 }
  0x5c   :  { %10332 = shalt.err (!%p10329_p0)
}
  0x5d   :  { %s10333_s1 = scalar_lea.vmem %s10466_s11, 1024  ;;  %p10338_p2 = scmp.lt.s32.totalorder %s10466_s11, %s10466_s11 }
  0x5e   :  { %p10334_p1 = scmp.ne.s32.totalorder %s10466_s11, %s10333_s1  ;;  %p10339_p3 = scmp.lt.s32.totalorder %s10333_s1, %s10333_s1 }
  0x60   :  { %p10340_p4 = por %p10339_p3, %p10338_p2 }
  0x62   :  { %p10341_p5 = pnand %p10340_p4, %p10334_p1 }
  0x64   :  { %10344 = shalt.err (!%p10341_p5)
}
  0x65   :  { %87 = dma.hbm_to_vmem [thread:$0]  %s10745_s6, 1024, %s10466_s11, [#allocation11], %s10355_s2, %s10355_s2, %s10356_s23  }
  0x66   :  { %10345 = dma.done.wait [#allocation3], 75264  }
  0x67   :  { %10346 = vsyncadd [#allocation3], 4294892032 }
  0x68   :  { %10347 = dma.done.wait [#allocation5], 37056  }
  0x69   :  { %10348 = vsyncadd [#allocation5], 4294930240 }
  0x6a   :  { %10349 = dma.done.wait [#allocation8], 4096  }
  0x6b   :  { %10350 = vsyncadd [#allocation8], 4294963200 }
  0x6c   :  { %10351 = dma.done.wait [#allocation11], 1024  }
  0x6d   :  { %10352 = vsyncadd [#allocation11], 4294966272  ;;  %v10365_v0 = vmov 0   ;;  %v8906_v1 = vld [vmem:[#allocation2 + $0x4] ss:$48 sps:$4 sm:$0xff]   ;;  %vm3713_vm0 = vcmask 130048  }
  0x6e   :  { %3872 = vmatprep.mubr.bf16.mxu1 %v10365_v0  ;;  %v8908_v2 = vld [vmem:[#allocation2 + $0x1204] ss:$48 sps:$4 sm:$0xff]   ;;  %3717 = vmatprep.subr.bf16.mxu0 %v8906_v1  ;;  %v8910_v3 = vld [vmem:[#allocation2] ss:$48 sps:$4 sm:$0xff]   ;;  %v8914_v6 = vld [vmem:[#allocation2 + $0x8] ss:$48 sps:$4 sm:$0xff]  }
  0x6f   :  { %v8911_v4 = vld [vmem:[#allocation2 + $0x1200] ss:$48 sps:$4 sm:$0xff]   ;;  %3840 = vmatprep.subr.bf16.mxu1 %v8908_v2  ;;  %v8912_v5 = vld [vmem:[#allocation2 + $0x64] ss:$48 sps:$4 sm:$0xff]   ;;  %3718 = vmatpush1.bf16.msra.mxu0 %v8910_v3  ;;  %v8916_v7 = vld [vmem:[#allocation2 + $0xc] ss:$48 sps:$4 sm:$0xff]  }
  0x70   :  { %3841 = vmatpush1.bf16.msra.mxu1 %v8911_v4  ;;  %3719 = vmatprep.subr.bf16.mxu0 %v8912_v5  ;;  %v8917_v8 = vld [vmem:[#allocation2 + $0x60] ss:$48 sps:$4 sm:$0xff]   ;;  %v8918_v11 = vld [vmem:[#allocation2 + $0xc4] ss:$48 sps:$4 sm:$0xff]   ;;  %v8920_v12 = vld [vmem:[#allocation2 + $0x68] ss:$48 sps:$4 sm:$0xff]  }
  0x71   :  { %v113_v9 = vld [vmem:[%s10739_s0 + $0x30] sm:$0xff]  ;;  %3881 = vmatprep.subr.bf16.mxu1 %v8916_v7  ;;  %v8922_v13 = vld [vmem:[#allocation2 + $0x6c] ss:$48 sps:$4 sm:$0xff]   ;;  %v8926_v18 = vld [vmem:[#allocation2 + $0xc8] ss:$48 sps:$4 sm:$0xff]   ;;  %vm10367_vm1 = vmmov 0  }
  0x72   :  { %v10507_v10 = vpack.c.bf16 %v113_v9, %v113_v9  ;;  %v8923_v14 = vld [vmem:[#allocation2 + $0xc0] ss:$48 sps:$4 sm:$0xff]   ;;  %v8924_v15 = vld [vmem:[#allocation2 + $0x124] ss:$48 sps:$4 sm:$0xff]   ;;  %v8928_v16 = vld [vmem:[#allocation2 + $0xcc] ss:$48 sps:$4 sm:$0xff]  }
  0x73   :  { %3720 = vmatpush1.bf16.msra.mxu0 %v8917_v8  ;;  %v8929_v17 = vld [vmem:[#allocation2 + $0x120] ss:$48 sps:$4 sm:$0xff]   ;;  %v8930_v19 = vld [vmem:[#allocation2 + $0x184] ss:$48 sps:$4 sm:$0xff]   ;;  %v8934_v20 = vld [vmem:[#allocation2 + $0x12c] ss:$48 sps:$4 sm:$0xff]  }
  0x74   :  { %8218 = vmatmul.mubr.msk.bf16.vlgmr.msra.gmra.mrb[0].mxu1 %vm3713_vm0, %v10507_v10  ;;  %3721 = vmatprep.subr.bf16.mxu0 %v8918_v11  ;;  %v8932_v21 = vld [vmem:[#allocation2 + $0x128] ss:$48 sps:$4 sm:$0xff]   ;;  %v8935_v22 = vld [vmem:[#allocation2 + $0x180] ss:$48 sps:$4 sm:$0xff]   ;;  %v8936_v23 = vld [vmem:[#allocation2 + $0x1e4] ss:$48 sps:$4 sm:$0xff]  }
  0x75   :  { %3882 = vmatpush1.bf16.msra.mxu1 %v8914_v6  ;;  %v8940_v24 = vld [vmem:[#allocation2 + $0x18c] ss:$48 sps:$4 sm:$0xff]   ;;  %v8941_v25 = vld [vmem:[#allocation2 + $0x1e0] ss:$48 sps:$4 sm:$0xff]   ;;  %v8938_v26 = vld [vmem:[#allocation2 + $0x188] ss:$48 sps:$4 sm:$0xff]  }
  0x76   :  { %3883 = vmatprep.subr.bf16.mxu1 %v8922_v13  ;;  %v8942_v27 = vld [vmem:[#allocation2 + $0x244] ss:$48 sps:$4 sm:$0xff]   ;;  %v8946_v28 = vld [vmem:[#allocation2 + $0x1ec] ss:$48 sps:$4 sm:$0xff]   ;;  %v8944_v29 = vld [vmem:[#allocation2 + $0x1e8] ss:$48 sps:$4 sm:$0xff]  }
  0x77   :  { %3722 = vmatpush1.bf16.msra.mxu0 %v8923_v14  ;;  %v8947_v30 = vld [vmem:[#allocation2 + $0x240] ss:$48 sps:$4 sm:$0xff]   ;;  %v8948_v31 = vld [vmem:[#allocation2 + $0x2a4] ss:$48 sps:$4 sm:$0xff]   ;;  %v8952_v32 = vld [vmem:[#allocation2 + $0x24c] ss:$48 sps:$4 sm:$0xff]  }
  0x78   :  { %3723 = vmatprep.subr.bf16.mxu0 %v8924_v15  ;;  %v8953_v33 = vld [vmem:[#allocation2 + $0x2a0] ss:$48 sps:$4 sm:$0xff]   ;;  %v8950_v34 = vld [vmem:[#allocation2 + $0x248] ss:$48 sps:$4 sm:$0xff]   ;;  %v8954_v35 = vld [vmem:[#allocation2 + $0x304] ss:$48 sps:$4 sm:$0xff]  }
  0x79   :  { %3884 = vmatpush1.bf16.msra.mxu1 %v8920_v12  ;;  %v8958_v36 = vld [vmem:[#allocation2 + $0x2ac] ss:$48 sps:$4 sm:$0xff]   ;;  %v8956_v37 = vld [vmem:[#allocation2 + $0x2a8] ss:$48 sps:$4 sm:$0xff]   ;;  %v8959_v38 = vld [vmem:[#allocation2 + $0x300] ss:$48 sps:$4 sm:$0xff]  }
  0x7a   :  { %3885 = vmatprep.subr.bf16.mxu1 %v8928_v16  ;;  %v8960_v39 = vld [vmem:[#allocation2 + $0x364] ss:$48 sps:$4 sm:$0xff]   ;;  %v8964_v40 = vld [vmem:[#allocation2 + $0x30c] ss:$48 sps:$4 sm:$0xff]   ;;  %v8965_v41 = vld [vmem:[#allocation2 + $0x360] ss:$48 sps:$4 sm:$0xff]  }
  0x7b   :  { %3724 = vmatpush1.bf16.msra.mxu0 %v8929_v17  ;;  %v8962_v42 = vld [vmem:[#allocation2 + $0x308] ss:$48 sps:$4 sm:$0xff]   ;;  %v8966_v43 = vld [vmem:[#allocation2 + $0x3c4] ss:$48 sps:$4 sm:$0xff]   ;;  %v8970_v44 = vld [vmem:[#allocation2 + $0x36c] ss:$48 sps:$4 sm:$0xff]  }
  0x7c   :  { %3725 = vmatprep.subr.bf16.mxu0 %v8930_v19  ;;  %v8968_v45 = vld [vmem:[#allocation2 + $0x368] ss:$48 sps:$4 sm:$0xff]   ;;  %v8971_v46 = vld [vmem:[#allocation2 + $0x3c0] ss:$48 sps:$4 sm:$0xff]   ;;  %v8972_v47 = vld [vmem:[#allocation2 + $0x424] ss:$48 sps:$4 sm:$0xff]  }
  0x7d   :  { %3886 = vmatpush1.bf16.msra.mxu1 %v8926_v18  ;;  %v8976_v48 = vld [vmem:[#allocation2 + $0x3cc] ss:$48 sps:$4 sm:$0xff]   ;;  %v8977_v50 = vld [vmem:[#allocation2 + $0x420] ss:$48 sps:$4 sm:$0xff]   ;;  %v8974_v52 = vld [vmem:[#allocation2 + $0x3c8] ss:$48 sps:$4 sm:$0xff]  }
  0x7e   :  { %3887 = vmatprep.subr.bf16.mxu1 %v8934_v20  ;;  %v108_v49 = vld [vmem:[%s10739_s0 + $0x8] sm:$0xff]  ;;  %v8978_v53 = vld [vmem:[#allocation2 + $0x484] ss:$48 sps:$4 sm:$0xff]   ;;  %v8983_v56 = vld [vmem:[#allocation2 + $0x480] ss:$48 sps:$4 sm:$0xff]  }
  0x7f   :  { %3726 = vmatpush1.bf16.msra.mxu0 %v8935_v22  ;;  %v10514_v51 = vpack.c.bf16 %v108_v49, %v108_v49  ;;  %v8982_v54 = vld [vmem:[#allocation2 + $0x42c] ss:$48 sps:$4 sm:$0xff]   ;;  %v8980_v55 = vld [vmem:[#allocation2 + $0x428] ss:$48 sps:$4 sm:$0xff]   ;;  %v8984_v57 = vld [vmem:[#allocation2 + $0x4e4] ss:$48 sps:$4 sm:$0xff]  }
  0x80   :  { %3727 = vmatprep.subr.bf16.mxu0 %v8936_v23  ;;  %v8988_v58 = vld [vmem:[#allocation2 + $0x48c] ss:$48 sps:$4 sm:$0xff]   ;;  %v8986_v59 = vld [vmem:[#allocation2 + $0x488] ss:$48 sps:$4 sm:$0xff]   ;;  %v8989_v60 = vld [vmem:[#allocation2 + $0x4e0] ss:$48 sps:$4 sm:$0xff]  }
  0x81   :  { %3888 = vmatpush1.bf16.msra.mxu1 %v8932_v21  ;;  %3749 = vmatprep.mubr.bf16.mxu0 %v10514_v51  ;;  %v8990_v61 = vld [vmem:[#allocation2 + $0x544] ss:$48 sps:$4 sm:$0xff]   ;;  %v8994_v62 = vld [vmem:[#allocation2 + $0x4ec] ss:$48 sps:$4 sm:$0xff]   ;;  %v8992_v63 = vld [vmem:[#allocation2 + $0x4e8] ss:$48 sps:$4 sm:$0xff]  }
  0x82   :  { %3889 = vmatprep.subr.bf16.mxu1 %v8940_v24  ;;  %3913 = vmatprep.mubr.bf16.mxu1 %v10514_v51  ;;  %v8995_v1 = vld [vmem:[#allocation2 + $0x540] ss:$48 sps:$4 sm:$0xff]   ;;  %v8996_v2 = vld [vmem:[#allocation2 + $0x5a4] ss:$48 sps:$4 sm:$0xff]   ;;  %v9000_v3 = vld [vmem:[#allocation2 + $0x54c] ss:$48 sps:$4 sm:$0xff]  }
  0x83   :  { %3728 = vmatpush1.bf16.msra.mxu0 %v8941_v25  ;;  %v8998_v4 = vld [vmem:[#allocation2 + $0x548] ss:$48 sps:$4 sm:$0xff]   ;;  %v9001_v5 = vld [vmem:[#allocation2 + $0x5a0] ss:$48 sps:$4 sm:$0xff]   ;;  %v9004_v7 = vld [vmem:[#allocation2 + $0x604] ss:$48 sps:$4 sm:$0xff]  }
  0x84   :  { %3729 = vmatprep.subr.bf16.mxu0 %v8942_v27  ;;  %v107_v6 = vld [vmem:[%s10739_s0] sm:$0xff]  ;;  %v9007_v8 = vld [vmem:[#allocation2 + $0x5ac] ss:$48 sps:$4 sm:$0xff]   ;;  %v9005_v12 = vld [vmem:[#allocation2 + $0x5a8] ss:$48 sps:$4 sm:$0xff]  }
  0x85   :  { %3890 = vmatpush1.bf16.msra.mxu1 %v8938_v26  ;;  %v10521_v9 = vpack.c.bf16 %v107_v6, %v107_v6  ;;  %v9002_v11 = vld [vmem:[#allocation2 + $0x600] ss:$48 sps:$4 sm:$0xff]   ;;  %v9010_v13 = vld [vmem:[#allocation2 + $0x664] ss:$48 sps:$4 sm:$0xff]   ;;  %v9013_v14 = vld [vmem:[#allocation2 + $0x60c] ss:$48 sps:$4 sm:$0xff]  }
  0x86   :  { %3891 = vmatprep.subr.bf16.mxu1 %v8946_v28  ;;  %v9008_v15 = vld [vmem:[#allocation2 + $0x660] ss:$48 sps:$4 sm:$0xff]   ;;  %v9011_v16 = vld [vmem:[#allocation2 + $0x608] ss:$48 sps:$4 sm:$0xff]   ;;  %v9016_v17 = vld [vmem:[#allocation2 + $0x6c4] ss:$48 sps:$4 sm:$0xff]  }
  0x87   :  { %3730 = vmatpush1.bf16.msra.mxu0 %v8947_v30  ;;  %v9019_v18 = vld [vmem:[#allocation2 + $0x66c] ss:$48 sps:$4 sm:$0xff]   ;;  %v9014_v19 = vld [vmem:[#allocation2 + $0x6c0] ss:$48 sps:$4 sm:$0xff]   ;;  %v9017_v20 = vld [vmem:[#allocation2 + $0x668] ss:$48 sps:$4 sm:$0xff]  }
  0x88   :  { %3731 = vmatprep.subr.bf16.mxu0 %v8948_v31  ;;  %v9022_v21 = vld [vmem:[#allocation2 + $0x724] ss:$48 sps:$4 sm:$0xff]   ;;  %v9025_v22 = vld [vmem:[#allocation2 + $0x6cc] ss:$48 sps:$4 sm:$0xff]   ;;  %v9020_v23 = vld [vmem:[#allocation2 + $0x720] ss:$48 sps:$4 sm:$0xff]  }
  0x89   :  { %3892 = vmatpush1.bf16.msra.mxu1 %v8944_v29  ;;  %v9023_v24 = vld [vmem:[#allocation2 + $0x6c8] ss:$48 sps:$4 sm:$0xff]   ;;  %v9028_v25 = vld [vmem:[#allocation2 + $0x784] ss:$48 sps:$4 sm:$0xff]   ;;  %v9031_v26 = vld [vmem:[#allocation2 + $0x72c] ss:$48 sps:$4 sm:$0xff]  }
  0x8a   :  { %3893 = vmatprep.subr.bf16.mxu1 %v8952_v32  ;;  %v9026_v27 = vld [vmem:[#allocation2 + $0x780] ss:$48 sps:$4 sm:$0xff]   ;;  %v9029_v28 = vld [vmem:[#allocation2 + $0x728] ss:$48 sps:$4 sm:$0xff]   ;;  %v9034_v29 = vld [vmem:[#allocation2 + $0x7e4] ss:$48 sps:$4 sm:$0xff]  }
  0x8b   :  { %3732 = vmatpush1.bf16.msra.mxu0 %v8953_v33  ;;  %v9037_v30 = vld [vmem:[#allocation2 + $0x78c] ss:$48 sps:$4 sm:$0xff]   ;;  %v9032_v31 = vld [vmem:[#allocation2 + $0x7e0] ss:$48 sps:$4 sm:$0xff]   ;;  %v9035_v32 = vld [vmem:[#allocation2 + $0x788] ss:$48 sps:$4 sm:$0xff]  }
  0x8c   :  { %3733 = vmatprep.subr.bf16.mxu0 %v8954_v35  ;;  %v9040_v33 = vld [vmem:[#allocation2 + $0x844] ss:$48 sps:$4 sm:$0xff]   ;;  %v110_v35 = vld [vmem:[%s10739_s0 + $0x18] sm:$0xff]  ;;  %v9056_v49 = vld [vmem:[#allocation2 + $0x960] ss:$48 sps:$4 sm:$0xff]  }
  0x8d   :  { %3894 = vmatpush1.bf16.msra.mxu1 %v8950_v34  ;;  %v9043_v34 = vld [vmem:[#allocation2 + $0x7ec] ss:$48 sps:$4 sm:$0xff]  }
  0x8e   :  { %3895 = vmatprep.subr.bf16.mxu1 %v8958_v36  ;;  %v10528_v36 = vpack.c.bf16 %v110_v35, %v110_v35  ;;  %v9091_v6 = vld [vmem:[#allocation2 + $0xaec] ss:$48 sps:$4 sm:$0xff]   ;;  %v9124_v35 = vld [vmem:[#allocation2 + $0xd84] ss:$48 sps:$4 sm:$0xff]  }
  0x8f   :  { %3734 = vmatpush1.bf16.msra.mxu0 %v8959_v38  ;;  %v9041_v38 = vld [vmem:[#allocation2 + $0x7e8] ss:$48 sps:$4 sm:$0xff]  }
  0x90   :  { %3735 = vmatprep.subr.bf16.mxu0 %v8960_v39  ;;  %v9046_v39 = vld [vmem:[#allocation2 + $0x8a4] ss:$48 sps:$4 sm:$0xff]  }
  0x91   :  { %3896 = vmatpush1.bf16.msra.mxu1 %v8956_v37  ;;  %v9038_v37 = vld [vmem:[#allocation2 + $0x840] ss:$48 sps:$4 sm:$0xff]  }
  0x92   :  { %3897 = vmatprep.subr.bf16.mxu1 %v8964_v40  ;;  %v9049_v40 = vld [vmem:[#allocation2 + $0x84c] ss:$48 sps:$4 sm:$0xff]  }
  0x93   :  { %3736 = vmatpush1.bf16.msra.mxu0 %v8965_v41  ;;  %v9044_v41 = vld [vmem:[#allocation2 + $0x8a0] ss:$48 sps:$4 sm:$0xff]  }
  0x94   :  { %3737 = vmatprep.subr.bf16.mxu0 %v8966_v43  ;;  %v9052_v43 = vld [vmem:[#allocation2 + $0x904] ss:$48 sps:$4 sm:$0xff]  }
  0x95   :  { %3898 = vmatpush1.bf16.msra.mxu1 %v8962_v42  ;;  %v9047_v42 = vld [vmem:[#allocation2 + $0x848] ss:$48 sps:$4 sm:$0xff]  }
  0x96   :  { %3899 = vmatprep.subr.bf16.mxu1 %v8970_v44  ;;  %v9055_v44 = vld [vmem:[#allocation2 + $0x8ac] ss:$48 sps:$4 sm:$0xff]  }
  0x97   :  { %3738 = vmatpush1.bf16.msra.mxu0 %v8971_v46  ;;  %v9053_v46 = vld [vmem:[#allocation2 + $0x8a8] ss:$48 sps:$4 sm:$0xff]  }
  0x98   :  { %3739 = vmatprep.subr.bf16.mxu0 %v8972_v47  ;;  %v9058_v47 = vld [vmem:[#allocation2 + $0x964] ss:$48 sps:$4 sm:$0xff]  }
  0x99   :  { %3900 = vmatpush1.bf16.msra.mxu1 %v8968_v45  ;;  %v9050_v45 = vld [vmem:[#allocation2 + $0x900] ss:$48 sps:$4 sm:$0xff]  }
  0x9a   :  { %3901 = vmatprep.subr.bf16.mxu1 %v8976_v48  ;;  %v9061_v48 = vld [vmem:[#allocation2 + $0x90c] ss:$48 sps:$4 sm:$0xff]  }
  0x9b   :  { %3740 = vmatpush1.bf16.msra.mxu0 %v8977_v50  ;;  %v9059_v50 = vld [vmem:[#allocation2 + $0x908] ss:$48 sps:$4 sm:$0xff]  }
  0x9c   :  { %3741 = vmatprep.subr.bf16.mxu0 %v8978_v53  ;;  %v9067_v53 = vld [vmem:[#allocation2 + $0x96c] ss:$48 sps:$4 sm:$0xff]  }
  0x9d   :  { %3902 = vmatpush1.bf16.msra.mxu1 %v8974_v52  ;;  %v9064_v52 = vld [vmem:[#allocation2 + $0x9c4] ss:$48 sps:$4 sm:$0xff]  }
  0x9e   :  { %3903 = vmatprep.subr.bf16.mxu1 %v8982_v54  ;;  %v9062_v54 = vld [vmem:[#allocation2 + $0x9c0] ss:$48 sps:$4 sm:$0xff]  }
  0x9f   :  { %3742 = vmatpush1.bf16.msra.mxu0 %v8983_v56  ;;  %v9070_v56 = vld [vmem:[#allocation2 + $0xa24] ss:$48 sps:$4 sm:$0xff]  }
  0xa0   :  { %3743 = vmatprep.subr.bf16.mxu0 %v8984_v57  ;;  %v9073_v57 = vld [vmem:[#allocation2 + $0x9cc] ss:$48 sps:$4 sm:$0xff]  }
  0xa1   :  { %3904 = vmatpush1.bf16.msra.mxu1 %v8980_v55  ;;  %v9065_v55 = vld [vmem:[#allocation2 + $0x968] ss:$48 sps:$4 sm:$0xff]  }
  0xa2   :  { %3905 = vmatprep.subr.bf16.mxu1 %v8988_v58  ;;  %v9068_v58 = vld [vmem:[#allocation2 + $0xa20] ss:$48 sps:$4 sm:$0xff]  }
  0xa3   :  { %3744 = vmatpush1.bf16.msra.mxu0 %v8989_v60  ;;  %v9076_v60 = vld [vmem:[#allocation2 + $0xa84] ss:$48 sps:$4 sm:$0xff]  }
  0xa4   :  { %3745 = vmatprep.subr.bf16.mxu0 %v8990_v61  ;;  %v9079_v61 = vld [vmem:[#allocation2 + $0xa2c] ss:$48 sps:$4 sm:$0xff]  }
  0xa5   :  { %3906 = vmatpush1.bf16.msra.mxu1 %v8986_v59  ;;  %v9071_v59 = vld [vmem:[#allocation2 + $0x9c8] ss:$48 sps:$4 sm:$0xff]  }
  0xa6   :  { %3907 = vmatprep.subr.bf16.mxu1 %v8994_v62  ;;  %v9074_v62 = vld [vmem:[#allocation2 + $0xa80] ss:$48 sps:$4 sm:$0xff]  }
  0xa7   :  { %3746 = vmatpush1.bf16.msra.mxu0 %v8995_v1  ;;  %v9082_v1 = vld [vmem:[#allocation2 + $0xae4] ss:$48 sps:$4 sm:$0xff]  }
  0xa8   :  { %3747 = vmatprep.subr.bf16.mxu0 %v8996_v2  ;;  %v9085_v2 = vld [vmem:[#allocation2 + $0xa8c] ss:$48 sps:$4 sm:$0xff]  }
  0xa9   :  { %3908 = vmatpush1.bf16.msra.mxu1 %v8992_v63  ;;  %v9077_v63 = vld [vmem:[#allocation2 + $0xa28] ss:$48 sps:$4 sm:$0xff]  }
  0xaa   :  { %3909 = vmatprep.subr.bf16.mxu1 %v9000_v3  ;;  %v9080_v3 = vld [vmem:[#allocation2 + $0xae0] ss:$48 sps:$4 sm:$0xff]  }
  0xab   :  { %3748 = vmatpush1.bf16.msra.mxu0 %v9001_v5  ;;  %v9088_v5 = vld [vmem:[#allocation2 + $0xb44] ss:$48 sps:$4 sm:$0xff]  }
  0xac   :  { %3758 = vmatprep.subr.bf16.mxu0 %v9004_v7  ;;  %v9086_v7 = vld [vmem:[#allocation2 + $0xb40] ss:$48 sps:$4 sm:$0xff]  }
  0xad   :  { %3910 = vmatpush1.bf16.msra.mxu1 %v8998_v4  ;;  %v9083_v4 = vld [vmem:[#allocation2 + $0xa88] ss:$48 sps:$4 sm:$0xff]  }
  0xae   :  { %3911 = vmatprep.subr.bf16.mxu1 %v9007_v8  ;;  %3750 = vmatmul.mubr.bf16.vlgmr.msra.gmra.mrb[0].mxu0 %v10521_v9  ;;  %v9089_v8 = vld [vmem:[#allocation2 + $0xae8] ss:$48 sps:$4 sm:$0xff]  }
  0xaf   :  { %3759 = vmatpush1.bf16.msra.mxu0 %v9002_v11  ;;  %3790 = vmatprep.mubr.bf16.mxu0 %v10528_v36  ;;  %v9094_v11 = vld [vmem:[#allocation2 + $0xba4] ss:$48 sps:$4 sm:$0xff]  }
  0xb0   :  { %3760 = vmatprep.subr.bf16.mxu0 %v9010_v13  ;;  %v9092_v13 = vld [vmem:[#allocation2 + $0xba0] ss:$48 sps:$4 sm:$0xff]  }
  0xb1   :  { %3912 = vmatpush1.bf16.msra.mxu1 %v9005_v12  ;;  %v9097_v12 = vld [vmem:[#allocation2 + $0xb4c] ss:$48 sps:$4 sm:$0xff]  }
  0xb2   :  { %3922 = vmatprep.subr.bf16.mxu1 %v9013_v14  ;;  %v109_v14 = vld [vmem:[%s10739_s0 + $0x10] sm:$0xff] }
  0xb3   :  { %3761 = vmatpush1.bf16.msra.mxu0 %v9008_v15  ;;  %v9095_v15 = vld [vmem:[#allocation2 + $0xb48] ss:$48 sps:$4 sm:$0xff]  }
  0xb4   :  { %3914 = vmatmul.mubr.bf16.vlgmr.msra.gmra.mrb[4].mxu1 %v10521_v9  ;;  %3762 = vmatprep.subr.bf16.mxu0 %v9016_v17  ;;  %v9103_v17 = vld [vmem:[#allocation2 + $0xbac] ss:$48 sps:$4 sm:$0xff]  }
  0xb5   :  { %3923 = vmatpush1.bf16.msra.mxu1 %v9011_v16  ;;  %3954 = vmatprep.mubr.bf16.mxu1 %v10528_v36  ;;  %v9100_v16 = vld [vmem:[#allocation2 + $0xc04] ss:$48 sps:$4 sm:$0xff]  }
  0xb6   :  { %3924 = vmatprep.subr.bf16.mxu1 %v9019_v18  ;;  %v10535_v18 = vpack.c.bf16 %v109_v14, %v109_v14  ;;  %v9176_v14 = vld [vmem:[#allocation2 + $0x10e0] ss:$48 sps:$4 sm:$0xff]  }
  0xb7   :  { %3763 = vmatpush1.bf16.msra.mxu0 %v9014_v19  ;;  %v9098_v19 = vld [vmem:[#allocation2 + $0xc00] ss:$48 sps:$4 sm:$0xff]  }
  0xb8   :  { %3764 = vmatprep.subr.bf16.mxu0 %v9022_v21  ;;  %v9106_v21 = vld [vmem:[#allocation2 + $0xc64] ss:$48 sps:$4 sm:$0xff]  }
  0xb9   :  { %3925 = vmatpush1.bf16.msra.mxu1 %v9017_v20  ;;  %v9101_v20 = vld [vmem:[#allocation2 + $0xba8] ss:$48 sps:$4 sm:$0xff]  }
  0xba   :  { %3926 = vmatprep.subr.bf16.mxu1 %v9025_v22  ;;  %v112_v22 = vld [vmem:[%s10739_s0 + $0x28] sm:$0xff] }
  0xbb   :  { %3765 = vmatpush1.bf16.msra.mxu0 %v9020_v23  ;;  %v9109_v23 = vld [vmem:[#allocation2 + $0xc0c] ss:$48 sps:$4 sm:$0xff]  }
  0xbc   :  { %3766 = vmatprep.subr.bf16.mxu0 %v9028_v25  ;;  %v9104_v25 = vld [vmem:[#allocation2 + $0xc60] ss:$48 sps:$4 sm:$0xff]  }
  0xbd   :  { %3927 = vmatpush1.bf16.msra.mxu1 %v9023_v24  ;;  %v10540_v24 = vpack.c.bf16 %v112_v22, %v112_v22  ;;  %v9193_v22 = vld [vmem:[#allocation2 + $0x114c] ss:$48 sps:$4 sm:$0xff]  }
  0xbe   :  { %3928 = vmatprep.subr.bf16.mxu1 %v9031_v26  ;;  %v9107_v26 = vld [vmem:[#allocation2 + $0xc08] ss:$48 sps:$4 sm:$0xff]  }
  0xbf   :  { %3767 = vmatpush1.bf16.msra.mxu0 %v9026_v27  ;;  %v9112_v27 = vld [vmem:[#allocation2 + $0xcc4] ss:$48 sps:$4 sm:$0xff]  }
  0xc0   :  { %3768 = vmatprep.subr.bf16.mxu0 %v9034_v29  ;;  %v9110_v29 = vld [vmem:[#allocation2 + $0xcc0] ss:$48 sps:$4 sm:$0xff]  }
  0xc1   :  { %3929 = vmatpush1.bf16.msra.mxu1 %v9029_v28  ;;  %v9115_v28 = vld [vmem:[#allocation2 + $0xc6c] ss:$48 sps:$4 sm:$0xff]  }
  0xc2   :  { %3930 = vmatprep.subr.bf16.mxu1 %v9037_v30  ;;  %v9113_v30 = vld [vmem:[#allocation2 + $0xc68] ss:$48 sps:$4 sm:$0xff]  }
  0xc3   :  { %3769 = vmatpush1.bf16.msra.mxu0 %v9032_v31  ;;  %v9118_v31 = vld [vmem:[#allocation2 + $0xd24] ss:$48 sps:$4 sm:$0xff]  }
  0xc4   :  { %3770 = vmatprep.subr.bf16.mxu0 %v9040_v33  ;;  %v9116_v33 = vld [vmem:[#allocation2 + $0xd20] ss:$48 sps:$4 sm:$0xff]  }
  0xc5   :  { %3931 = vmatpush1.bf16.msra.mxu1 %v9035_v32  ;;  %v9121_v32 = vld [vmem:[#allocation2 + $0xccc] ss:$48 sps:$4 sm:$0xff]  }
  0xc6   :  { %3932 = vmatprep.subr.bf16.mxu1 %v9043_v34  ;;  %v9119_v34 = vld [vmem:[#allocation2 + $0xcc8] ss:$48 sps:$4 sm:$0xff]  }
  0xc7   :  { %3771 = vmatpush1.bf16.msra.mxu0 %v9038_v37  ;;  %v9127_v37 = vld [vmem:[#allocation2 + $0xd2c] ss:$48 sps:$4 sm:$0xff]  }
  0xc8   :  { %3772 = vmatprep.subr.bf16.mxu0 %v9046_v39  ;;  %v9125_v39 = vld [vmem:[#allocation2 + $0xd28] ss:$48 sps:$4 sm:$0xff]  }
  0xc9   :  { %3933 = vmatpush1.bf16.msra.mxu1 %v9041_v38  ;;  %v9122_v38 = vld [vmem:[#allocation2 + $0xd80] ss:$48 sps:$4 sm:$0xff]  }
  0xca   :  { %3934 = vmatprep.subr.bf16.mxu1 %v9049_v40  ;;  %v9130_v40 = vld [vmem:[#allocation2 + $0xde4] ss:$48 sps:$4 sm:$0xff]  }
  0xcb   :  { %3773 = vmatpush1.bf16.msra.mxu0 %v9044_v41  ;;  %v9133_v41 = vld [vmem:[#allocation2 + $0xd8c] ss:$48 sps:$4 sm:$0xff]  }
  0xcc   :  { %3774 = vmatprep.subr.bf16.mxu0 %v9052_v43  ;;  %v9131_v43 = vld [vmem:[#allocation2 + $0xd88] ss:$48 sps:$4 sm:$0xff]  }
  0xcd   :  { %3935 = vmatpush1.bf16.msra.mxu1 %v9047_v42  ;;  %v9128_v42 = vld [vmem:[#allocation2 + $0xde0] ss:$48 sps:$4 sm:$0xff]  }
  0xce   :  { %3936 = vmatprep.subr.bf16.mxu1 %v9055_v44  ;;  %v9136_v44 = vld [vmem:[#allocation2 + $0xe44] ss:$48 sps:$4 sm:$0xff]  }
  0xcf   :  { %3775 = vmatpush1.bf16.msra.mxu0 %v9050_v45  ;;  %v9139_v45 = vld [vmem:[#allocation2 + $0xdec] ss:$48 sps:$4 sm:$0xff]  }
  0xd0   :  { %3776 = vmatprep.subr.bf16.mxu0 %v9058_v47  ;;  %v9137_v47 = vld [vmem:[#allocation2 + $0xde8] ss:$48 sps:$4 sm:$0xff]  }
  0xd1   :  { %3937 = vmatpush1.bf16.msra.mxu1 %v9053_v46  ;;  %v9134_v46 = vld [vmem:[#allocation2 + $0xe40] ss:$48 sps:$4 sm:$0xff]  }
  0xd2   :  { %3938 = vmatprep.subr.bf16.mxu1 %v9061_v48  ;;  %v9142_v48 = vld [vmem:[#allocation2 + $0xea4] ss:$48 sps:$4 sm:$0xff]  }
  0xd3   :  { %3777 = vmatpush1.bf16.msra.mxu0 %v9056_v49  ;;  %v9145_v49 = vld [vmem:[#allocation2 + $0xe4c] ss:$48 sps:$4 sm:$0xff]  }
  0xd4   :  { %3778 = vmatprep.subr.bf16.mxu0 %v9064_v52  ;;  %v9143_v52 = vld [vmem:[#allocation2 + $0xe48] ss:$48 sps:$4 sm:$0xff]  }
  0xd5   :  { %3939 = vmatpush1.bf16.msra.mxu1 %v9059_v50  ;;  %v9140_v50 = vld [vmem:[#allocation2 + $0xea0] ss:$48 sps:$4 sm:$0xff]  }
  0xd6   :  { %3940 = vmatprep.subr.bf16.mxu1 %v9067_v53  ;;  %v9148_v53 = vld [vmem:[#allocation2 + $0xf04] ss:$48 sps:$4 sm:$0xff]  }
  0xd7   :  { %3779 = vmatpush1.bf16.msra.mxu0 %v9062_v54  ;;  %v9151_v54 = vld [vmem:[#allocation2 + $0xeac] ss:$48 sps:$4 sm:$0xff]  }
  0xd8   :  { %3780 = vmatprep.subr.bf16.mxu0 %v9070_v56  ;;  %v9149_v56 = vld [vmem:[#allocation2 + $0xea8] ss:$48 sps:$4 sm:$0xff]  }
  0xd9   :  { %3941 = vmatpush1.bf16.msra.mxu1 %v9065_v55  ;;  %v9146_v55 = vld [vmem:[#allocation2 + $0xf00] ss:$48 sps:$4 sm:$0xff]  }
  0xda   :  { %3942 = vmatprep.subr.bf16.mxu1 %v9073_v57  ;;  %v9154_v57 = vld [vmem:[#allocation2 + $0xf64] ss:$48 sps:$4 sm:$0xff]  }
  0xdb   :  { %3781 = vmatpush1.bf16.msra.mxu0 %v9068_v58  ;;  %v9157_v58 = vld [vmem:[#allocation2 + $0xf0c] ss:$48 sps:$4 sm:$0xff]  }
  0xdc   :  { %3782 = vmatprep.subr.bf16.mxu0 %v9076_v60  ;;  %v9155_v60 = vld [vmem:[#allocation2 + $0xf08] ss:$48 sps:$4 sm:$0xff]  }
  0xdd   :  { %3943 = vmatpush1.bf16.msra.mxu1 %v9071_v59  ;;  %v9152_v59 = vld [vmem:[#allocation2 + $0xf60] ss:$48 sps:$4 sm:$0xff]  }
  0xde   :  { %3944 = vmatprep.subr.bf16.mxu1 %v9079_v61  ;;  %v9160_v61 = vld [vmem:[#allocation2 + $0xfc4] ss:$48 sps:$4 sm:$0xff]  }
  0xdf   :  { %3783 = vmatpush1.bf16.msra.mxu0 %v9074_v62  ;;  %v9163_v62 = vld [vmem:[#allocation2 + $0xf6c] ss:$48 sps:$4 sm:$0xff]  }
  0xe0   :  { %3784 = vmatprep.subr.bf16.mxu0 %v9082_v1  ;;  %v9161_v1 = vld [vmem:[#allocation2 + $0xf68] ss:$48 sps:$4 sm:$0xff]  }
  0xe1   :  { %3945 = vmatpush1.bf16.msra.mxu1 %v9077_v63  ;;  %v9158_v63 = vld [vmem:[#allocation2 + $0xfc0] ss:$48 sps:$4 sm:$0xff]  }
  0xe2   :  { %3946 = vmatprep.subr.bf16.mxu1 %v9085_v2  ;;  %v9166_v2 = vld [vmem:[#allocation2 + $0x1024] ss:$48 sps:$4 sm:$0xff]  }
  0xe3   :  { %3785 = vmatpush1.bf16.msra.mxu0 %v9080_v3  ;;  %v9169_v3 = vld [vmem:[#allocation2 + $0xfcc] ss:$48 sps:$4 sm:$0xff]  }
  0xe4   :  { %3786 = vmatprep.subr.bf16.mxu0 %v9088_v5  ;;  %v9167_v5 = vld [vmem:[#allocation2 + $0xfc8] ss:$48 sps:$4 sm:$0xff]  }
  0xe5   :  { %3947 = vmatpush1.bf16.msra.mxu1 %v9083_v4  ;;  %v9164_v4 = vld [vmem:[#allocation2 + $0x1020] ss:$48 sps:$4 sm:$0xff]  }
  0xe6   :  { %3948 = vmatprep.subr.bf16.mxu1 %v9091_v6  ;;  %v9172_v6 = vld [vmem:[#allocation2 + $0x1084] ss:$48 sps:$4 sm:$0xff]  }
  0xe7   :  { %3787 = vmatpush1.bf16.msra.mxu0 %v9086_v7  ;;  %v9175_v7 = vld [vmem:[#allocation2 + $0x102c] ss:$48 sps:$4 sm:$0xff]  }
  0xe8   :  { %3788 = vmatprep.subr.bf16.mxu0 %v9094_v11  ;;  %v9173_v11 = vld [vmem:[#allocation2 + $0x1028] ss:$48 sps:$4 sm:$0xff]  }
  0xe9   :  { %3949 = vmatpush1.bf16.msra.mxu1 %v9089_v8  ;;  %v9170_v8 = vld [vmem:[#allocation2 + $0x1080] ss:$48 sps:$4 sm:$0xff]  }
  0xea   :  { %3950 = vmatprep.subr.bf16.mxu1 %v9097_v12  ;;  %v9178_v12 = vld [vmem:[#allocation2 + $0x10e4] ss:$48 sps:$4 sm:$0xff]  }
  0xeb   :  { %3789 = vmatpush1.bf16.msra.mxu0 %v9092_v13  ;;  %v9181_v13 = vld [vmem:[#allocation2 + $0x108c] ss:$48 sps:$4 sm:$0xff]  }
  0xec   :  { %3799 = vmatprep.subr.bf16.mxu0 %v9100_v16  ;;  %v9184_v16 = vld [vmem:[#allocation2 + $0x1144] ss:$48 sps:$4 sm:$0xff]  }
  0xed   :  { %3951 = vmatpush1.bf16.msra.mxu1 %v9095_v15  ;;  %v9179_v15 = vld [vmem:[#allocation2 + $0x1088] ss:$48 sps:$4 sm:$0xff]  }
  0xee   :  { %3952 = vmatprep.subr.bf16.mxu1 %v9103_v17  ;;  %3791 = vmatmul.mubr.bf16.vlgmr.msra.gmra.mrb[0].mxu0 %v10535_v18  ;;  %v9187_v17 = vld [vmem:[#allocation2 + $0x10ec] ss:$48 sps:$4 sm:$0xff]  }
  0xef   :  { %3800 = vmatpush1.bf16.msra.mxu0 %v9098_v19  ;;  %3831 = vmatprep.mubr.bf16.mxu0 %v10540_v24  ;;  %v9182_v19 = vld [vmem:[#allocation2 + $0x1140] ss:$48 sps:$4 sm:$0xff]  }
  0xf0   :  { %3801 = vmatprep.subr.bf16.mxu0 %v9106_v21  ;;  %v9190_v21 = vld [vmem:[#allocation2 + $0x11a4] ss:$48 sps:$4 sm:$0xff]  }
  0xf1   :  { %3953 = vmatpush1.bf16.msra.mxu1 %v9101_v20  ;;  %v9185_v20 = vld [vmem:[#allocation2 + $0x10e8] ss:$48 sps:$4 sm:$0xff]  }
  0xf2   :  { %3963 = vmatprep.subr.bf16.mxu1 %v9109_v23  ;;  %v9188_v23 = vld [vmem:[#allocation2 + $0x11a0] ss:$48 sps:$4 sm:$0xff]  }
  0xf3   :  { %3802 = vmatpush1.bf16.msra.mxu0 %v9104_v25  ;;  %v9191_v25 = vld [vmem:[#allocation2 + $0x1148] ss:$48 sps:$4 sm:$0xff]  }
  0xf4   :  { %3955 = vmatmul.mubr.bf16.vlgmr.msra.gmra.mrb[4].mxu1 %v10535_v18  ;;  %3803 = vmatprep.subr.bf16.mxu0 %v9112_v27  ;;  %v9199_v27 = vld [vmem:[#allocation2 + $0x14] ss:$48 sps:$4 sm:$0xff]  }
  0xf5   :  { %3964 = vmatpush1.bf16.msra.mxu1 %v9107_v26  ;;  %3995 = vmatprep.mubr.bf16.mxu1 %v10540_v24  ;;  %v111_v26 = vld [vmem:[%s10739_s0 + $0x20] sm:$0xff] }
  0xf6   :  { %3965 = vmatprep.subr.bf16.mxu1 %v9115_v28  ;;  %v9196_v28 = vld [vmem:[#allocation2 + $0x11ac] ss:$48 sps:$4 sm:$0xff]  }
  0xf7   :  { %3804 = vmatpush1.bf16.msra.mxu0 %v9110_v29  ;;  %v10549_v29 = vpack.c.bf16 %v111_v26, %v111_v26  ;;  %v9271_v26 = vld [vmem:[#allocation2 + $0x31c] ss:$48 sps:$4 sm:$0xff]  }
  0xf8   :  { %3805 = vmatprep.subr.bf16.mxu0 %v9118_v31  ;;  %v9197_v31 = vld [vmem:[#allocation2 + $0x10] ss:$48 sps:$4 sm:$0xff]  }
  0xf9   :  { %3966 = vmatpush1.bf16.msra.mxu1 %v9113_v30  ;;  %v9194_v30 = vld [vmem:[#allocation2 + $0x11a8] ss:$48 sps:$4 sm:$0xff]  }
  0xfa   :  { %3967 = vmatprep.subr.bf16.mxu1 %v9121_v32  ;;  %v9202_v32 = vld [vmem:[#allocation2 + $0x74] ss:$48 sps:$4 sm:$0xff]  }
  0xfb   :  { %3806 = vmatpush1.bf16.msra.mxu0 %v9116_v33  ;;  %v9208_v33 = vld [vmem:[#allocation2 + $0x120c] ss:$48 sps:$4 sm:$0xff]  }
  0xfc   :  { %3807 = vmatprep.subr.bf16.mxu0 %v9124_v35  ;;  %v9205_v35 = vld [vmem:[#allocation2 + $0xd4] ss:$48 sps:$4 sm:$0xff]  }
  0xfd   :  { %3968 = vmatpush1.bf16.msra.mxu1 %v9119_v34  ;;  %v9200_v34 = vld [vmem:[#allocation2 + $0x70] ss:$48 sps:$4 sm:$0xff]  }
  0xfe   :  { %3969 = vmatprep.subr.bf16.mxu1 %v9127_v37  ;;  %v9206_v37 = vld [vmem:[#allocation2 + $0x1208] ss:$48 sps:$4 sm:$0xff]  }
  0xff   :  { %3808 = vmatpush1.bf16.msra.mxu0 %v9122_v38  ;;  %v9217_v38 = vld [vmem:[#allocation2 + $0x1214] ss:$48 sps:$4 sm:$0xff]  }
 0x100   :  { %3809 = vmatprep.subr.bf16.mxu0 %v9130_v40  ;;  %v9211_v40 = vld [vmem:[#allocation2 + $0x134] ss:$48 sps:$4 sm:$0xff]  }
 0x101   :  { %3970 = vmatpush1.bf16.msra.mxu1 %v9125_v39  ;;  %v9203_v39 = vld [vmem:[#allocation2 + $0xd0] ss:$48 sps:$4 sm:$0xff]  }
 0x102   :  { %3971 = vmatprep.subr.bf16.mxu1 %v9133_v41  ;;  %v9209_v41 = vld [vmem:[#allocation2 + $0x130] ss:$48 sps:$4 sm:$0xff]  }
 0x103   :  { %3810 = vmatpush1.bf16.msra.mxu0 %v9128_v42  ;;  %v9214_v42 = vld [vmem:[#allocation2 + $0x194] ss:$48 sps:$4 sm:$0xff]  }
 0x104   :  { %3811 = vmatprep.subr.bf16.mxu0 %v9136_v44  ;;  %v9215_v44 = vld [vmem:[#allocation2 + $0x1210] ss:$48 sps:$4 sm:$0xff]  }
 0x105   :  { %3972 = vmatpush1.bf16.msra.mxu1 %v9131_v43  ;;  %v9212_v43 = vld [vmem:[#allocation2 + $0x190] ss:$48 sps:$4 sm:$0xff]  }
 0x106   :  { %3973 = vmatprep.subr.bf16.mxu1 %v9139_v45  ;;  %v9220_v45 = vld [vmem:[#allocation2 + $0x1f4] ss:$48 sps:$4 sm:$0xff]  }
 0x107   :  { %3812 = vmatpush1.bf16.msra.mxu0 %v9134_v46  ;;  %v9223_v46 = vld [vmem:[#allocation2 + $0x1c] ss:$48 sps:$4 sm:$0xff]  }
 0x108   :  { %3813 = vmatprep.subr.bf16.mxu0 %v9142_v48  ;;  %v9226_v48 = vld [vmem:[#allocation2 + $0x254] ss:$48 sps:$4 sm:$0xff]  }
 0x109   :  { %3974 = vmatpush1.bf16.msra.mxu1 %v9137_v47  ;;  %v9218_v47 = vld [vmem:[#allocation2 + $0x1f0] ss:$48 sps:$4 sm:$0xff]  }
 0x10a   :  { %3975 = vmatprep.subr.bf16.mxu1 %v9145_v49  ;;  %v9221_v49 = vld [vmem:[#allocation2 + $0x18] ss:$48 sps:$4 sm:$0xff]  }
 0x10b   :  { %3814 = vmatpush1.bf16.msra.mxu0 %v9140_v50  ;;  %v9224_v50 = vld [vmem:[#allocation2 + $0x250] ss:$48 sps:$4 sm:$0xff]  }
 0x10c   :  { %3815 = vmatprep.subr.bf16.mxu0 %v9148_v53  ;;  %v9229_v53 = vld [vmem:[#allocation2 + $0x7c] ss:$48 sps:$4 sm:$0xff]  }
 0x10d   :  { %3976 = vmatpush1.bf16.msra.mxu1 %v9143_v52  ;;  %v9232_v52 = vld [vmem:[#allocation2 + $0x2b4] ss:$48 sps:$4 sm:$0xff]  }
 0x10e   :  { %3977 = vmatprep.subr.bf16.mxu1 %v9151_v54 }
 0x10f   :  { %3816 = vmatpush1.bf16.msra.mxu0 %v9146_v55  ;;  %v9227_v55 = vld [vmem:[#allocation2 + $0x78] ss:$48 sps:$4 sm:$0xff]  }
 0x110   :  { %3817 = vmatprep.subr.bf16.mxu0 %v9154_v57 }
 0x111   :  { %3978 = vmatpush1.bf16.msra.mxu1 %v9149_v56  ;;  %v9230_v56 = vld [vmem:[#allocation2 + $0x2b0] ss:$48 sps:$4 sm:$0xff]  }
 0x112   :  { %3979 = vmatprep.subr.bf16.mxu1 %v9157_v58  ;;  %v9238_v58 = vld [vmem:[#allocation2 + $0x314] ss:$48 sps:$4 sm:$0xff]  }
 0x113   :  { %3818 = vmatpush1.bf16.msra.mxu0 %v9152_v59 }
 0x114   :  { %3819 = vmatprep.subr.bf16.mxu0 %v9160_v61 }
 0x115   :  { %3980 = vmatpush1.bf16.msra.mxu1 %v9155_v60  ;;  %v9235_v60 = vld [vmem:[#allocation2 + $0xdc] ss:$48 sps:$4 sm:$0xff]  }
 0x116   :  { %3981 = vmatprep.subr.bf16.mxu1 %v9163_v62  ;;  %v9233_v62 = vld [vmem:[#allocation2 + $0xd8] ss:$48 sps:$4 sm:$0xff]  }
 0x117   :  { %3820 = vmatpush1.bf16.msra.mxu0 %v9158_v63  ;;  %v9236_v63 = vld [vmem:[#allocation2 + $0x310] ss:$48 sps:$4 sm:$0xff]  }
 0x118   :  { %3821 = vmatprep.subr.bf16.mxu0 %v9166_v2  ;;  %v9241_v2 = vld [vmem:[#allocation2 + $0x13c] ss:$48 sps:$4 sm:$0xff]  }
 0x119   :  { %3982 = vmatpush1.bf16.msra.mxu1 %v9161_v1  ;;  %v9244_v1 = vld [vmem:[#allocation2 + $0x374] ss:$48 sps:$4 sm:$0xff]  }
 0x11a   :  { %3983 = vmatprep.subr.bf16.mxu1 %v9169_v3  ;;  %v9239_v3 = vld [vmem:[#allocation2 + $0x138] ss:$48 sps:$4 sm:$0xff]  }
 0x11b   :  { %3822 = vmatpush1.bf16.msra.mxu0 %v9164_v4  ;;  %v9242_v4 = vld [vmem:[#allocation2 + $0x370] ss:$48 sps:$4 sm:$0xff]  }
 0x11c   :  { %3823 = vmatprep.subr.bf16.mxu0 %v9172_v6  ;;  %v9247_v6 = vld [vmem:[#allocation2 + $0x19c] ss:$48 sps:$4 sm:$0xff]  }
 0x11d   :  { %3984 = vmatpush1.bf16.msra.mxu1 %v9167_v5  ;;  %v9250_v5 = vld [vmem:[#allocation2 + $0x3d4] ss:$48 sps:$4 sm:$0xff]  }
 0x11e   :  { %3985 = vmatprep.subr.bf16.mxu1 %v9175_v7  ;;  %v9245_v7 = vld [vmem:[#allocation2 + $0x198] ss:$48 sps:$4 sm:$0xff]  }
 0x11f   :  { %3824 = vmatpush1.bf16.msra.mxu0 %v9170_v8  ;;  %v9248_v8 = vld [vmem:[#allocation2 + $0x3d0] ss:$48 sps:$4 sm:$0xff]  }
 0x120   :  { %3825 = vmatprep.subr.bf16.mxu0 %v9178_v12  ;;  %v9253_v12 = vld [vmem:[#allocation2 + $0x1fc] ss:$48 sps:$4 sm:$0xff]  }
 0x121   :  { %3986 = vmatpush1.bf16.msra.mxu1 %v9173_v11  ;;  %v9256_v11 = vld [vmem:[#allocation2 + $0x434] ss:$48 sps:$4 sm:$0xff]  }
 0x122   :  { %3987 = vmatprep.subr.bf16.mxu1 %v9181_v13  ;;  %v9251_v13 = vld [vmem:[#allocation2 + $0x1f8] ss:$48 sps:$4 sm:$0xff]  }
 0x123   :  { %3826 = vmatpush1.bf16.msra.mxu0 %v9176_v14  ;;  %v9254_v14 = vld [vmem:[#allocation2 + $0x430] ss:$48 sps:$4 sm:$0xff]  }
 0x124   :  { %3827 = vmatprep.subr.bf16.mxu0 %v9184_v16  ;;  %v9259_v16 = vld [vmem:[#allocation2 + $0x25c] ss:$48 sps:$4 sm:$0xff]  }
 0x125   :  { %3988 = vmatpush1.bf16.msra.mxu1 %v9179_v15  ;;  %v9262_v15 = vld [vmem:[#allocation2 + $0x494] ss:$48 sps:$4 sm:$0xff]  }
 0x126   :  { %3989 = vmatprep.subr.bf16.mxu1 %v9187_v17  ;;  %v9257_v17 = vld [vmem:[#allocation2 + $0x258] ss:$48 sps:$4 sm:$0xff]  }
 0x127   :  { %3828 = vmatpush1.bf16.msra.mxu0 %v9182_v19  ;;  %v9260_v19 = vld [vmem:[#allocation2 + $0x490] ss:$48 sps:$4 sm:$0xff]  }
 0x128   :  { %3829 = vmatprep.subr.bf16.mxu0 %v9190_v21  ;;  %v9265_v21 = vld [vmem:[#allocation2 + $0x2bc] ss:$48 sps:$4 sm:$0xff]  }
 0x129   :  { %3990 = vmatpush1.bf16.msra.mxu1 %v9185_v20  ;;  %v9268_v20 = vld [vmem:[#allocation2 + $0x4f4] ss:$48 sps:$4 sm:$0xff]  }
 0x12a   :  { %3991 = vmatprep.subr.bf16.mxu1 %v9193_v22  ;;  %v9263_v22 = vld [vmem:[#allocation2 + $0x2b8] ss:$48 sps:$4 sm:$0xff]  }
 0x12b   :  { %3830 = vmatpush1.bf16.msra.mxu0 %v9188_v23  ;;  %v9266_v23 = vld [vmem:[#allocation2 + $0x4f0] ss:$48 sps:$4 sm:$0xff]  }
 0x12c   :  { %4045 = vmatprep.subr.bf16.mxu0 %v9199_v27  ;;  %v9269_v27 = vld [vmem:[#allocation2 + $0x318] ss:$48 sps:$4 sm:$0xff]  }
 0x12d   :  { %3992 = vmatpush1.bf16.msra.mxu1 %v9191_v25  ;;  %v9274_v25 = vld [vmem:[#allocation2 + $0x554] ss:$48 sps:$4 sm:$0xff]  }
 0x12e   :  { %3993 = vmatprep.subr.bf16.mxu1 %v9196_v28  ;;  %3832 = vmatmul.mubr.bf16.vlgmr.msra.gmra.mrb[0].mxu0 %v10549_v29  ;;  %v9272_v28 = vld [vmem:[#allocation2 + $0x550] ss:$48 sps:$4 sm:$0xff]  }
 0x12f   :  { %4046 = vmatpush1.bf16.msra.mxu0 %v9197_v31  ;;  %4077 = vmatprep.mubr.bf16.mxu0 %v10514_v51  ;;  %v9277_v31 = vld [vmem:[#allocation2 + $0x37c] ss:$48 sps:$4 sm:$0xff]  }
 0x130   :  { %4047 = vmatprep.subr.bf16.mxu0 %v9202_v32  ;;  %v9278_v32 = vld [vmem:[#allocation2 + $0x5b0] ss:$48 sps:$4 sm:$0xff]  }
 0x131   :  { %3994 = vmatpush1.bf16.msra.mxu1 %v9194_v30  ;;  %v9280_v30 = vld [vmem:[#allocation2 + $0x5b4] ss:$48 sps:$4 sm:$0xff]  }
 0x132   :  { %4004 = vmatprep.subr.bf16.mxu1 %v9208_v33  ;;  %v9275_v33 = vld [vmem:[#allocation2 + $0x378] ss:$48 sps:$4 sm:$0xff]  }
 0x133   :  { %4048 = vmatpush1.bf16.msra.mxu0 %v9200_v34  ;;  %v9286_v34 = vld [vmem:[#allocation2 + $0x614] ss:$48 sps:$4 sm:$0xff]  }
 0x134   :  { %3996 = vmatmul.mubr.bf16.vlgmr.msra.gmra.mrb[4].mxu1 %v10549_v29  ;;  %4049 = vmatprep.subr.bf16.mxu0 %v9205_v35  ;;  %v9283_v35 = vld [vmem:[#allocation2 + $0x3dc] ss:$48 sps:$4 sm:$0xff]  }
 0x135   :  { %4005 = vmatpush1.bf16.msra.mxu1 %v9206_v37  ;;  %4036 = vmatprep.mubr.bf16.mxu1 %v10365_v0  ;;  %v9284_v37 = vld [vmem:[#allocation2 + $0x610] ss:$48 sps:$4 sm:$0xff]  }
 0x136   :  { %4168 = vmatprep.subr.bf16.mxu1 %v9217_v38  ;;  %v9281_v38 = vld [vmem:[#allocation2 + $0x3d8] ss:$48 sps:$4 sm:$0xff]  }
 0x137   :  { %4050 = vmatpush1.bf16.msra.mxu0 %v9203_v39  ;;  %v9289_v39 = vld [vmem:[#allocation2 + $0x43c] ss:$48 sps:$4 sm:$0xff]  }
 0x138   :  { %4051 = vmatprep.subr.bf16.mxu0 %v9211_v40  ;;  %v9292_v40 = vld [vmem:[#allocation2 + $0x674] ss:$48 sps:$4 sm:$0xff]  }
 0x13b   :  { %4052 = vmatpush1.bf16.msra.mxu0 %v9209_v41  ;;  %v9287_v41 = vld [vmem:[#allocation2 + $0x438] ss:$48 sps:$4 sm:$0xff]  }
 0x13c   :  { %4053 = vmatprep.subr.bf16.mxu0 %v9214_v42  ;;  %v9290_v42 = vld [vmem:[#allocation2 + $0x670] ss:$48 sps:$4 sm:$0xff]  }
 0x13f   :  { %4054 = vmatpush1.bf16.msra.mxu0 %v9212_v43  ;;  %v9295_v43 = vld [vmem:[#allocation2 + $0x49c] ss:$48 sps:$4 sm:$0xff]  }
 0x140   :  { %8219 = vmatmul.mubr.msk.bf16.vlgmr.msra.gmra.mrb[4].mxu1 %vm3713_vm0, %v10507_v10  ;;  %4055 = vmatprep.subr.bf16.mxu0 %v9220_v45  ;;  %v9293_v45 = vld [vmem:[#allocation2 + $0x498] ss:$48 sps:$4 sm:$0xff]  }
 0x141   :  { %4169 = vmatpush1.bf16.msra.mxu1 %v9215_v44  ;;  %4200 = vmatprep.mubr.bf16.mxu1 %v10365_v0  ;;  %v9298_v44 = vld [vmem:[#allocation2 + $0x6d4] ss:$48 sps:$4 sm:$0xff]  }
 0x142   :  { %4209 = vmatprep.subr.bf16.mxu1 %v9223_v46  ;;  %v9296_v46 = vld [vmem:[#allocation2 + $0x6d0] ss:$48 sps:$4 sm:$0xff]  }
 0x143   :  { %4056 = vmatpush1.bf16.msra.mxu0 %v9218_v47  ;;  %v9301_v47 = vld [vmem:[#allocation2 + $0x4fc] ss:$48 sps:$4 sm:$0xff]  }
 0x144   :  { %4057 = vmatprep.subr.bf16.mxu0 %v9226_v48  ;;  %v9304_v48 = vld [vmem:[#allocation2 + $0x734] ss:$48 sps:$4 sm:$0xff]  }
 0x147   :  { %v10558_v54 = vpop.f32.mrb[0].mxu1  ;;  %4058 = vmatpush1.bf16.msra.mxu0 %v9224_v50  ;;  %v9302_v50 = vld [vmem:[#allocation2 + $0x730] ss:$48 sps:$4 sm:$0xff]  }
 0x148   :  { %8220 = vmatmul.mubr.msk.bf16.vlgmr.msra.gmra.mrb[8].mxu1 %vm3713_vm0, %v10507_v10  ;;  %v10562_v57 = vpop.f32.mrb[1].mxu1  ;;  %4059 = vmatprep.subr.bf16.mxu0 %v9232_v52  ;;  %v9307_v52 = vld [vmem:[#allocation2 + $0x55c] ss:$48 sps:$4 sm:$0xff]  }
 0x149   :  { %4210 = vmatpush1.bf16.msra.mxu1 %v9221_v49  ;;  %v3878_v59 = vpop.f32.mrb[2].mxu1  ;;  %4241 = vmatprep.mubr.bf16.mxu1 %v10514_v51  ;;  %v9299_v49 = vld [vmem:[#allocation2 + $0x4f8] ss:$48 sps:$4 sm:$0xff]  }
 0x14a   :  { %4211 = vmatprep.subr.bf16.mxu1 %v9229_v53  ;;  %v3879_v61 = vpop.f32.mrb[3].mxu1  ;;  %v9310_v53 = vld [vmem:[#allocation2 + $0x794] ss:$48 sps:$4 sm:$0xff]  }
 0x14b   :  { %4060 = vmatpush1.bf16.msra.mxu0 %v9230_v56  ;;  %v9308_v56 = vld [vmem:[#allocation2 + $0x790] ss:$48 sps:$4 sm:$0xff]   ;;  %v9316_v59 = vld [vmem:[#allocation2 + $0x7f4] ss:$48 sps:$4 sm:$0xff]  }
 0x14c   :  { %4061 = vmatprep.subr.bf16.mxu0 %v9238_v58  ;;  %v9313_v58 = vld [vmem:[#allocation2 + $0x5bc] ss:$48 sps:$4 sm:$0xff]   ;;  %v9314_v61 = vld [vmem:[#allocation2 + $0x7f0] ss:$48 sps:$4 sm:$0xff]  }
 0x14d   :  { %4212 = vmatpush1.bf16.msra.mxu1 %v9227_v55  ;;  %v9305_v55 = vld [vmem:[#allocation2 + $0x558] ss:$48 sps:$4 sm:$0xff]  }
 0x14e   :  { %4213 = vmatprep.subr.bf16.mxu1 %v9235_v60  ;;  %v9311_v60 = vld [vmem:[#allocation2 + $0x5b8] ss:$48 sps:$4 sm:$0xff]  }
 0x14f   :  { %4062 = vmatpush1.bf16.msra.mxu0 %v9236_v63  ;;  %v9319_v63 = vld [vmem:[#allocation2 + $0x61c] ss:$48 sps:$4 sm:$0xff]  }
 0x150   :  { %4063 = vmatprep.subr.bf16.mxu0 %v9244_v1  ;;  %v9317_v1 = vld [vmem:[#allocation2 + $0x618] ss:$48 sps:$4 sm:$0xff]  }
 0x151   :  { %4214 = vmatpush1.bf16.msra.mxu1 %v9233_v62  ;;  %v9322_v62 = vld [vmem:[#allocation2 + $0x854] ss:$48 sps:$4 sm:$0xff]  }
 0x152   :  { %4215 = vmatprep.subr.bf16.mxu1 %v9241_v2  ;;  %v9320_v2 = vld [vmem:[#allocation2 + $0x850] ss:$48 sps:$4 sm:$0xff]  }
 0x153   :  { %4064 = vmatpush1.bf16.msra.mxu0 %v9242_v4  ;;  %v9328_v4 = vld [vmem:[#allocation2 + $0x8b4] ss:$48 sps:$4 sm:$0xff]  }
 0x154   :  { %4065 = vmatprep.subr.bf16.mxu0 %v9250_v5  ;;  %v9323_v5 = vld [vmem:[#allocation2 + $0x678] ss:$48 sps:$4 sm:$0xff]  }
 0x155   :  { %4216 = vmatpush1.bf16.msra.mxu1 %v9239_v3  ;;  %v9325_v3 = vld [vmem:[#allocation2 + $0x67c] ss:$48 sps:$4 sm:$0xff]  }
 0x156   :  { %4217 = vmatprep.subr.bf16.mxu1 %v9247_v6  ;;  %v9326_v6 = vld [vmem:[#allocation2 + $0x8b0] ss:$48 sps:$4 sm:$0xff]  }
 0x157   :  { %4066 = vmatpush1.bf16.msra.mxu0 %v9248_v8  ;;  %v9331_v8 = vld [vmem:[#allocation2 + $0x6dc] ss:$48 sps:$4 sm:$0xff]  }
 0x158   :  { %4067 = vmatprep.subr.bf16.mxu0 %v9256_v11  ;;  %v9329_v11 = vld [vmem:[#allocation2 + $0x6d8] ss:$48 sps:$4 sm:$0xff]  }
 0x159   :  { %4218 = vmatpush1.bf16.msra.mxu1 %v9245_v7  ;;  %v9334_v7 = vld [vmem:[#allocation2 + $0x914] ss:$48 sps:$4 sm:$0xff]  }
 0x15a   :  { %4219 = vmatprep.subr.bf16.mxu1 %v9253_v12  ;;  %v9332_v12 = vld [vmem:[#allocation2 + $0x910] ss:$48 sps:$4 sm:$0xff]  }
 0x15b   :  { %4068 = vmatpush1.bf16.msra.mxu0 %v9254_v14  ;;  %v9340_v14 = vld [vmem:[#allocation2 + $0x974] ss:$48 sps:$4 sm:$0xff]  }
 0x15c   :  { %4069 = vmatprep.subr.bf16.mxu0 %v9262_v15  ;;  %v9338_v15 = vld [vmem:[#allocation2 + $0x970] ss:$48 sps:$4 sm:$0xff]  }
 0x15d   :  { %4220 = vmatpush1.bf16.msra.mxu1 %v9251_v13  ;;  %v9337_v13 = vld [vmem:[#allocation2 + $0x73c] ss:$48 sps:$4 sm:$0xff]  }
 0x15e   :  { %4221 = vmatprep.subr.bf16.mxu1 %v9259_v16  ;;  %v9335_v16 = vld [vmem:[#allocation2 + $0x738] ss:$48 sps:$4 sm:$0xff]  }
 0x15f   :  { %4070 = vmatpush1.bf16.msra.mxu0 %v9260_v19  ;;  %v9343_v19 = vld [vmem:[#allocation2 + $0x79c] ss:$48 sps:$4 sm:$0xff]  }
 0x160   :  { %4071 = vmatprep.subr.bf16.mxu0 %v9268_v20  ;;  %v9341_v20 = vld [vmem:[#allocation2 + $0x798] ss:$48 sps:$4 sm:$0xff]  }
 0x161   :  { %4222 = vmatpush1.bf16.msra.mxu1 %v9257_v17  ;;  %v9346_v17 = vld [vmem:[#allocation2 + $0x9d4] ss:$48 sps:$4 sm:$0xff]  }
 0x162   :  { %4223 = vmatprep.subr.bf16.mxu1 %v9265_v21  ;;  %v9344_v21 = vld [vmem:[#allocation2 + $0x9d0] ss:$48 sps:$4 sm:$0xff]  }
 0x163   :  { %4072 = vmatpush1.bf16.msra.mxu0 %v9266_v23  ;;  %v9349_v23 = vld [vmem:[#allocation2 + $0x7fc] ss:$48 sps:$4 sm:$0xff]  }
 0x164   :  { %4073 = vmatprep.subr.bf16.mxu0 %v9274_v25  ;;  %v9347_v25 = vld [vmem:[#allocation2 + $0x7f8] ss:$48 sps:$4 sm:$0xff]  }
 0x165   :  { %4224 = vmatpush1.bf16.msra.mxu1 %v9263_v22  ;;  %v9352_v22 = vld [vmem:[#allocation2 + $0xa34] ss:$48 sps:$4 sm:$0xff]  }
 0x166   :  { %4225 = vmatprep.subr.bf16.mxu1 %v9271_v26  ;;  %v9350_v26 = vld [vmem:[#allocation2 + $0xa30] ss:$48 sps:$4 sm:$0xff]  }
 0x167   :  { %4074 = vmatpush1.bf16.msra.mxu0 %v9272_v28  ;;  %v9358_v28 = vld [vmem:[#allocation2 + $0xa94] ss:$48 sps:$4 sm:$0xff]  }
 0x168   :  { %4075 = vmatprep.subr.bf16.mxu0 %v9280_v30  ;;  %v9356_v30 = vld [vmem:[#allocation2 + $0xa90] ss:$48 sps:$4 sm:$0xff]  }
 0x169   :  { %4226 = vmatpush1.bf16.msra.mxu1 %v9269_v27  ;;  %v9355_v27 = vld [vmem:[#allocation2 + $0x85c] ss:$48 sps:$4 sm:$0xff]  }
 0x16a   :  { %4227 = vmatprep.subr.bf16.mxu1 %v9277_v31  ;;  %v9353_v31 = vld [vmem:[#allocation2 + $0x858] ss:$48 sps:$4 sm:$0xff]  }
 0x16b   :  { %4076 = vmatpush1.bf16.msra.mxu0 %v9278_v32  ;;  %v9361_v32 = vld [vmem:[#allocation2 + $0x8bc] ss:$48 sps:$4 sm:$0xff]  }
 0x16c   :  { %4086 = vmatprep.subr.bf16.mxu0 %v9286_v34  ;;  %v9362_v34 = vld [vmem:[#allocation2 + $0xaf0] ss:$48 sps:$4 sm:$0xff]  }
 0x16d   :  { %4228 = vmatpush1.bf16.msra.mxu1 %v9275_v33  ;;  %v9364_v33 = vld [vmem:[#allocation2 + $0xaf4] ss:$48 sps:$4 sm:$0xff]  }
 0x16e   :  { %4229 = vmatprep.subr.bf16.mxu1 %v9283_v35  ;;  %4078 = vmatmul.mubr.bf16.vlgmr.msra.gmra.mrb[4].mxu0 %v10521_v9  ;;  %v9359_v35 = vld [vmem:[#allocation2 + $0x8b8] ss:$48 sps:$4 sm:$0xff]  }
 0x16f   :  { %4087 = vmatpush1.bf16.msra.mxu0 %v9284_v37  ;;  %4118 = vmatprep.mubr.bf16.mxu0 %v10528_v36  ;;  %v9367_v37 = vld [vmem:[#allocation2 + $0x91c] ss:$48 sps:$4 sm:$0xff]  }
 0x170   :  { %4088 = vmatprep.subr.bf16.mxu0 %v9292_v40  ;;  %v9365_v40 = vld [vmem:[#allocation2 + $0x918] ss:$48 sps:$4 sm:$0xff]  }
 0x171   :  { %4230 = vmatpush1.bf16.msra.mxu1 %v9281_v38  ;;  %v9370_v38 = vld [vmem:[#allocation2 + $0xb54] ss:$48 sps:$4 sm:$0xff]  }
 0x172   :  { %4231 = vmatprep.subr.bf16.mxu1 %v9289_v39  ;;  %v9368_v39 = vld [vmem:[#allocation2 + $0xb50] ss:$48 sps:$4 sm:$0xff]  }
 0x173   :  { %4089 = vmatpush1.bf16.msra.mxu0 %v9290_v42  ;;  %v9376_v42 = vld [vmem:[#allocation2 + $0xbb4] ss:$48 sps:$4 sm:$0xff]  }
 0x174   :  { %4090 = vmatprep.subr.bf16.mxu0 %v9298_v44  ;;  %v9371_v44 = vld [vmem:[#allocation2 + $0x978] ss:$48 sps:$4 sm:$0xff]  }
 0x175   :  { %4232 = vmatpush1.bf16.msra.mxu1 %v9287_v41  ;;  %v9373_v41 = vld [vmem:[#allocation2 + $0x97c] ss:$48 sps:$4 sm:$0xff]  }
 0x176   :  { %4233 = vmatprep.subr.bf16.mxu1 %v9295_v43  ;;  %v9374_v43 = vld [vmem:[#allocation2 + $0xbb0] ss:$48 sps:$4 sm:$0xff]  }
 0x177   :  { %4091 = vmatpush1.bf16.msra.mxu0 %v9296_v46  ;;  %v9382_v46 = vld [vmem:[#allocation2 + $0xc14] ss:$48 sps:$4 sm:$0xff]  }
 0x178   :  { %4092 = vmatprep.subr.bf16.mxu0 %v9304_v48  ;;  %v9377_v48 = vld [vmem:[#allocation2 + $0x9d8] ss:$48 sps:$4 sm:$0xff]  }
 0x179   :  { %4234 = vmatpush1.bf16.msra.mxu1 %v9293_v45  ;;  %v9379_v45 = vld [vmem:[#allocation2 + $0x9dc] ss:$48 sps:$4 sm:$0xff]  }
 0x17a   :  { %4235 = vmatprep.subr.bf16.mxu1 %v9301_v47  ;;  %v9380_v47 = vld [vmem:[#allocation2 + $0xc10] ss:$48 sps:$4 sm:$0xff]  }
 0x17b   :  { %4093 = vmatpush1.bf16.msra.mxu0 %v9302_v50  ;;  %v9388_v50 = vld [vmem:[#allocation2 + $0xc74] ss:$48 sps:$4 sm:$0xff]  }
 0x17c   :  { %4094 = vmatprep.subr.bf16.mxu0 %v9310_v53  ;;  %v9383_v53 = vld [vmem:[#allocation2 + $0xa38] ss:$48 sps:$4 sm:$0xff]  }
 0x17d   :  { %4236 = vmatpush1.bf16.msra.mxu1 %v9299_v49  ;;  %v9385_v49 = vld [vmem:[#allocation2 + $0xa3c] ss:$48 sps:$4 sm:$0xff]  }
 0x17e   :  { %4237 = vmatprep.subr.bf16.mxu1 %v9307_v52  ;;  %v9386_v52 = vld [vmem:[#allocation2 + $0xc70] ss:$48 sps:$4 sm:$0xff]  }
 0x17f   :  { %4095 = vmatpush1.bf16.msra.mxu0 %v9308_v56  ;;  %v9394_v56 = vld [vmem:[#allocation2 + $0xcd4] ss:$48 sps:$4 sm:$0xff]  }
 0x180   :  { %4096 = vmatprep.subr.bf16.mxu0 %v9316_v59  ;;  %v9389_v59 = vld [vmem:[#allocation2 + $0xa98] ss:$48 sps:$4 sm:$0xff]  }
 0x181   :  { %4238 = vmatpush1.bf16.msra.mxu1 %v9305_v55  ;;  %v9391_v55 = vld [vmem:[#allocation2 + $0xa9c] ss:$48 sps:$4 sm:$0xff]  }
 0x182   :  { %4239 = vmatprep.subr.bf16.mxu1 %v9313_v58  ;;  %v9392_v58 = vld [vmem:[#allocation2 + $0xcd0] ss:$48 sps:$4 sm:$0xff]  }
 0x183   :  { %4097 = vmatpush1.bf16.msra.mxu0 %v9314_v61  ;;  %v9400_v61 = vld [vmem:[#allocation2 + $0xd34] ss:$48 sps:$4 sm:$0xff]  }
 0x184   :  { %4098 = vmatprep.subr.bf16.mxu0 %v9322_v62  ;;  %v9398_v62 = vld [vmem:[#allocation2 + $0xd30] ss:$48 sps:$4 sm:$0xff]  }
 0x185   :  { %4240 = vmatpush1.bf16.msra.mxu1 %v9311_v60  ;;  %v9397_v60 = vld [vmem:[#allocation2 + $0xafc] ss:$48 sps:$4 sm:$0xff]  }
 0x186   :  { %4250 = vmatprep.subr.bf16.mxu1 %v9319_v63  ;;  %v9395_v63 = vld [vmem:[#allocation2 + $0xaf8] ss:$48 sps:$4 sm:$0xff]  }
 0x187   :  { %4099 = vmatpush1.bf16.msra.mxu0 %v9320_v2  ;;  %v9406_v2 = vld [vmem:[#allocation2 + $0xd94] ss:$48 sps:$4 sm:$0xff]  }
 0x188   :  { %4242 = vmatmul.mubr.bf16.vlgmr.msra.gmra.mrb[12].mxu1 %v10521_v9  ;;  %4100 = vmatprep.subr.bf16.mxu0 %v9328_v4  ;;  %v9401_v4 = vld [vmem:[#allocation2 + $0xb58] ss:$48 sps:$4 sm:$0xff]  }
 0x189   :  { %4251 = vmatpush1.bf16.msra.mxu1 %v9317_v1  ;;  %4282 = vmatprep.mubr.bf16.mxu1 %v10528_v36  ;;  %v9403_v1 = vld [vmem:[#allocation2 + $0xb5c] ss:$48 sps:$4 sm:$0xff]  }
 0x18a   :  { %4252 = vmatprep.subr.bf16.mxu1 %v9325_v3  ;;  %v9404_v3 = vld [vmem:[#allocation2 + $0xd90] ss:$48 sps:$4 sm:$0xff]  }
 0x18b   :  { %4101 = vmatpush1.bf16.msra.mxu0 %v9326_v6  ;;  %v9412_v6 = vld [vmem:[#allocation2 + $0xdf4] ss:$48 sps:$4 sm:$0xff]  }
 0x18c   :  { %4102 = vmatprep.subr.bf16.mxu0 %v9334_v7  ;;  %v9410_v7 = vld [vmem:[#allocation2 + $0xdf0] ss:$48 sps:$4 sm:$0xff]  }
 0x18d   :  { %4253 = vmatpush1.bf16.msra.mxu1 %v9323_v5  ;;  %v9409_v5 = vld [vmem:[#allocation2 + $0xbbc] ss:$48 sps:$4 sm:$0xff]  }
 0x18e   :  { %4254 = vmatprep.subr.bf16.mxu1 %v9331_v8  ;;  %v9407_v8 = vld [vmem:[#allocation2 + $0xbb8] ss:$48 sps:$4 sm:$0xff]  }
 0x18f   :  { %4103 = vmatpush1.bf16.msra.mxu0 %v9332_v12  ;;  %v9418_v12 = vld [vmem:[#allocation2 + $0xe54] ss:$48 sps:$4 sm:$0xff]  }
 0x190   :  { %4104 = vmatprep.subr.bf16.mxu0 %v9340_v14  ;;  %v9413_v14 = vld [vmem:[#allocation2 + $0xc18] ss:$48 sps:$4 sm:$0xff]  }
 0x191   :  { %4255 = vmatpush1.bf16.msra.mxu1 %v9329_v11  ;;  %v9415_v11 = vld [vmem:[#allocation2 + $0xc1c] ss:$48 sps:$4 sm:$0xff]  }
 0x192   :  { %4256 = vmatprep.subr.bf16.mxu1 %v9337_v13  ;;  %v9416_v13 = vld [vmem:[#allocation2 + $0xe50] ss:$48 sps:$4 sm:$0xff]  }
 0x193   :  { %4105 = vmatpush1.bf16.msra.mxu0 %v9338_v15  ;;  %v9421_v15 = vld [vmem:[#allocation2 + $0xc7c] ss:$48 sps:$4 sm:$0xff]  }
 0x194   :  { %4106 = vmatprep.subr.bf16.mxu0 %v9346_v17  ;;  %v9422_v17 = vld [vmem:[#allocation2 + $0xeb0] ss:$48 sps:$4 sm:$0xff]  }
 0x195   :  { %4257 = vmatpush1.bf16.msra.mxu1 %v9335_v16  ;;  %v9424_v16 = vld [vmem:[#allocation2 + $0xeb4] ss:$48 sps:$4 sm:$0xff]  }
 0x196   :  { %4258 = vmatprep.subr.bf16.mxu1 %v9343_v19  ;;  %v9419_v19 = vld [vmem:[#allocation2 + $0xc78] ss:$48 sps:$4 sm:$0xff]  }
 0x197   :  { %4107 = vmatpush1.bf16.msra.mxu0 %v9344_v21  ;;  %v9430_v21 = vld [vmem:[#allocation2 + $0xf14] ss:$48 sps:$4 sm:$0xff]  }
 0x198   :  { %4108 = vmatprep.subr.bf16.mxu0 %v9352_v22  ;;  %v9428_v22 = vld [vmem:[#allocation2 + $0xf10] ss:$48 sps:$4 sm:$0xff]  }
 0x199   :  { %4259 = vmatpush1.bf16.msra.mxu1 %v9341_v20  ;;  %v9427_v20 = vld [vmem:[#allocation2 + $0xcdc] ss:$48 sps:$4 sm:$0xff]  }
 0x19a   :  { %4260 = vmatprep.subr.bf16.mxu1 %v9349_v23  ;;  %v9425_v23 = vld [vmem:[#allocation2 + $0xcd8] ss:$48 sps:$4 sm:$0xff]  }
 0x19b   :  { %4109 = vmatpush1.bf16.msra.mxu0 %v9350_v26  ;;  %v9436_v26 = vld [vmem:[#allocation2 + $0xf74] ss:$48 sps:$4 sm:$0xff]  }
 0x19c   :  { %4110 = vmatprep.subr.bf16.mxu0 %v9358_v28  ;;  %v9431_v28 = vld [vmem:[#allocation2 + $0xd38] ss:$48 sps:$4 sm:$0xff]  }
 0x19d   :  { %4261 = vmatpush1.bf16.msra.mxu1 %v9347_v25  ;;  %v9433_v25 = vld [vmem:[#allocation2 + $0xd3c] ss:$48 sps:$4 sm:$0xff]  }
 0x19e   :  { %4262 = vmatprep.subr.bf16.mxu1 %v9355_v27  ;;  %v9434_v27 = vld [vmem:[#allocation2 + $0xf70] ss:$48 sps:$4 sm:$0xff]  }
 0x19f   :  { %4111 = vmatpush1.bf16.msra.mxu0 %v9356_v30  ;;  %v9439_v30 = vld [vmem:[#allocation2 + $0xd9c] ss:$48 sps:$4 sm:$0xff]  }
 0x1a0   :  { %4112 = vmatprep.subr.bf16.mxu0 %v9364_v33  ;;  %v9437_v33 = vld [vmem:[#allocation2 + $0xd98] ss:$48 sps:$4 sm:$0xff]  }
 0x1a1   :  { %4263 = vmatpush1.bf16.msra.mxu1 %v9353_v31  ;;  %v9442_v31 = vld [vmem:[#allocation2 + $0xfd4] ss:$48 sps:$4 sm:$0xff]  }
 0x1a2   :  { %4264 = vmatprep.subr.bf16.mxu1 %v9361_v32  ;;  %v9440_v32 = vld [vmem:[#allocation2 + $0xfd0] ss:$48 sps:$4 sm:$0xff]  }
 0x1a3   :  { %4113 = vmatpush1.bf16.msra.mxu0 %v9362_v34  ;;  %v9445_v34 = vld [vmem:[#allocation2 + $0xdfc] ss:$48 sps:$4 sm:$0xff]  }
 0x1a4   :  { %4114 = vmatprep.subr.bf16.mxu0 %v9370_v38  ;;  %v9443_v38 = vld [vmem:[#allocation2 + $0xdf8] ss:$48 sps:$4 sm:$0xff]  }
 0x1a5   :  { %4265 = vmatpush1.bf16.msra.mxu1 %v9359_v35  ;;  %v9448_v35 = vld [vmem:[#allocation2 + $0x1034] ss:$48 sps:$4 sm:$0xff]  }
 0x1a6   :  { %4266 = vmatprep.subr.bf16.mxu1 %v9367_v37  ;;  %v9446_v37 = vld [vmem:[#allocation2 + $0x1030] ss:$48 sps:$4 sm:$0xff]  }
 0x1a7   :  { %4115 = vmatpush1.bf16.msra.mxu0 %v9368_v39  ;;  %v9451_v39 = vld [vmem:[#allocation2 + $0xe5c] ss:$48 sps:$4 sm:$0xff]  }
 0x1a8   :  { %4116 = vmatprep.subr.bf16.mxu0 %v9376_v42  ;;  %v9449_v42 = vld [vmem:[#allocation2 + $0xe58] ss:$48 sps:$4 sm:$0xff]  }
 0x1a9   :  { %4267 = vmatpush1.bf16.msra.mxu1 %v9365_v40  ;;  %v9454_v40 = vld [vmem:[#allocation2 + $0x1094] ss:$48 sps:$4 sm:$0xff]  }
 0x1aa   :  { %4268 = vmatprep.subr.bf16.mxu1 %v9373_v41  ;;  %v9452_v41 = vld [vmem:[#allocation2 + $0x1090] ss:$48 sps:$4 sm:$0xff]  }
 0x1ab   :  { %4117 = vmatpush1.bf16.msra.mxu0 %v9374_v43  ;;  %v9457_v43 = vld [vmem:[#allocation2 + $0xebc] ss:$48 sps:$4 sm:$0xff]  }
 0x1ac   :  { %4127 = vmatprep.subr.bf16.mxu0 %v9382_v46  ;;  %v9455_v46 = vld [vmem:[#allocation2 + $0xeb8] ss:$48 sps:$4 sm:$0xff]  }
 0x1ad   :  { %4269 = vmatpush1.bf16.msra.mxu1 %v9371_v44  ;;  %v9460_v44 = vld [vmem:[#allocation2 + $0x10f4] ss:$48 sps:$4 sm:$0xff]  }
 0x1ae   :  { %4270 = vmatprep.subr.bf16.mxu1 %v9379_v45  ;;  %4119 = vmatmul.mubr.bf16.vlgmr.msra.gmra.mrb[4].mxu0 %v10535_v18  ;;  %v9458_v45 = vld [vmem:[#allocation2 + $0x10f0] ss:$48 sps:$4 sm:$0xff]  }
 0x1af   :  { %4128 = vmatpush1.bf16.msra.mxu0 %v9380_v47  ;;  %4159 = vmatprep.mubr.bf16.mxu0 %v10540_v24  ;;  %v9463_v47 = vld [vmem:[#allocation2 + $0xf1c] ss:$48 sps:$4 sm:$0xff]  }
 0x1b0   :  { %4129 = vmatprep.subr.bf16.mxu0 %v9388_v50  ;;  %v9461_v50 = vld [vmem:[#allocation2 + $0xf18] ss:$48 sps:$4 sm:$0xff]  }
 0x1b1   :  { %4271 = vmatpush1.bf16.msra.mxu1 %v9377_v48  ;;  %v9466_v48 = vld [vmem:[#allocation2 + $0x1154] ss:$48 sps:$4 sm:$0xff]  }
 0x1b2   :  { %4272 = vmatprep.subr.bf16.mxu1 %v9385_v49  ;;  %v9464_v49 = vld [vmem:[#allocation2 + $0x1150] ss:$48 sps:$4 sm:$0xff]  }
 0x1b3   :  { %4130 = vmatpush1.bf16.msra.mxu0 %v9386_v52  ;;  %v9469_v52 = vld [vmem:[#allocation2 + $0xf7c] ss:$48 sps:$4 sm:$0xff]  }
 0x1b4   :  { %4131 = vmatprep.subr.bf16.mxu0 %v9394_v56  ;;  %v9467_v56 = vld [vmem:[#allocation2 + $0xf78] ss:$48 sps:$4 sm:$0xff]  }
 0x1b5   :  { %4273 = vmatpush1.bf16.msra.mxu1 %v9383_v53  ;;  %v9472_v53 = vld [vmem:[#allocation2 + $0x11b4] ss:$48 sps:$4 sm:$0xff]  }
 0x1b6   :  { %4274 = vmatprep.subr.bf16.mxu1 %v9391_v55  ;;  %v9470_v55 = vld [vmem:[#allocation2 + $0x11b0] ss:$48 sps:$4 sm:$0xff]  }
 0x1b7   :  { %4132 = vmatpush1.bf16.msra.mxu0 %v9392_v58  ;;  %v9475_v58 = vld [vmem:[#allocation2 + $0xfdc] ss:$48 sps:$4 sm:$0xff]  }
 0x1b8   :  { %4133 = vmatprep.subr.bf16.mxu0 %v9400_v61  ;;  %v9473_v61 = vld [vmem:[#allocation2 + $0xfd8] ss:$48 sps:$4 sm:$0xff]  }
 0x1b9   :  { %4275 = vmatpush1.bf16.msra.mxu1 %v9389_v59  ;;  %v9478_v59 = vld [vmem:[#allocation2 + $0x24] ss:$48 sps:$4 sm:$0xff]  }
 0x1ba   :  { %4276 = vmatprep.subr.bf16.mxu1 %v9397_v60  ;;  %v9476_v60 = vld [vmem:[#allocation2 + $0x20] ss:$48 sps:$4 sm:$0xff]  }
 0x1bb   :  { %4134 = vmatpush1.bf16.msra.mxu0 %v9398_v62  ;;  %v9481_v62 = vld [vmem:[#allocation2 + $0x103c] ss:$48 sps:$4 sm:$0xff]  }
 0x1bc   :  { %4135 = vmatprep.subr.bf16.mxu0 %v9406_v2  ;;  %v9479_v2 = vld [vmem:[#allocation2 + $0x1038] ss:$48 sps:$4 sm:$0xff]  }
 0x1bd   :  { %4277 = vmatpush1.bf16.msra.mxu1 %v9395_v63  ;;  %v9484_v63 = vld [vmem:[#allocation2 + $0x84] ss:$48 sps:$4 sm:$0xff]  }
 0x1be   :  { %4278 = vmatprep.subr.bf16.mxu1 %v9403_v1  ;;  %v9482_v1 = vld [vmem:[#allocation2 + $0x80] ss:$48 sps:$4 sm:$0xff]  }
 0x1bf   :  { %4136 = vmatpush1.bf16.msra.mxu0 %v9404_v3  ;;  %v9487_v3 = vld [vmem:[#allocation2 + $0x109c] ss:$48 sps:$4 sm:$0xff]  }
 0x1c0   :  { %4137 = vmatprep.subr.bf16.mxu0 %v9412_v6  ;;  %v9488_v6 = vld [vmem:[#allocation2 + $0xe0] ss:$48 sps:$4 sm:$0xff]  }
 0x1c1   :  { %4279 = vmatpush1.bf16.msra.mxu1 %v9401_v4  ;;  %v9490_v4 = vld [vmem:[#allocation2 + $0xe4] ss:$48 sps:$4 sm:$0xff]  }
 0x1c2   :  { %4280 = vmatprep.subr.bf16.mxu1 %v9409_v5  ;;  %v713_v5 = vlaneseq }
 0x1c3   :  { %4138 = vmatpush1.bf16.msra.mxu0 %v9410_v7  ;;  %v9485_v7 = vld [vmem:[#allocation2 + $0x1098] ss:$48 sps:$4 sm:$0xff]  }
 0x1c4   :  { %4139 = vmatprep.subr.bf16.mxu0 %v9418_v12  ;;  %v10575_v12 = vshrl.u32 %v713_v5, 7  ;;  %v9536_v5 = vld [vmem:[#allocation2 + $0x88] ss:$48 sps:$4 sm:$0xff]  }
 0x1c5   :  { %4281 = vmatpush1.bf16.msra.mxu1 %v9407_v8  ;;  %v9493_v8 = vld [vmem:[#allocation2 + $0x10fc] ss:$48 sps:$4 sm:$0xff]  }
 0x1c6   :  { %4291 = vmatprep.subr.bf16.mxu1 %v9415_v11  ;;  %v9496_v11 = vld [vmem:[#allocation2 + $0x144] ss:$48 sps:$4 sm:$0xff]  }
 0x1c7   :  { %4140 = vmatpush1.bf16.msra.mxu0 %v9416_v13  ;;  %v9494_v13 = vld [vmem:[#allocation2 + $0x140] ss:$48 sps:$4 sm:$0xff]  }
 0x1c8   :  { %4283 = vmatmul.mubr.bf16.vlgmr.msra.gmra.mrb[12].mxu1 %v10535_v18  ;;  %4141 = vmatprep.subr.bf16.mxu0 %v9424_v16  ;;  %v9502_v16 = vld [vmem:[#allocation2 + $0x1a4] ss:$48 sps:$4 sm:$0xff]  }
 0x1c9   :  { %4292 = vmatpush1.bf16.msra.mxu1 %v9413_v14  ;;  %4323 = vmatprep.mubr.bf16.mxu1 %v10540_v24  ;;  %v9491_v14 = vld [vmem:[#allocation2 + $0x10f8] ss:$48 sps:$4 sm:$0xff]  }
 0x1ca   :  { %4293 = vmatprep.subr.bf16.mxu1 %v9421_v15  ;;  %v9499_v15 = vld [vmem:[#allocation2 + $0x115c] ss:$48 sps:$4 sm:$0xff]  }
 0x1cb   :  { %4142 = vmatpush1.bf16.msra.mxu0 %v9422_v17  ;;  %v9500_v17 = vld [vmem:[#allocation2 + $0x1a0] ss:$48 sps:$4 sm:$0xff]  }
 0x1cc   :  { %4143 = vmatprep.subr.bf16.mxu0 %v9430_v21  ;;  %v719_v21 = vsub.s32 1, %v10575_v12 }
 0x1cd   :  { %4294 = vmatpush1.bf16.msra.mxu1 %v9419_v19  ;;  %v715_v19 = vsub.s32 0, %v10575_v12 }
 0x1ce   :  { %4295 = vmatprep.subr.bf16.mxu1 %v9427_v20  ;;  %v709_v20 = vld [vmem:[#allocation4] sm:$0xff] }
 0x1cf   :  { %4144 = vmatpush1.bf16.msra.mxu0 %v9428_v22  ;;  %v9497_v22 = vld [vmem:[#allocation2 + $0x1158] ss:$48 sps:$4 sm:$0xff]  }
 0x1d0   :  { %4145 = vmatprep.subr.bf16.mxu0 %v9436_v26  ;;  %v716_v26 = vrot.slane %v709_v20, %v715_v19 }
 0x1d1   :  { %4296 = vmatpush1.bf16.msra.mxu1 %v9425_v23  ;;  %v9505_v23 = vld [vmem:[#allocation2 + $0x11bc] ss:$48 sps:$4 sm:$0xff]  }
 0x1d2   :  { %4297 = vmatprep.subr.bf16.mxu1 %v9433_v25  ;;  %v9508_v25 = vld [vmem:[#allocation2 + $0x204] ss:$48 sps:$4 sm:$0xff]  }
 0x1d3   :  { %4146 = vmatpush1.bf16.msra.mxu0 %v9434_v27  ;;  %v720_v27 = vrot.slane %v709_v20, %v719_v21  ;;  %v9548_v20 = vld [vmem:[#allocation2 + $0x148] ss:$48 sps:$4 sm:$0xff]  }
 0x1d4   :  { %4147 = vmatprep.subr.bf16.mxu0 %v9442_v31  ;;  %v9511_v31 = vld [vmem:[#allocation2 + $0x264] ss:$48 sps:$4 sm:$0xff]  }
 0x1d5   :  { %4298 = vmatpush1.bf16.msra.mxu1 %v9431_v28  ;;  %v9506_v28 = vld [vmem:[#allocation2 + $0x200] ss:$48 sps:$4 sm:$0xff]  }
 0x1d6   :  { %4299 = vmatprep.subr.bf16.mxu1 %v9439_v30  ;;  %v9503_v30 = vld [vmem:[#allocation2 + $0x11b8] ss:$48 sps:$4 sm:$0xff]  }
 0x1d7   :  { %4148 = vmatpush1.bf16.msra.mxu0 %v9440_v32  ;;  %v9517_v32 = vld [vmem:[#allocation2 + $0x121c] ss:$48 sps:$4 sm:$0xff]  }
 0x1d8   :  { %4149 = vmatprep.subr.bf16.mxu0 %v9448_v35 }
 0x1d9   :  { %4300 = vmatpush1.bf16.msra.mxu1 %v9437_v33 }
 0x1da   :  { %4301 = vmatprep.subr.bf16.mxu1 %v9445_v34 }
 0x1db   :  { %4150 = vmatpush1.bf16.msra.mxu0 %v9446_v37 }
 0x1dc   :  { %4151 = vmatprep.subr.bf16.mxu0 %v9454_v40 }
 0x1dd   :  { %4302 = vmatpush1.bf16.msra.mxu1 %v9443_v38 }
 0x1de   :  { %4303 = vmatprep.subr.bf16.mxu1 %v9451_v39  ;;  %v9509_v39 = vld [vmem:[#allocation2 + $0x260] ss:$48 sps:$4 sm:$0xff]  }
 0x1df   :  { %4152 = vmatpush1.bf16.msra.mxu0 %v9452_v41 }
 0x1e0   :  { %4153 = vmatprep.subr.bf16.mxu0 %v9460_v44 }
 0x1e1   :  { %4304 = vmatpush1.bf16.msra.mxu1 %v9449_v42  ;;  %v9514_v42 = vld [vmem:[#allocation2 + $0x2c4] ss:$48 sps:$4 sm:$0xff]  }
 0x1e2   :  { %4305 = vmatprep.subr.bf16.mxu1 %v9457_v43  ;;  %v9515_v43 = vld [vmem:[#allocation2 + $0x1218] ss:$48 sps:$4 sm:$0xff]  }
 0x1e3   :  { %4154 = vmatpush1.bf16.msra.mxu0 %v9458_v45  ;;  %v9526_v45 = vld [vmem:[#allocation2 + $0x1224] ss:$48 sps:$4 sm:$0xff]  }
 0x1e4   :  { %4155 = vmatprep.subr.bf16.mxu0 %v9466_v48  ;;  %v9523_v48 = vld [vmem:[#allocation2 + $0x384] ss:$48 sps:$4 sm:$0xff]  }
 0x1e5   :  { %4306 = vmatpush1.bf16.msra.mxu1 %v9455_v46  ;;  %v9512_v46 = vld [vmem:[#allocation2 + $0x2c0] ss:$48 sps:$4 sm:$0xff]  }
 0x1e6   :  { %4307 = vmatprep.subr.bf16.mxu1 %v9463_v47  ;;  %v9520_v47 = vld [vmem:[#allocation2 + $0x324] ss:$48 sps:$4 sm:$0xff]  }
 0x1e7   :  { %4156 = vmatpush1.bf16.msra.mxu0 %v9464_v49  ;;  %v9521_v49 = vld [vmem:[#allocation2 + $0x380] ss:$48 sps:$4 sm:$0xff]  }
 0x1e8   :  { %4157 = vmatprep.subr.bf16.mxu0 %v9472_v53 }
 0x1e9   :  { %4308 = vmatpush1.bf16.msra.mxu1 %v9461_v50  ;;  %v9529_v50 = vld [vmem:[#allocation2 + $0x3e4] ss:$48 sps:$4 sm:$0xff]  }
 0x1ea   :  { %4309 = vmatprep.subr.bf16.mxu1 %v9469_v52  ;;  %v9532_v52 = vld [vmem:[#allocation2 + $0x2c] ss:$48 sps:$4 sm:$0xff]  }
 0x1eb   :  { %4158 = vmatpush1.bf16.msra.mxu0 %v9470_v55 }
 0x1ec   :  { %4373 = vmatprep.subr.bf16.mxu0 %v9478_v59  ;;  %v9535_v59 = vld [vmem:[#allocation2 + $0x444] ss:$48 sps:$4 sm:$0xff]  }
 0x1ed   :  { %4310 = vmatpush1.bf16.msra.mxu1 %v9467_v56  ;;  %v9527_v56 = vld [vmem:[#allocation2 + $0x3e0] ss:$48 sps:$4 sm:$0xff]  }
 0x1ee   :  { %4311 = vmatprep.subr.bf16.mxu1 %v9475_v58  ;;  %4160 = vmatmul.mubr.bf16.vlgmr.msra.gmra.mrb[4].mxu0 %v10549_v29 }
 0x1ef   :  { %4374 = vmatpush1.bf16.msra.mxu0 %v9476_v60  ;;  %4405 = vmatprep.mubr.bf16.mxu0 %v10514_v51 }
 0x1f0   :  { %4375 = vmatprep.subr.bf16.mxu0 %v9484_v63  ;;  %v9538_v63 = vld [vmem:[#allocation2 + $0x8c] ss:$48 sps:$4 sm:$0xff]  }
 0x1f1   :  { %4312 = vmatpush1.bf16.msra.mxu1 %v9473_v61  ;;  %v9533_v61 = vld [vmem:[#allocation2 + $0x440] ss:$48 sps:$4 sm:$0xff]  }
 0x1f2   :  { %4313 = vmatprep.subr.bf16.mxu1 %v9481_v62  ;;  %v9530_v62 = vld [vmem:[#allocation2 + $0x28] ss:$48 sps:$4 sm:$0xff]  }
 0x1f3   :  { %4376 = vmatpush1.bf16.msra.mxu0 %v9482_v1  ;;  %v9541_v1 = vld [vmem:[#allocation2 + $0x4a4] ss:$48 sps:$4 sm:$0xff]  }
 0x1f4   :  { %4377 = vmatprep.subr.bf16.mxu0 %v9490_v4 }
 0x1f5   :  { %4314 = vmatpush1.bf16.msra.mxu1 %v9479_v2 }
 0x1f6   :  { %4315 = vmatprep.subr.bf16.mxu1 %v9487_v3  ;;  %v9539_v3 = vld [vmem:[#allocation2 + $0x4a0] ss:$48 sps:$4 sm:$0xff]  }
 0x1f7   :  { %4378 = vmatpush1.bf16.msra.mxu0 %v9488_v6  ;;  %v9547_v6 = vld [vmem:[#allocation2 + $0x504] ss:$48 sps:$4 sm:$0xff]  }
 0x1f8   :  { %4379 = vmatprep.subr.bf16.mxu0 %v9496_v11 }
 0x1f9   :  { %4316 = vmatpush1.bf16.msra.mxu1 %v9485_v7 }
 0x1fa   :  { %4317 = vmatprep.subr.bf16.mxu1 %v9493_v8  ;;  %v9544_v8 = vld [vmem:[#allocation2 + $0xec] ss:$48 sps:$4 sm:$0xff]  }
 0x1fb   :  { %4380 = vmatpush1.bf16.msra.mxu0 %v9494_v13  ;;  %v9545_v13 = vld [vmem:[#allocation2 + $0x500] ss:$48 sps:$4 sm:$0xff]  }
 0x1fc   :  { %4381 = vmatprep.subr.bf16.mxu0 %v9502_v16  ;;  %v9553_v16 = vld [vmem:[#allocation2 + $0x564] ss:$48 sps:$4 sm:$0xff]  }
 0x1fd   :  { %4318 = vmatpush1.bf16.msra.mxu1 %v9491_v14  ;;  %v9542_v14 = vld [vmem:[#allocation2 + $0xe8] ss:$48 sps:$4 sm:$0xff]  }
 0x1fe   :  { %4319 = vmatprep.subr.bf16.mxu1 %v9499_v15  ;;  %v9550_v15 = vld [vmem:[#allocation2 + $0x14c] ss:$48 sps:$4 sm:$0xff]  }
 0x1ff   :  { %4382 = vmatpush1.bf16.msra.mxu0 %v9500_v17  ;;  %v9551_v17 = vld [vmem:[#allocation2 + $0x560] ss:$48 sps:$4 sm:$0xff]  }
 0x200   :  { %4383 = vmatprep.subr.bf16.mxu0 %v9508_v25  ;;  %v9557_v25 = vld [vmem:[#allocation2 + $0x5c0] ss:$48 sps:$4 sm:$0xff]  }
 0x201   :  { %4320 = vmatpush1.bf16.msra.mxu1 %v9497_v22  ;;  %v3833_v33 = vpop.f32.mrb[0].mxu0  ;;  %v9556_v22 = vld [vmem:[#allocation2 + $0x1ac] ss:$48 sps:$4 sm:$0xff]  }
 0x202   :  { %4321 = vmatprep.subr.bf16.mxu1 %v9505_v23  ;;  %v8793_v34 = vadd.f32 %v3833_v33, %v716_v26  ;;  %v3835_v35 = vpop.f32.mrb[1].mxu0  ;;  %v9559_v23 = vld [vmem:[#allocation2 + $0x5c4] ss:$48 sps:$4 sm:$0xff]   ;;  %v9562_v26 = vld [vmem:[#allocation2 + $0x20c] ss:$48 sps:$4 sm:$0xff]  }
 0x203   :  { %v8795_v37 = vadd.f32 %v3835_v35, %v720_v27  ;;  %v3837_v38 = vpop.f32.mrb[2].mxu0  ;;  %4384 = vmatpush1.bf16.msra.mxu0 %v9506_v28  ;;  %v9565_v27 = vld [vmem:[#allocation2 + $0x624] ss:$48 sps:$4 sm:$0xff]   ;;  %v9563_v28 = vld [vmem:[#allocation2 + $0x620] ss:$48 sps:$4 sm:$0xff]  }
 0x204   :  { %v10584_v40 = vadd.f32 %v8793_v34, %v10558_v54  ;;  %v3838_v41 = vpop.f32.mrb[3].mxu0  ;;  %4385 = vmatprep.subr.bf16.mxu0 %v9511_v31  ;;  %v9518_v54 = vld [vmem:[#allocation2 + $0x320] ss:$48 sps:$4 sm:$0xff]   ;;  %v9568_v31 = vld [vmem:[#allocation2 + $0x26c] ss:$48 sps:$4 sm:$0xff]  }
 0x205   :  { %4322 = vmatpush1.bf16.msra.mxu1 %v9503_v30  ;;  %v10587_v44 = vadd.f32 %v8795_v37, %v10562_v57  ;;  %v9524_v57 = vld [vmem:[#allocation2 + $0x1220] ss:$48 sps:$4 sm:$0xff]   ;;  %v9560_v30 = vld [vmem:[#allocation2 + $0x208] ss:$48 sps:$4 sm:$0xff]   ;;  %v9574_v35 = vld [vmem:[#allocation2 + $0x2cc] ss:$48 sps:$4 sm:$0xff]  }
 0x206   :  { %4332 = vmatprep.subr.bf16.mxu1 %v9517_v32  ;;  %v9571_v32 = vld [vmem:[#allocation2 + $0x684] ss:$48 sps:$4 sm:$0xff]   ;;  %v9569_v33 = vld [vmem:[#allocation2 + $0x680] ss:$48 sps:$4 sm:$0xff]   ;;  %v9566_v34 = vld [vmem:[#allocation2 + $0x268] ss:$48 sps:$4 sm:$0xff]  }
 0x207   :  { %4386 = vmatpush1.bf16.msra.mxu0 %v9509_v39  ;;  %v9577_v37 = vld [vmem:[#allocation2 + $0x6e4] ss:$48 sps:$4 sm:$0xff]   ;;  %v9575_v38 = vld [vmem:[#allocation2 + $0x6e0] ss:$48 sps:$4 sm:$0xff]   ;;  %v9572_v39 = vld [vmem:[#allocation2 + $0x2c8] ss:$48 sps:$4 sm:$0xff]  }
 0x208   :  { %4324 = vmatmul.mubr.bf16.vlgmr.msra.gmra.mrb[12].mxu1 %v10549_v29  ;;  %4387 = vmatprep.subr.bf16.mxu0 %v9514_v42  ;;  %v9580_v41 = vld [vmem:[#allocation2 + $0x32c] ss:$48 sps:$4 sm:$0xff]   ;;  %v9583_v42 = vld [vmem:[#allocation2 + $0x744] ss:$48 sps:$4 sm:$0xff]  }
 0x209   :  { %4333 = vmatpush1.bf16.msra.mxu1 %v9515_v43  ;;  %4364 = vmatprep.mubr.bf16.mxu1 %v10365_v0  ;;  %v9581_v43 = vld [vmem:[#allocation2 + $0x740] ss:$48 sps:$4 sm:$0xff]  }
 0x20a   :  { %4496 = vmatprep.subr.bf16.mxu1 %v9526_v45  ;;  %v9578_v45 = vld [vmem:[#allocation2 + $0x328] ss:$48 sps:$4 sm:$0xff]  }
 0x20b   :  { %4388 = vmatpush1.bf16.msra.mxu0 %v9512_v46  ;;  %v9586_v46 = vld [vmem:[#allocation2 + $0x38c] ss:$48 sps:$4 sm:$0xff]  }
 0x20c   :  { %4389 = vmatprep.subr.bf16.mxu0 %v9520_v47  ;;  %v9589_v47 = vld [vmem:[#allocation2 + $0x7a4] ss:$48 sps:$4 sm:$0xff]  }
 0x20f   :  { %4390 = vmatpush1.bf16.msra.mxu0 %v9518_v54  ;;  %v9587_v54 = vld [vmem:[#allocation2 + $0x7a0] ss:$48 sps:$4 sm:$0xff]  }
 0x210   :  { %4391 = vmatprep.subr.bf16.mxu0 %v9523_v48  ;;  %v9584_v48 = vld [vmem:[#allocation2 + $0x388] ss:$48 sps:$4 sm:$0xff]  }
 0x213   :  { %v10591_v53 = vpop.f32.mrb[4].mxu1  ;;  %4392 = vmatpush1.bf16.msra.mxu0 %v9521_v49  ;;  %v9592_v49 = vld [vmem:[#allocation2 + $0x3ec] ss:$48 sps:$4 sm:$0xff]  }
 0x214   :  { %8221 = vmatmul.mubr.msk.bf16.vlgmr.msra.gmra.mrb[12].mxu1 %vm3713_vm0, %v10507_v10  ;;  %v10595_v55 = vpop.f32.mrb[5].mxu1  ;;  %4393 = vmatprep.subr.bf16.mxu0 %v9529_v50  ;;  %v9593_v50 = vld [vmem:[#allocation2 + $0x800] ss:$48 sps:$4 sm:$0xff]  }
 0x215   :  { %v4042_v58 = vpop.f32.mrb[6].mxu1  ;;  %4497 = vmatpush1.bf16.msra.mxu1 %v9524_v57  ;;  %4528 = vmatprep.mubr.bf16.mxu1 %v10365_v0  ;;  %v9595_v57 = vld [vmem:[#allocation2 + $0x804] ss:$48 sps:$4 sm:$0xff]  }
 0x216   :  { %v4043_v60 = vpop.f32.mrb[7].mxu1  ;;  %4537 = vmatprep.subr.bf16.mxu1 %v9532_v52  ;;  %v9590_v52 = vld [vmem:[#allocation2 + $0x3e8] ss:$48 sps:$4 sm:$0xff]   ;;  %v9601_v58 = vld [vmem:[#allocation2 + $0x864] ss:$48 sps:$4 sm:$0xff]  }
 0x217   :  { %4394 = vmatpush1.bf16.msra.mxu0 %v9527_v56  ;;  %v9598_v56 = vld [vmem:[#allocation2 + $0x44c] ss:$48 sps:$4 sm:$0xff]   ;;  %v9599_v60 = vld [vmem:[#allocation2 + $0x860] ss:$48 sps:$4 sm:$0xff]  }
 0x218   :  { %4395 = vmatprep.subr.bf16.mxu0 %v9535_v59  ;;  %v9596_v59 = vld [vmem:[#allocation2 + $0x448] ss:$48 sps:$4 sm:$0xff]  }
 0x21b   :  { %v10598_v2 = vpop.f32.mrb[8].mxu1  ;;  %4396 = vmatpush1.bf16.msra.mxu0 %v9533_v61  ;;  %v9607_v61 = vld [vmem:[#allocation2 + $0x8c4] ss:$48 sps:$4 sm:$0xff]  }
 0x21c   :  { %8222 = vmatmul.mubr.msk.bf16.vlgmr.msra.gmra.mrb[16].mxu1 %vm3713_vm0, %v10507_v10  ;;  %v10602_v4 = vpop.f32.mrb[9].mxu1  ;;  %4397 = vmatprep.subr.bf16.mxu0 %v9541_v1  ;;  %v9605_v1 = vld [vmem:[#allocation2 + $0x8c0] ss:$48 sps:$4 sm:$0xff]  }
 0x21d   :  { %4538 = vmatpush1.bf16.msra.mxu1 %v9530_v62  ;;  %v4206_v7 = vpop.f32.mrb[10].mxu1  ;;  %4569 = vmatprep.mubr.bf16.mxu1 %v10514_v51  ;;  %v9554_v51 = vld [vmem:[#allocation2 + $0x1a8] ss:$48 sps:$4 sm:$0xff]   ;;  %v9604_v62 = vld [vmem:[#allocation2 + $0x4ac] ss:$48 sps:$4 sm:$0xff]  }
 0x21e   :  { %4539 = vmatprep.subr.bf16.mxu1 %v9538_v63  ;;  %v4207_v11 = vpop.f32.mrb[11].mxu1  ;;  %v9602_v63 = vld [vmem:[#allocation2 + $0x4a8] ss:$48 sps:$4 sm:$0xff]  }
 0x21f   :  { %4398 = vmatpush1.bf16.msra.mxu0 %v9539_v3  ;;  %v9613_v3 = vld [vmem:[#allocation2 + $0x924] ss:$48 sps:$4 sm:$0xff]   ;;  %v9608_v7 = vld [vmem:[#allocation2 + $0x508] ss:$48 sps:$4 sm:$0xff]  }
 0x220   :  { %4399 = vmatprep.subr.bf16.mxu0 %v9547_v6  ;;  %v9611_v6 = vld [vmem:[#allocation2 + $0x920] ss:$48 sps:$4 sm:$0xff]   ;;  %v9619_v11 = vld [vmem:[#allocation2 + $0x984] ss:$48 sps:$4 sm:$0xff]  }
 0x221   :  { %4540 = vmatpush1.bf16.msra.mxu1 %v9536_v5  ;;  %v9610_v5 = vld [vmem:[#allocation2 + $0x50c] ss:$48 sps:$4 sm:$0xff]  }
 0x222   :  { %4541 = vmatprep.subr.bf16.mxu1 %v9544_v8  ;;  %v9616_v8 = vld [vmem:[#allocation2 + $0x56c] ss:$48 sps:$4 sm:$0xff]  }
 0x223   :  { %4400 = vmatpush1.bf16.msra.mxu0 %v9545_v13  ;;  %v9617_v13 = vld [vmem:[#allocation2 + $0x980] ss:$48 sps:$4 sm:$0xff]  }
 0x224   :  { %4401 = vmatprep.subr.bf16.mxu0 %v9553_v16  ;;  %v9625_v16 = vld [vmem:[#allocation2 + $0x9e4] ss:$48 sps:$4 sm:$0xff]  }
 0x225   :  { %4542 = vmatpush1.bf16.msra.mxu1 %v9542_v14  ;;  %v9614_v14 = vld [vmem:[#allocation2 + $0x568] ss:$48 sps:$4 sm:$0xff]  }
 0x226   :  { %4543 = vmatprep.subr.bf16.mxu1 %v9550_v15  ;;  %v9622_v15 = vld [vmem:[#allocation2 + $0x5cc] ss:$48 sps:$4 sm:$0xff]  }
 0x227   :  { %4402 = vmatpush1.bf16.msra.mxu0 %v9551_v17  ;;  %v9623_v17 = vld [vmem:[#allocation2 + $0x9e0] ss:$48 sps:$4 sm:$0xff]  }
 0x228   :  { %4403 = vmatprep.subr.bf16.mxu0 %v9559_v23  ;;  %v9631_v23 = vld [vmem:[#allocation2 + $0xa44] ss:$48 sps:$4 sm:$0xff]  }
 0x229   :  { %4544 = vmatpush1.bf16.msra.mxu1 %v9548_v20  ;;  %v9620_v20 = vld [vmem:[#allocation2 + $0x5c8] ss:$48 sps:$4 sm:$0xff]  }
 0x22a   :  { %4545 = vmatprep.subr.bf16.mxu1 %v9556_v22  ;;  %v9628_v22 = vld [vmem:[#allocation2 + $0x62c] ss:$48 sps:$4 sm:$0xff]  }
 0x22b   :  { %4404 = vmatpush1.bf16.msra.mxu0 %v9557_v25  ;;  %v9629_v25 = vld [vmem:[#allocation2 + $0xa40] ss:$48 sps:$4 sm:$0xff]  }
 0x22c   :  { %4414 = vmatprep.subr.bf16.mxu0 %v9565_v27  ;;  %v9637_v27 = vld [vmem:[#allocation2 + $0xaa4] ss:$48 sps:$4 sm:$0xff]  }
 0x22d   :  { %4546 = vmatpush1.bf16.msra.mxu1 %v9554_v51  ;;  %v9626_v51 = vld [vmem:[#allocation2 + $0x628] ss:$48 sps:$4 sm:$0xff]  }
 0x22e   :  { %4547 = vmatprep.subr.bf16.mxu1 %v9562_v26  ;;  %4406 = vmatmul.mubr.bf16.vlgmr.msra.gmra.mrb[8].mxu0 %v10521_v9  ;;  %v9634_v26 = vld [vmem:[#allocation2 + $0x68c] ss:$48 sps:$4 sm:$0xff]  }
 0x22f   :  { %4415 = vmatpush1.bf16.msra.mxu0 %v9563_v28  ;;  %4446 = vmatprep.mubr.bf16.mxu0 %v10528_v36  ;;  %v9635_v28 = vld [vmem:[#allocation2 + $0xaa0] ss:$48 sps:$4 sm:$0xff]  }
 0x230   :  { %4416 = vmatprep.subr.bf16.mxu0 %v9571_v32  ;;  %v9643_v32 = vld [vmem:[#allocation2 + $0xb04] ss:$48 sps:$4 sm:$0xff]  }
 0x231   :  { %4548 = vmatpush1.bf16.msra.mxu1 %v9560_v30  ;;  %v9632_v30 = vld [vmem:[#allocation2 + $0x688] ss:$48 sps:$4 sm:$0xff]  }
 0x232   :  { %4549 = vmatprep.subr.bf16.mxu1 %v9568_v31  ;;  %v9640_v31 = vld [vmem:[#allocation2 + $0x6ec] ss:$48 sps:$4 sm:$0xff]  }
 0x233   :  { %4417 = vmatpush1.bf16.msra.mxu0 %v9569_v33  ;;  %v9641_v33 = vld [vmem:[#allocation2 + $0xb00] ss:$48 sps:$4 sm:$0xff]  }
 0x234   :  { %4418 = vmatprep.subr.bf16.mxu0 %v9577_v37  ;;  %v9649_v37 = vld [vmem:[#allocation2 + $0xb64] ss:$48 sps:$4 sm:$0xff]  }
 0x235   :  { %4550 = vmatpush1.bf16.msra.mxu1 %v9566_v34  ;;  %v9638_v34 = vld [vmem:[#allocation2 + $0x6e8] ss:$48 sps:$4 sm:$0xff]  }
 0x236   :  { %4551 = vmatprep.subr.bf16.mxu1 %v9574_v35  ;;  %v9646_v35 = vld [vmem:[#allocation2 + $0x74c] ss:$48 sps:$4 sm:$0xff]  }
 0x237   :  { %4419 = vmatpush1.bf16.msra.mxu0 %v9575_v38  ;;  %v9647_v38 = vld [vmem:[#allocation2 + $0xb60] ss:$48 sps:$4 sm:$0xff]  }
 0x238   :  { %4420 = vmatprep.subr.bf16.mxu0 %v9583_v42  ;;  %v9653_v42 = vld [vmem:[#allocation2 + $0xbc0] ss:$48 sps:$4 sm:$0xff]  }
 0x239   :  { %4552 = vmatpush1.bf16.msra.mxu1 %v9572_v39  ;;  %v9652_v39 = vld [vmem:[#allocation2 + $0x7ac] ss:$48 sps:$4 sm:$0xff]  }
 0x23a   :  { %4553 = vmatprep.subr.bf16.mxu1 %v9580_v41  ;;  %v9655_v41 = vld [vmem:[#allocation2 + $0xbc4] ss:$48 sps:$4 sm:$0xff]  }
 0x23b   :  { %4421 = vmatpush1.bf16.msra.mxu0 %v9581_v43  ;;  %v9650_v43 = vld [vmem:[#allocation2 + $0x7a8] ss:$48 sps:$4 sm:$0xff]  }
 0x23c   :  { %4422 = vmatprep.subr.bf16.mxu0 %v9589_v47  ;;  %v9656_v47 = vld [vmem:[#allocation2 + $0x808] ss:$48 sps:$4 sm:$0xff]  }
 0x23d   :  { %4554 = vmatpush1.bf16.msra.mxu1 %v9578_v45  ;;  %v9658_v45 = vld [vmem:[#allocation2 + $0x80c] ss:$48 sps:$4 sm:$0xff]  }
 0x23e   :  { %4555 = vmatprep.subr.bf16.mxu1 %v9586_v46  ;;  %v9659_v46 = vld [vmem:[#allocation2 + $0xc20] ss:$48 sps:$4 sm:$0xff]  }
 0x23f   :  { %4423 = vmatpush1.bf16.msra.mxu0 %v9587_v54  ;;  %v9664_v54 = vld [vmem:[#allocation2 + $0x86c] ss:$48 sps:$4 sm:$0xff]  }
 0x240   :  { %4424 = vmatprep.subr.bf16.mxu0 %v9595_v57  ;;  %v9662_v57 = vld [vmem:[#allocation2 + $0x868] ss:$48 sps:$4 sm:$0xff]  }
 0x241   :  { %4556 = vmatpush1.bf16.msra.mxu1 %v9584_v48  ;;  %v9667_v48 = vld [vmem:[#allocation2 + $0xc84] ss:$48 sps:$4 sm:$0xff]  }
 0x242   :  { %4557 = vmatprep.subr.bf16.mxu1 %v9592_v49  ;;  %v9665_v49 = vld [vmem:[#allocation2 + $0xc80] ss:$48 sps:$4 sm:$0xff]  }
 0x243   :  { %4425 = vmatpush1.bf16.msra.mxu0 %v9593_v50  ;;  %v9670_v50 = vld [vmem:[#allocation2 + $0x8cc] ss:$48 sps:$4 sm:$0xff]  }
 0x244   :  { %4426 = vmatprep.subr.bf16.mxu0 %v9601_v58  ;;  %v9668_v58 = vld [vmem:[#allocation2 + $0x8c8] ss:$48 sps:$4 sm:$0xff]  }
 0x245   :  { %4558 = vmatpush1.bf16.msra.mxu1 %v9590_v52  ;;  %v9673_v52 = vld [vmem:[#allocation2 + $0xce4] ss:$48 sps:$4 sm:$0xff]  }
 0x246   :  { %4559 = vmatprep.subr.bf16.mxu1 %v9598_v56  ;;  %v9671_v56 = vld [vmem:[#allocation2 + $0xce0] ss:$48 sps:$4 sm:$0xff]  }
 0x247   :  { %4427 = vmatpush1.bf16.msra.mxu0 %v9599_v60  ;;  %v9679_v60 = vld [vmem:[#allocation2 + $0xd44] ss:$48 sps:$4 sm:$0xff]  }
 0x248   :  { %4428 = vmatprep.subr.bf16.mxu0 %v9607_v61  ;;  %v9677_v61 = vld [vmem:[#allocation2 + $0xd40] ss:$48 sps:$4 sm:$0xff]  }
 0x249   :  { %4560 = vmatpush1.bf16.msra.mxu1 %v9596_v59  ;;  %v9676_v59 = vld [vmem:[#allocation2 + $0x92c] ss:$48 sps:$4 sm:$0xff]  }
 0x24a   :  { %4561 = vmatprep.subr.bf16.mxu1 %v9604_v62  ;;  %v9674_v62 = vld [vmem:[#allocation2 + $0x928] ss:$48 sps:$4 sm:$0xff]  }
 0x24b   :  { %4429 = vmatpush1.bf16.msra.mxu0 %v9605_v1  ;;  %v9685_v1 = vld [vmem:[#allocation2 + $0xda4] ss:$48 sps:$4 sm:$0xff]  }
 0x24c   :  { %4430 = vmatprep.subr.bf16.mxu0 %v9613_v3  ;;  %v9683_v3 = vld [vmem:[#allocation2 + $0xda0] ss:$48 sps:$4 sm:$0xff]  }
 0x24d   :  { %4562 = vmatpush1.bf16.msra.mxu1 %v9602_v63  ;;  %v9682_v63 = vld [vmem:[#allocation2 + $0x98c] ss:$48 sps:$4 sm:$0xff]  }
 0x24e   :  { %4563 = vmatprep.subr.bf16.mxu1 %v9610_v5  ;;  %v9680_v5 = vld [vmem:[#allocation2 + $0x988] ss:$48 sps:$4 sm:$0xff]  }
 0x24f   :  { %4431 = vmatpush1.bf16.msra.mxu0 %v9611_v6  ;;  %v9688_v6 = vld [vmem:[#allocation2 + $0x9ec] ss:$48 sps:$4 sm:$0xff]  }
 0x250   :  { %4432 = vmatprep.subr.bf16.mxu0 %v9619_v11  ;;  %v9686_v11 = vld [vmem:[#allocation2 + $0x9e8] ss:$48 sps:$4 sm:$0xff]  }
 0x251   :  { %4564 = vmatpush1.bf16.msra.mxu1 %v9608_v7  ;;  %v9691_v7 = vld [vmem:[#allocation2 + $0xe04] ss:$48 sps:$4 sm:$0xff]  }
 0x252   :  { %4565 = vmatprep.subr.bf16.mxu1 %v9616_v8  ;;  %v9689_v8 = vld [vmem:[#allocation2 + $0xe00] ss:$48 sps:$4 sm:$0xff]  }
 0x253   :  { %4433 = vmatpush1.bf16.msra.mxu0 %v9617_v13  ;;  %v9694_v13 = vld [vmem:[#allocation2 + $0xa4c] ss:$48 sps:$4 sm:$0xff]  }
 0x254   :  { %4434 = vmatprep.subr.bf16.mxu0 %v9625_v16  ;;  %v9692_v16 = vld [vmem:[#allocation2 + $0xa48] ss:$48 sps:$4 sm:$0xff]  }
 0x255   :  { %4566 = vmatpush1.bf16.msra.mxu1 %v9614_v14  ;;  %v9697_v14 = vld [vmem:[#allocation2 + $0xe64] ss:$48 sps:$4 sm:$0xff]  }
 0x256   :  { %4567 = vmatprep.subr.bf16.mxu1 %v9622_v15  ;;  %v9695_v15 = vld [vmem:[#allocation2 + $0xe60] ss:$48 sps:$4 sm:$0xff]  }
 0x257   :  { %4435 = vmatpush1.bf16.msra.mxu0 %v9623_v17  ;;  %v9703_v17 = vld [vmem:[#allocation2 + $0xec4] ss:$48 sps:$4 sm:$0xff]  }
 0x258   :  { %4436 = vmatprep.subr.bf16.mxu0 %v9631_v23  ;;  %v9698_v23 = vld [vmem:[#allocation2 + $0xaa8] ss:$48 sps:$4 sm:$0xff]  }
 0x259   :  { %4568 = vmatpush1.bf16.msra.mxu1 %v9620_v20  ;;  %v9700_v20 = vld [vmem:[#allocation2 + $0xaac] ss:$48 sps:$4 sm:$0xff]  }
 0x25a   :  { %4578 = vmatprep.subr.bf16.mxu1 %v9628_v22  ;;  %v9701_v22 = vld [vmem:[#allocation2 + $0xec0] ss:$48 sps:$4 sm:$0xff]  }
 0x25b   :  { %4437 = vmatpush1.bf16.msra.mxu0 %v9629_v25  ;;  %v9706_v25 = vld [vmem:[#allocation2 + $0xb0c] ss:$48 sps:$4 sm:$0xff]  }
 0x25c   :  { %4570 = vmatmul.mubr.bf16.vlgmr.msra.gmra.mrb[20].mxu1 %v10521_v9  ;;  %4438 = vmatprep.subr.bf16.mxu0 %v9637_v27  ;;  %v9644_v9 = vld [vmem:[#allocation2 + $0x748] ss:$48 sps:$4 sm:$0xff]  }
 0x25d   :  { %4579 = vmatpush1.bf16.msra.mxu1 %v9626_v51  ;;  %4610 = vmatprep.mubr.bf16.mxu1 %v10528_v36  ;;  %v9661_v36 = vld [vmem:[#allocation2 + $0xc24] ss:$48 sps:$4 sm:$0xff]   ;;  %v9704_v27 = vld [vmem:[#allocation2 + $0xb08] ss:$48 sps:$4 sm:$0xff]  }
 0x25e   :  { %4580 = vmatprep.subr.bf16.mxu1 %v9634_v26  ;;  %v9709_v51 = vld [vmem:[#allocation2 + $0xf24] ss:$48 sps:$4 sm:$0xff]   ;;  %v9707_v26 = vld [vmem:[#allocation2 + $0xf20] ss:$48 sps:$4 sm:$0xff]  }
 0x25f   :  { %4439 = vmatpush1.bf16.msra.mxu0 %v9635_v28  ;;  %v9712_v28 = vld [vmem:[#allocation2 + $0xb6c] ss:$48 sps:$4 sm:$0xff]  }
 0x260   :  { %4440 = vmatprep.subr.bf16.mxu0 %v9643_v32  ;;  %v9710_v32 = vld [vmem:[#allocation2 + $0xb68] ss:$48 sps:$4 sm:$0xff]  }
 0x261   :  { %4581 = vmatpush1.bf16.msra.mxu1 %v9632_v30  ;;  %v9715_v30 = vld [vmem:[#allocation2 + $0xf84] ss:$48 sps:$4 sm:$0xff]  }
 0x262   :  { %4582 = vmatprep.subr.bf16.mxu1 %v9640_v31  ;;  %v9713_v31 = vld [vmem:[#allocation2 + $0xf80] ss:$48 sps:$4 sm:$0xff]  }
 0x263   :  { %4441 = vmatpush1.bf16.msra.mxu0 %v9641_v33  ;;  %v9718_v33 = vld [vmem:[#allocation2 + $0xbcc] ss:$48 sps:$4 sm:$0xff]  }
 0x264   :  { %4442 = vmatprep.subr.bf16.mxu0 %v9649_v37  ;;  %v9716_v37 = vld [vmem:[#allocation2 + $0xbc8] ss:$48 sps:$4 sm:$0xff]  }
 0x265   :  { %4583 = vmatpush1.bf16.msra.mxu1 %v9638_v34  ;;  %v9721_v34 = vld [vmem:[#allocation2 + $0xfe4] ss:$48 sps:$4 sm:$0xff]  }
 0x266   :  { %4584 = vmatprep.subr.bf16.mxu1 %v9646_v35  ;;  %v9719_v35 = vld [vmem:[#allocation2 + $0xfe0] ss:$48 sps:$4 sm:$0xff]  }
 0x267   :  { %4443 = vmatpush1.bf16.msra.mxu0 %v9647_v38  ;;  %v9724_v38 = vld [vmem:[#allocation2 + $0xc2c] ss:$48 sps:$4 sm:$0xff]  }
 0x268   :  { %4444 = vmatprep.subr.bf16.mxu0 %v9655_v41  ;;  %v9722_v41 = vld [vmem:[#allocation2 + $0xc28] ss:$48 sps:$4 sm:$0xff]  }
 0x269   :  { %4585 = vmatpush1.bf16.msra.mxu1 %v9644_v9  ;;  %v9727_v9 = vld [vmem:[#allocation2 + $0x1044] ss:$48 sps:$4 sm:$0xff]  }
 0x26a   :  { %4586 = vmatprep.subr.bf16.mxu1 %v9652_v39  ;;  %v9725_v39 = vld [vmem:[#allocation2 + $0x1040] ss:$48 sps:$4 sm:$0xff]  }
 0x26b   :  { %4445 = vmatpush1.bf16.msra.mxu0 %v9653_v42  ;;  %v9730_v42 = vld [vmem:[#allocation2 + $0xc8c] ss:$48 sps:$4 sm:$0xff]  }
 0x26c   :  { %4455 = vmatprep.subr.bf16.mxu0 %v9661_v36  ;;  %v9731_v36 = vld [vmem:[#allocation2 + $0x10a0] ss:$48 sps:$4 sm:$0xff]  }
 0x26d   :  { %4587 = vmatpush1.bf16.msra.mxu1 %v9650_v43  ;;  %v9733_v43 = vld [vmem:[#allocation2 + $0x10a4] ss:$48 sps:$4 sm:$0xff]  }
 0x26e   :  { %4588 = vmatprep.subr.bf16.mxu1 %v9658_v45  ;;  %4447 = vmatmul.mubr.bf16.vlgmr.msra.gmra.mrb[8].mxu0 %v10535_v18  ;;  %v9728_v45 = vld [vmem:[#allocation2 + $0xc88] ss:$48 sps:$4 sm:$0xff]  }
 0x26f   :  { %4456 = vmatpush1.bf16.msra.mxu0 %v9659_v46  ;;  %4487 = vmatprep.mubr.bf16.mxu0 %v10540_v24  ;;  %v9736_v46 = vld [vmem:[#allocation2 + $0xcec] ss:$48 sps:$4 sm:$0xff]  }
 0x270   :  { %4457 = vmatprep.subr.bf16.mxu0 %v9667_v48  ;;  %v9734_v48 = vld [vmem:[#allocation2 + $0xce8] ss:$48 sps:$4 sm:$0xff]  }
 0x271   :  { %4589 = vmatpush1.bf16.msra.mxu1 %v9656_v47  ;;  %v9739_v47 = vld [vmem:[#allocation2 + $0x1104] ss:$48 sps:$4 sm:$0xff]  }
 0x272   :  { %4590 = vmatprep.subr.bf16.mxu1 %v9664_v54  ;;  %v9737_v54 = vld [vmem:[#allocation2 + $0x1100] ss:$48 sps:$4 sm:$0xff]  }
 0x273   :  { %4458 = vmatpush1.bf16.msra.mxu0 %v9665_v49  ;;  %v9742_v49 = vld [vmem:[#allocation2 + $0xd4c] ss:$48 sps:$4 sm:$0xff]  }
 0x274   :  { %4459 = vmatprep.subr.bf16.mxu0 %v9673_v52  ;;  %v9751_v52 = vld [vmem:[#allocation2 + $0x11c4] ss:$48 sps:$4 sm:$0xff]  }
 0x275   :  { %4591 = vmatpush1.bf16.msra.mxu1 %v9662_v57  ;;  %v9745_v57 = vld [vmem:[#allocation2 + $0x1164] ss:$48 sps:$4 sm:$0xff]  }
 0x276   :  { %4592 = vmatprep.subr.bf16.mxu1 %v9670_v50  ;;  %v9743_v50 = vld [vmem:[#allocation2 + $0x1160] ss:$48 sps:$4 sm:$0xff]  }
 0x277   :  { %4460 = vmatpush1.bf16.msra.mxu0 %v9671_v56  ;;  %v9748_v56 = vld [vmem:[#allocation2 + $0xdac] ss:$48 sps:$4 sm:$0xff]  }
 0x278   :  { %4461 = vmatprep.subr.bf16.mxu0 %v9679_v60  ;;  %v9757_v60 = vld [vmem:[#allocation6 + $0x4] ss:$12 sps:$4 sm:$0xff]  }
 0x279   :  { %4593 = vmatpush1.bf16.msra.mxu1 %v9668_v58  ;;  %v9749_v58 = vld [vmem:[#allocation2 + $0x11c0] ss:$48 sps:$4 sm:$0xff]  }
 0x27a   :  { %4594 = vmatprep.subr.bf16.mxu1 %v9676_v59  ;;  %v9746_v59 = vld [vmem:[#allocation2 + $0xda8] ss:$48 sps:$4 sm:$0xff]  }
 0x27b   :  { %4462 = vmatpush1.bf16.msra.mxu0 %v9677_v61  ;;  %v4702_v61 = vmul.f32 %v10587_v44, %v10587_v44  ;;  %v9769_v44 = vld [vmem:[#allocation6 + $0x34] ss:$12 sps:$4 sm:$0xff]  }
 0x27c   :  { %4463 = vmatprep.subr.bf16.mxu0 %v9685_v1  ;;  %v9760_v1 = vld [vmem:[#allocation2 + $0xe6c] ss:$48 sps:$4 sm:$0xff]  }
 0x27d   :  { %4595 = vmatpush1.bf16.msra.mxu1 %v9674_v62  ;;  %v9755_v62 = vld [vmem:[#allocation6] ss:$12 sps:$4 sm:$0xff]  }
 0x27e   :  { %4596 = vmatprep.subr.bf16.mxu1 %v9682_v63  ;;  %v9752_v63 = vld [vmem:[#allocation2 + $0xe08] ss:$48 sps:$4 sm:$0xff]  }
 0x27f   :  { %4464 = vmatpush1.bf16.msra.mxu0 %v9683_v3  ;;  %v9763_v3 = vld [vmem:[#allocation6 + $0x1c] ss:$12 sps:$4 sm:$0xff]  }
 0x280   :  { %4465 = vmatprep.subr.bf16.mxu0 %v9691_v7  ;;  %v9758_v7 = vld [vmem:[#allocation2 + $0xe68] ss:$48 sps:$4 sm:$0xff]  }
 0x281   :  { %4597 = vmatpush1.bf16.msra.mxu1 %v9680_v5  ;;  %v10615_v5 = vpack.c.bf16 %v4702_v61, %v4702_v61  ;;  %v9815_v61 = vld [vmem:[#allocation6 + $0xf0] ss:$12 sps:$4 sm:$0xff]  }
 0x282   :  { %4598 = vmatprep.subr.bf16.mxu1 %v9688_v6  ;;  %v9761_v6 = vld [vmem:[#allocation6 + $0x18] ss:$12 sps:$4 sm:$0xff]  }
 0x283   :  { %4466 = vmatpush1.bf16.msra.mxu0 %v9689_v8  ;;  %v9766_v8 = vld [vmem:[#allocation2 + $0xecc] ss:$48 sps:$4 sm:$0xff]  }
 0x284   :  { %4467 = vmatprep.subr.bf16.mxu0 %v9697_v14  ;;  %v9775_v14 = vld [vmem:[#allocation6 + $0x4c] ss:$12 sps:$4 sm:$0xff]  }
 0x285   :  { %4599 = vmatpush1.bf16.msra.mxu1 %v9686_v11  ;;  %v9767_v11 = vld [vmem:[#allocation6 + $0x30] ss:$12 sps:$4 sm:$0xff]  }
 0x286   :  { %4600 = vmatprep.subr.bf16.mxu1 %v9694_v13  ;;  %v9764_v13 = vld [vmem:[#allocation2 + $0xec8] ss:$48 sps:$4 sm:$0xff]  }
 0x287   :  { %4468 = vmatpush1.bf16.msra.mxu0 %v9695_v15  ;;  %v9772_v15 = vld [vmem:[#allocation2 + $0xf2c] ss:$48 sps:$4 sm:$0xff]  }
 0x288   :  { %4469 = vmatprep.subr.bf16.mxu0 %v9703_v17  ;;  %v9770_v17 = vld [vmem:[#allocation2 + $0xf28] ss:$48 sps:$4 sm:$0xff]  }
 0x289   :  { %4601 = vmatpush1.bf16.msra.mxu1 %v9692_v16  ;;  %v9773_v16 = vld [vmem:[#allocation6 + $0x48] ss:$12 sps:$4 sm:$0xff]  }
 0x28a   :  { %4602 = vmatprep.subr.bf16.mxu1 %v9700_v20  ;;  %v9781_v20 = vld [vmem:[#allocation6 + $0x64] ss:$12 sps:$4 sm:$0xff]  }
 0x28b   :  { %4470 = vmatpush1.bf16.msra.mxu0 %v9701_v22  ;;  %v9778_v22 = vld [vmem:[#allocation2 + $0xf8c] ss:$48 sps:$4 sm:$0xff]  }
 0x28c   :  { %4471 = vmatprep.subr.bf16.mxu0 %v9709_v51  ;;  %v735_v51 = vsub.s32 5, %v10575_v12 }
 0x28d   :  { %4603 = vmatpush1.bf16.msra.mxu1 %v9698_v23  ;;  %v731_v23 = vsub.s32 4, %v10575_v12 }
 0x28e   :  { %4604 = vmatprep.subr.bf16.mxu1 %v9706_v25  ;;  %v9779_v25 = vld [vmem:[#allocation6 + $0x60] ss:$12 sps:$4 sm:$0xff]  }
 0x28f   :  { %4472 = vmatpush1.bf16.msra.mxu0 %v9707_v26  ;;  %v9776_v26 = vld [vmem:[#allocation2 + $0xf88] ss:$48 sps:$4 sm:$0xff]  }
 0x290   :  { %4473 = vmatprep.subr.bf16.mxu0 %v9715_v30  ;;  %v10621_v30 = vld [vmem:[#allocation4] sm:$0xff] }
 0x291   :  { %4605 = vmatpush1.bf16.msra.mxu1 %v9704_v27  ;;  %v9787_v27 = vld [vmem:[#allocation6 + $0x7c] ss:$12 sps:$4 sm:$0xff]  }
 0x292   :  { %4606 = vmatprep.subr.bf16.mxu1 %v9712_v28  ;;  %v9784_v28 = vld [vmem:[#allocation2 + $0xfec] ss:$48 sps:$4 sm:$0xff]  }
 0x293   :  { %4474 = vmatpush1.bf16.msra.mxu0 %v9713_v31  ;;  %v732_v31 = vrot.slane %v10621_v30, %v731_v23  ;;  %v9839_v23 = vld [vmem:[#allocation6 + $0x16c] ss:$12 sps:$4 sm:$0xff]  }
 0x294   :  { %4475 = vmatprep.subr.bf16.mxu0 %v9721_v34  ;;  %v9782_v34 = vld [vmem:[#allocation2 + $0xfe8] ss:$48 sps:$4 sm:$0xff]  }
 0x295   :  { %4607 = vmatpush1.bf16.msra.mxu1 %v9710_v32  ;;  %v736_v32 = vrot.slane %v10621_v30, %v735_v51  ;;  %v9837_v51 = vld [vmem:[#allocation6 + $0x168] ss:$12 sps:$4 sm:$0xff]  }
 0x296   :  { %4608 = vmatprep.subr.bf16.mxu1 %v9718_v33  ;;  %v9785_v33 = vld [vmem:[#allocation6 + $0x78] ss:$12 sps:$4 sm:$0xff]  }
 0x297   :  { %4476 = vmatpush1.bf16.msra.mxu0 %v9719_v35  ;;  %v9793_v35 = vld [vmem:[#allocation6 + $0x94] ss:$12 sps:$4 sm:$0xff]  }
 0x298   :  { %4477 = vmatprep.subr.bf16.mxu0 %v9727_v9 }
 0x299   :  { %4609 = vmatpush1.bf16.msra.mxu1 %v9716_v37 }
 0x29a   :  { %4619 = vmatprep.subr.bf16.mxu1 %v9724_v38  ;;  %v9790_v38 = vld [vmem:[#allocation2 + $0x104c] ss:$48 sps:$4 sm:$0xff]  }
 0x29b   :  { %4478 = vmatpush1.bf16.msra.mxu0 %v9725_v39 }
 0x29c   :  { %4611 = vmatmul.mubr.bf16.vlgmr.msra.gmra.mrb[20].mxu1 %v10535_v18  ;;  %4479 = vmatprep.subr.bf16.mxu0 %v9733_v43  ;;  %v9740_v18 = vld [vmem:[#allocation2 + $0xd48] ss:$48 sps:$4 sm:$0xff]  }
 0x29d   :  { %4620 = vmatpush1.bf16.msra.mxu1 %v9722_v41  ;;  %4651 = vmatprep.mubr.bf16.mxu1 %v10540_v24  ;;  %v9754_v24 = vld [vmem:[#allocation2 + $0xe0c] ss:$48 sps:$4 sm:$0xff]  }
 0x29e   :  { %4621 = vmatprep.subr.bf16.mxu1 %v9730_v42  ;;  %v9791_v43 = vld [vmem:[#allocation6 + $0x90] ss:$12 sps:$4 sm:$0xff]  }
 0x29f   :  { %4480 = vmatpush1.bf16.msra.mxu0 %v9731_v36 }
 0x2a0   :  { %4481 = vmatprep.subr.bf16.mxu0 %v9739_v47  ;;  %v9799_v47 = vld [vmem:[#allocation6 + $0xac] ss:$12 sps:$4 sm:$0xff]  }
 0x2a1   :  { %4622 = vmatpush1.bf16.msra.mxu1 %v9728_v45 }
 0x2a2   :  { %4623 = vmatprep.subr.bf16.mxu1 %v9736_v46  ;;  %v9788_v46 = vld [vmem:[#allocation2 + $0x1048] ss:$48 sps:$4 sm:$0xff]  }
 0x2a3   :  { %4482 = vmatpush1.bf16.msra.mxu0 %v9737_v54 }
 0x2a4   :  { %4483 = vmatprep.subr.bf16.mxu0 %v9745_v57  ;;  %v9794_v57 = vld [vmem:[#allocation2 + $0x10a8] ss:$48 sps:$4 sm:$0xff]  }
 0x2a5   :  { %4624 = vmatpush1.bf16.msra.mxu1 %v9734_v48  ;;  %v9796_v48 = vld [vmem:[#allocation2 + $0x10ac] ss:$48 sps:$4 sm:$0xff]  }
 0x2a6   :  { %4625 = vmatprep.subr.bf16.mxu1 %v9742_v49  ;;  %v9797_v49 = vld [vmem:[#allocation6 + $0xa8] ss:$12 sps:$4 sm:$0xff]  }
 0x2a7   :  { %4484 = vmatpush1.bf16.msra.mxu0 %v9743_v50  ;;  %v9805_v50 = vld [vmem:[#allocation6 + $0xc4] ss:$12 sps:$4 sm:$0xff]  }
 0x2a8   :  { %4485 = vmatprep.subr.bf16.mxu0 %v9751_v52  ;;  %v9800_v52 = vld [vmem:[#allocation2 + $0x1108] ss:$48 sps:$4 sm:$0xff]  }
 0x2a9   :  { %4626 = vmatpush1.bf16.msra.mxu1 %v9740_v18  ;;  %v9802_v18 = vld [vmem:[#allocation2 + $0x110c] ss:$48 sps:$4 sm:$0xff]  }
 0x2aa   :  { %4627 = vmatprep.subr.bf16.mxu1 %v9748_v56  ;;  %v9811_v56 = vld [vmem:[#allocation6 + $0xdc] ss:$12 sps:$4 sm:$0xff]  }
 0x2ab   :  { %4486 = vmatpush1.bf16.msra.mxu0 %v9749_v58  ;;  %v9808_v58 = vld [vmem:[#allocation2 + $0x116c] ss:$48 sps:$4 sm:$0xff]  }
 0x2ac   :  { %6645 = vmatprep.subr.bf16.mxu0 %v9757_v60  ;;  %v9814_v60 = vld [vmem:[#allocation2 + $0x11cc] ss:$48 sps:$4 sm:$0xff]  }
 0x2ad   :  { %4628 = vmatpush1.bf16.msra.mxu1 %v9746_v59  ;;  %v9806_v59 = vld [vmem:[#allocation2 + $0x1168] ss:$48 sps:$4 sm:$0xff]  }
 0x2ae   :  { %4629 = vmatprep.subr.bf16.mxu1 %v9754_v24  ;;  %4488 = vmatmul.mubr.bf16.vlgmr.msra.gmra.mrb[8].mxu0 %v10549_v29  ;;  %v9817_v24 = vld [vmem:[#allocation6 + $0xf4] ss:$12 sps:$4 sm:$0xff]  }
 0x2af   :  { %6646 = vmatpush1.bf16.msra.mxu0 %v9755_v62  ;;  %6677 = vmatprep.mubr.bf16.mxu0 %v10615_v5  ;;  %v9812_v62 = vld [vmem:[#allocation2 + $0x11c8] ss:$48 sps:$4 sm:$0xff]  }
 0x2b0   :  { %6647 = vmatprep.subr.bf16.mxu0 %v9763_v3  ;;  %v9818_v3 = vld [vmem:[#allocation6 + $0x108] ss:$12 sps:$4 sm:$0xff]  }
 0x2b1   :  { %4630 = vmatpush1.bf16.msra.mxu1 %v9752_v63  ;;  %v9820_v63 = vld [vmem:[#allocation6 + $0x10c] ss:$12 sps:$4 sm:$0xff]  }
 0x2b2   :  { %4631 = vmatprep.subr.bf16.mxu1 %v9760_v1  ;;  %v9826_v1 = vld [vmem:[#allocation2 + $0x122c] ss:$48 sps:$4 sm:$0xff]  }
 0x2b3   :  { %6648 = vmatpush1.bf16.msra.mxu0 %v9761_v6  ;;  %v9823_v6 = vld [vmem:[#allocation6 + $0x124] ss:$12 sps:$4 sm:$0xff]  }
 0x2b4   :  { %6649 = vmatprep.subr.bf16.mxu0 %v9769_v44  ;;  %v9830_v44 = vld [vmem:[#allocation6 + $0xc8] ss:$12 sps:$4 sm:$0xff]  }
 0x2b5   :  { %4632 = vmatpush1.bf16.msra.mxu1 %v9758_v7  ;;  %v9824_v7 = vld [vmem:[#allocation2 + $0x1228] ss:$48 sps:$4 sm:$0xff]  }
 0x2b6   :  { %4633 = vmatprep.subr.bf16.mxu1 %v9766_v8  ;;  %v9821_v8 = vld [vmem:[#allocation6 + $0x120] ss:$12 sps:$4 sm:$0xff]  }
 0x2b7   :  { %6650 = vmatpush1.bf16.msra.mxu0 %v9767_v11  ;;  %v9829_v11 = vld [vmem:[#allocation6 + $0x13c] ss:$12 sps:$4 sm:$0xff]  }
 0x2b8   :  { %6651 = vmatprep.subr.bf16.mxu0 %v9775_v14  ;;  %v9827_v14 = vld [vmem:[#allocation6 + $0x138] ss:$12 sps:$4 sm:$0xff]  }
 0x2b9   :  { %4634 = vmatpush1.bf16.msra.mxu1 %v9764_v13  ;;  %v727_v13 = vsub.s32 3, %v10575_v12 }
 0x2ba   :  { %4635 = vmatprep.subr.bf16.mxu1 %v9772_v15  ;;  %v9834_v15 = vld [vmem:[#allocation6 + $0x154] ss:$12 sps:$4 sm:$0xff]  }
 0x2bb   :  { %6652 = vmatpush1.bf16.msra.mxu0 %v9773_v16  ;;  %v728_v16 = vrot.slane %v10621_v30, %v727_v13 }
 0x2bc   :  { %6653 = vmatprep.subr.bf16.mxu0 %v9781_v20 }
 0x2bd   :  { %4636 = vmatpush1.bf16.msra.mxu1 %v9770_v17  ;;  %v9831_v17 = vld [vmem:[#allocation6 + $0x8] ss:$12 sps:$4 sm:$0xff]   ;;  %v8798_v20 = vadd.f32 %v10595_v55, %v728_v16  ;;  %v9844_v55 = vld [vmem:[#allocation6 + $0x184] ss:$12 sps:$4 sm:$0xff]  }
 0x2be   :  { %4637 = vmatprep.subr.bf16.mxu1 %v9778_v22  ;;  %v9835_v22 = vld [vmem:[#allocation6 + $0xe0] ss:$12 sps:$4 sm:$0xff]   ;;  %v9889_v16 = vld [vmem:[#allocation6 + $0x25c] ss:$12 sps:$4 sm:$0xff]  }
 0x2bf   :  { %6654 = vmatpush1.bf16.msra.mxu0 %v9779_v25 }
 0x2c0   :  { %6655 = vmatprep.subr.bf16.mxu0 %v9787_v27 }
 0x2c1   :  { %4638 = vmatpush1.bf16.msra.mxu1 %v9776_v26  ;;  %v4161_v37 = vpop.f32.mrb[4].mxu0  ;;  %v4701_v26 = vmul.f32 %v10584_v40, %v10584_v40  ;;  %v9845_v40 = vld [vmem:[#allocation6 + $0x110] ss:$12 sps:$4 sm:$0xff]  }
 0x2c2   :  { %4639 = vmatprep.subr.bf16.mxu1 %v9784_v28  ;;  %v8799_v9 = vadd.f32 %v4161_v37, %v732_v31  ;;  %v4163_v39 = vpop.f32.mrb[5].mxu0  ;;  %v9836_v28 = vld [vmem:[#allocation6 + $0x20] ss:$12 sps:$4 sm:$0xff]   ;;  %v4704_v31 = vmul.f32 %v8798_v20, %v8798_v20  ;;  %v9849_v37 = vld [vmem:[#allocation6 + $0x19c] ss:$12 sps:$4 sm:$0xff]  }
 0x2c3   :  { %v8801_v41 = vadd.f32 %v4163_v39, %v736_v32  ;;  %v4165_v42 = vpop.f32.mrb[6].mxu0  ;;  %6656 = vmatpush1.bf16.msra.mxu0 %v9785_v33  ;;  %v9840_v33 = vld [vmem:[#allocation6 + $0xf8] ss:$12 sps:$4 sm:$0xff]   ;;  %v9886_v20 = vld [vmem:[#allocation6 + $0x1d0] ss:$12 sps:$4 sm:$0xff]  }
 0x2c4   :  { %v10626_v36 = vadd.f32 %v8799_v9, %v10598_v2  ;;  %v4166_v45 = vpop.f32.mrb[7].mxu0  ;;  %6657 = vmatprep.subr.bf16.mxu0 %v9793_v35  ;;  %v9803_v2 = vld [vmem:[#allocation6 + $0xc0] ss:$12 sps:$4 sm:$0xff]   ;;  %v9841_v35 = vld [vmem:[#allocation6 + $0x38] ss:$12 sps:$4 sm:$0xff]  }
 0x2c5   :  { %4640 = vmatpush1.bf16.msra.mxu1 %v9782_v34  ;;  %v10629_v54 = vadd.f32 %v8801_v41, %v10602_v4  ;;  %v9809_v4 = vld [vmem:[#allocation6 + $0xd8] ss:$12 sps:$4 sm:$0xff]   ;;  %v4713_v34 = vpack.c.bf16 %v4701_v26, %v4701_v26  ;;  %v9846_v41 = vld [vmem:[#allocation6 + $0x50] ss:$12 sps:$4 sm:$0xff]   ;;  %v9854_v42 = vld [vmem:[#allocation6 + $0x1b4] ss:$12 sps:$4 sm:$0xff]  }
 0x2c6   :  { %4641 = vmatprep.subr.bf16.mxu1 %v9790_v38  ;;  %v4716_v38 = vpack.c.bf16 %v4704_v31, %v4704_v31  ;;  %v9847_v9 = vld [vmem:[#allocation6 + $0x198] ss:$12 sps:$4 sm:$0xff]   ;;  %v9850_v45 = vld [vmem:[#allocation6 + $0x128] ss:$12 sps:$4 sm:$0xff]  }
 0x2c7   :  { %6658 = vmatpush1.bf16.msra.mxu0 %v9791_v43  ;;  %v9891_v26 = vld [vmem:[#allocation6 + $0x1e8] ss:$12 sps:$4 sm:$0xff]  }
 0x2c8   :  { %6659 = vmatprep.subr.bf16.mxu0 %v9799_v47  ;;  %v9852_v47 = vld [vmem:[#allocation6 + $0x1b0] ss:$12 sps:$4 sm:$0xff]   ;;  %v9897_v31 = vld [vmem:[#allocation6 + $0x288] ss:$12 sps:$4 sm:$0xff]  }
 0x2c9   :  { %4642 = vmatpush1.bf16.msra.mxu1 %v9788_v46 }
 0x2ca   :  { %4643 = vmatprep.subr.bf16.mxu1 %v9796_v48  ;;  %v9851_v48 = vld [vmem:[#allocation6 + $0x68] ss:$12 sps:$4 sm:$0xff]  }
 0x2cb   :  { %6660 = vmatpush1.bf16.msra.mxu0 %v9797_v49  ;;  %v9859_v49 = vld [vmem:[#allocation6 + $0x1cc] ss:$12 sps:$4 sm:$0xff]  }
 0x2cc   :  { %6661 = vmatprep.subr.bf16.mxu0 %v9805_v50  ;;  %v9857_v50 = vld [vmem:[#allocation6 + $0x1c8] ss:$12 sps:$4 sm:$0xff]  }
 0x2cd   :  { %4644 = vmatpush1.bf16.msra.mxu1 %v9794_v57  ;;  %v9855_v57 = vld [vmem:[#allocation6 + $0x140] ss:$12 sps:$4 sm:$0xff]  }
 0x2ce   :  { %4645 = vmatprep.subr.bf16.mxu1 %v9802_v18  ;;  %v9856_v18 = vld [vmem:[#allocation6 + $0x80] ss:$12 sps:$4 sm:$0xff]  }
 0x2cf   :  { %6662 = vmatpush1.bf16.msra.mxu0 %v9803_v2  ;;  %v9864_v2 = vld [vmem:[#allocation6 + $0x1e4] ss:$12 sps:$4 sm:$0xff]  }
 0x2d0   :  { %6663 = vmatprep.subr.bf16.mxu0 %v9811_v56  ;;  %v9862_v56 = vld [vmem:[#allocation6 + $0x1e0] ss:$12 sps:$4 sm:$0xff]  }
 0x2d1   :  { %4646 = vmatpush1.bf16.msra.mxu1 %v9800_v52  ;;  %v9860_v52 = vld [vmem:[#allocation6 + $0x158] ss:$12 sps:$4 sm:$0xff]  }
 0x2d2   :  { %4647 = vmatprep.subr.bf16.mxu1 %v9808_v58  ;;  %v9861_v58 = vld [vmem:[#allocation6 + $0x98] ss:$12 sps:$4 sm:$0xff]  }
 0x2d3   :  { %6664 = vmatpush1.bf16.msra.mxu0 %v9809_v4  ;;  %v9869_v4 = vld [vmem:[#allocation6 + $0x1fc] ss:$12 sps:$4 sm:$0xff]  }
 0x2d4   :  { %6665 = vmatprep.subr.bf16.mxu0 %v9817_v24  ;;  %v9867_v24 = vld [vmem:[#allocation6 + $0x1f8] ss:$12 sps:$4 sm:$0xff]  }
 0x2d5   :  { %4648 = vmatpush1.bf16.msra.mxu1 %v9806_v59  ;;  %v9865_v59 = vld [vmem:[#allocation6 + $0x170] ss:$12 sps:$4 sm:$0xff]  }
 0x2d6   :  { %4649 = vmatprep.subr.bf16.mxu1 %v9814_v60  ;;  %v9866_v60 = vld [vmem:[#allocation6 + $0xb0] ss:$12 sps:$4 sm:$0xff]  }
 0x2d7   :  { %6666 = vmatpush1.bf16.msra.mxu0 %v9815_v61  ;;  %v9874_v61 = vld [vmem:[#allocation6 + $0x214] ss:$12 sps:$4 sm:$0xff]  }
 0x2d8   :  { %6667 = vmatprep.subr.bf16.mxu0 %v9820_v63  ;;  %v9872_v63 = vld [vmem:[#allocation6 + $0x210] ss:$12 sps:$4 sm:$0xff]  }
 0x2d9   :  { %4650 = vmatpush1.bf16.msra.mxu1 %v9812_v62  ;;  %v9870_v62 = vld [vmem:[#allocation6 + $0x248] ss:$12 sps:$4 sm:$0xff]  }
 0x2da   :  { %4660 = vmatprep.subr.bf16.mxu1 %v9826_v1  ;;  %v9871_v1 = vld [vmem:[#allocation6 + $0x188] ss:$12 sps:$4 sm:$0xff]  }
 0x2db   :  { %6668 = vmatpush1.bf16.msra.mxu0 %v9818_v3  ;;  %v9875_v3 = vld [vmem:[#allocation6 + $0x260] ss:$12 sps:$4 sm:$0xff]  }
 0x2dc   :  { %4652 = vmatmul.mubr.bf16.vlgmr.msra.gmra.mrb[20].mxu1 %v10549_v29  ;;  %6669 = vmatprep.subr.bf16.mxu0 %v9823_v6  ;;  %v9832_v29 = vld [vmem:[#allocation6 + $0x150] ss:$12 sps:$4 sm:$0xff]   ;;  %v9879_v6 = vld [vmem:[#allocation6 + $0x22c] ss:$12 sps:$4 sm:$0xff]  }
 0x2dd   :  { %4661 = vmatpush1.bf16.msra.mxu1 %v9824_v7  ;;  %4692 = vmatprep.mubr.bf16.mxu1 %v10365_v0  ;;  %v9877_v7 = vld [vmem:[#allocation6 + $0x228] ss:$12 sps:$4 sm:$0xff]  }
 0x2de   :  { %8552 = vmatprep.subr.bf16.mxu1 %v9830_v44  ;;  %v9876_v44 = vld [vmem:[#allocation6 + $0x1a0] ss:$12 sps:$4 sm:$0xff]  }
 0x2df   :  { %6670 = vmatpush1.bf16.msra.mxu0 %v9821_v8  ;;  %v9884_v8 = vld [vmem:[#allocation6 + $0x244] ss:$12 sps:$4 sm:$0xff]  }
 0x2e0   :  { %6671 = vmatprep.subr.bf16.mxu0 %v9829_v11  ;;  %v9880_v11 = vld [vmem:[#allocation6 + $0x278] ss:$12 sps:$4 sm:$0xff]  }
 0x2e3   :  { %6672 = vmatpush1.bf16.msra.mxu0 %v9827_v14  ;;  %v9882_v14 = vld [vmem:[#allocation6 + $0x240] ss:$12 sps:$4 sm:$0xff]  }
 0x2e4   :  { %6673 = vmatprep.subr.bf16.mxu0 %v9834_v15  ;;  %v9881_v15 = vld [vmem:[#allocation6 + $0x1b8] ss:$12 sps:$4 sm:$0xff]  }
 0x2e7   :  { %v10638_v25 = vpop.f32.mrb[12].mxu1  ;;  %6674 = vmatpush1.bf16.msra.mxu0 %v9832_v29  ;;  %v9885_v29 = vld [vmem:[#allocation6 + $0x290] ss:$12 sps:$4 sm:$0xff]  }
 0x2e8   :  { %8223 = vmatmul.mubr.msk.bf16.vlgmr.msra.gmra.mrb[20].mxu1 %vm3713_vm0, %v10507_v10  ;;  %v10642_v0 = vpop.f32.mrb[13].mxu1  ;;  %6675 = vmatprep.subr.bf16.mxu0 %v9839_v23  ;;  %v9842_v10 = vld [vmem:[#allocation6 + $0x180] ss:$12 sps:$4 sm:$0xff]   ;;  %v9890_v23 = vld [vmem:[#allocation6 + $0x2a8] ss:$12 sps:$4 sm:$0xff]  }
 0x2e9   :  { %8553 = vmatpush3.bf16.msra.mxu1 %v9831_v17  ;;  %6923 = vmatprep.mubr.bf16.mxu1 %v10615_v5  ;;  %v4370_v27 = vpop.f32.mrb[14].mxu1  ;;  %v9887_v17 = vld [vmem:[#allocation6 + $0x258] ss:$12 sps:$4 sm:$0xff]  }
 0x2ea   :  { %v4371_v32 = vpop.f32.mrb[15].mxu1  ;;  %8554 = vmatprep.subr.bf16.mxu1 %v9835_v22  ;;  %v9894_v22 = vld [vmem:[#allocation6 + $0x274] ss:$12 sps:$4 sm:$0xff]   ;;  %v9899_v27 = vld [vmem:[#allocation6 + $0x28c] ss:$12 sps:$4 sm:$0xff]  }
 0x2eb   :  { %6676 = vmatpush1.bf16.msra.mxu0 %v9837_v51  ;;  %v9892_v51 = vld [vmem:[#allocation6 + $0x270] ss:$12 sps:$4 sm:$0xff]   ;;  %v9896_v32 = vld [vmem:[#allocation6 + $0x200] ss:$12 sps:$4 sm:$0xff]  }
 0x2ec   :  { %6686 = vmatprep.subr.bf16.mxu0 %v9844_v55  ;;  %v9895_v55 = vld [vmem:[#allocation6 + $0x2c0] ss:$12 sps:$4 sm:$0xff]  }
 0x2ed   :  { %8555 = vmatpush3.bf16.msra.mxu1 %v9836_v28  ;;  %v723_v28 = vsub.s32 2, %v10575_v12 }
 0x2ee   :  { %8556 = vmatprep.subr.bf16.mxu1 %v9840_v33  ;;  %6678 = vmatmul.mubr.bf16.vlgmr.msra.gmra.mrb[12].mxu0 %v4713_v34  ;;  %v9904_v33 = vld [vmem:[#allocation6 + $0x2a4] ss:$12 sps:$4 sm:$0xff]  }
 0x2ef   :  { %v10647_v5 = vpop.f32.mrb[16].mxu1  ;;  %6687 = vmatpush1.bf16.msra.mxu0 %v9842_v10  ;;  %6718 = vmatprep.mubr.bf16.mxu0 %v4716_v38  ;;  %v724_v10 = vrot.slane %v10621_v30, %v723_v28 }
 0x2f0   :  { %v10649_v39 = vpop.f32.mrb[17].mxu1  ;;  %6688 = vmatprep.subr.bf16.mxu0 %v9849_v37  ;;  %v9901_v37 = vld [vmem:[#allocation6 + $0x218] ss:$12 sps:$4 sm:$0xff]  }
 0x2f1   :  { %8557 = vmatpush3.bf16.msra.mxu1 %v9841_v35  ;;  %v4534_v43 = vpop.f32.mrb[18].mxu1  ;;  %v9902_v35 = vld [vmem:[#allocation6 + $0x2a0] ss:$12 sps:$4 sm:$0xff]  }
 0x2f2   :  { %8558 = vmatprep.subr.bf16.mxu1 %v9845_v40  ;;  %v4535_v46 = vpop.f32.mrb[19].mxu1  ;;  %v8797_v40 = vadd.f32 %v10591_v53, %v724_v10  ;;  %v9914_v43 = vld [vmem:[#allocation6 + $0x2d4] ss:$12 sps:$4 sm:$0xff]  }
 0x2f3   :  { %6689 = vmatpush1.bf16.msra.mxu0 %v9847_v9  ;;  %v9905_v9 = vld [vmem:[#allocation6 + $0x2f0] ss:$12 sps:$4 sm:$0xff]   ;;  %v9910_v46 = vld [vmem:[#allocation6 + $0x3c8] ss:$12 sps:$4 sm:$0xff]  }
 0x2f4   :  { %6690 = vmatprep.subr.bf16.mxu0 %v9854_v42  ;;  %v9906_v42 = vld [vmem:[#allocation6 + $0x230] ss:$12 sps:$4 sm:$0xff]   ;;  %v9951_v10 = vld [vmem:[#allocation6 + $0x488] ss:$12 sps:$4 sm:$0xff]  }
 0x2f5   :  { %8559 = vmatpush3.bf16.msra.mxu1 %v9846_v41  ;;  %v9907_v41 = vld [vmem:[#allocation6 + $0x2b8] ss:$12 sps:$4 sm:$0xff]  }
 0x2f6   :  { %8560 = vmatprep.subr.bf16.mxu1 %v9850_v45  ;;  %v4703_v45 = vmul.f32 %v8797_v40, %v8797_v40  ;;  %v9964_v40 = vld [vmem:[#allocation6 + $0x3c4] ss:$12 sps:$4 sm:$0xff]  }
 0x2f7   :  { %6691 = vmatpush1.bf16.msra.mxu0 %v9852_v47  ;;  %v4706_v47 = vmul.f32 %v10629_v54, %v10629_v54  ;;  %v9920_v54 = vld [vmem:[#allocation6 + $0x3f8] ss:$12 sps:$4 sm:$0xff]  }
 0x2f8   :  { %6692 = vmatprep.subr.bf16.mxu0 %v9859_v49  ;;  %v9911_v49 = vld [vmem:[#allocation6 + $0x308] ss:$12 sps:$4 sm:$0xff]   ;;  %v4715_v53 = vpack.c.bf16 %v4703_v45, %v4703_v45  ;;  %v9965_v45 = vld [vmem:[#allocation6 + $0x590] ss:$12 sps:$4 sm:$0xff]  }
 0x2f9   :  { %8561 = vmatpush3.bf16.msra.mxu1 %v9851_v48  ;;  %v9912_v48 = vld [vmem:[#allocation6 + $0x2d0] ss:$12 sps:$4 sm:$0xff]  }
 0x2fa   :  { %8562 = vmatprep.subr.bf16.mxu1 %v9855_v57  ;;  %v9915_v57 = vld [vmem:[#allocation6 + $0x3e0] ss:$12 sps:$4 sm:$0xff]  }
 0x2fb   :  { %6693 = vmatpush1.bf16.msra.mxu0 %v9857_v50  ;;  %v9919_v50 = vld [vmem:[#allocation6 + $0x2ec] ss:$12 sps:$4 sm:$0xff]  }
 0x2fc   :  { %6694 = vmatprep.subr.bf16.mxu0 %v9864_v2  ;;  %v9917_v2 = vld [vmem:[#allocation6 + $0x2e8] ss:$12 sps:$4 sm:$0xff]  }
 0x2fd   :  { %8563 = vmatpush3.bf16.msra.mxu1 %v9856_v18  ;;  %v4718_v18 = vpack.c.bf16 %v4706_v47, %v4706_v47  ;;  %v9966_v47 = vld [vmem:[#allocation6 + $0x4d0] ss:$12 sps:$4 sm:$0xff]  }
 0x2fe   :  { %8564 = vmatprep.subr.bf16.mxu1 %v9860_v52  ;;  %v9916_v52 = vld [vmem:[#allocation6 + $0x320] ss:$12 sps:$4 sm:$0xff]  }
 0x2ff   :  { %6695 = vmatpush1.bf16.msra.mxu0 %v9862_v56  ;;  %v9924_v56 = vld [vmem:[#allocation6 + $0x304] ss:$12 sps:$4 sm:$0xff]  }
 0x300   :  { %6696 = vmatprep.subr.bf16.mxu0 %v9869_v4  ;;  %v9921_v4 = vld [vmem:[#allocation6 + $0x338] ss:$12 sps:$4 sm:$0xff]  }
 0x301   :  { %8565 = vmatpush3.bf16.msra.mxu1 %v9861_v58  ;;  %v9922_v58 = vld [vmem:[#allocation6 + $0x300] ss:$12 sps:$4 sm:$0xff]  }
 0x302   :  { %8566 = vmatprep.subr.bf16.mxu1 %v9865_v59  ;;  %v9929_v59 = vld [vmem:[#allocation6 + $0x31c] ss:$12 sps:$4 sm:$0xff]  }
 0x303   :  { %6697 = vmatpush1.bf16.msra.mxu0 %v9867_v24  ;;  %v9925_v24 = vld [vmem:[#allocation6 + $0x410] ss:$12 sps:$4 sm:$0xff]  }
 0x304   :  { %6698 = vmatprep.subr.bf16.mxu0 %v9874_v61  ;;  %v9926_v61 = vld [vmem:[#allocation6 + $0x350] ss:$12 sps:$4 sm:$0xff]  }
 0x305   :  { %8567 = vmatpush3.bf16.msra.mxu1 %v9866_v60  ;;  %v9927_v60 = vld [vmem:[#allocation6 + $0x318] ss:$12 sps:$4 sm:$0xff]  }
 0x306   :  { %8574 = vmatprep.subr.bf16.mxu1 %v9870_v62  ;;  %v9934_v62 = vld [vmem:[#allocation6 + $0x334] ss:$12 sps:$4 sm:$0xff]  }
 0x307   :  { %6699 = vmatpush1.bf16.msra.mxu0 %v9872_v63  ;;  %v9930_v63 = vld [vmem:[#allocation6 + $0x428] ss:$12 sps:$4 sm:$0xff]  }
 0x308   :  { %6924 = vmatmul.mubr.bf16.vlgmr.msra.gmra.mrb[24].mxu1 %v4713_v34  ;;  %6700 = vmatprep.subr.bf16.mxu0 %v9879_v6  ;;  %v9900_v34 = vld [vmem:[#allocation6 + $0x2d8] ss:$12 sps:$4 sm:$0xff]  }
 0x309   :  { %8575 = vmatpush3.bf16.msra.mxu1 %v9871_v1  ;;  %6963 = vmatprep.mubr.bf16.mxu1 %v4716_v38  ;;  %v9909_v38 = vld [vmem:[#allocation6 + $0x2bc] ss:$12 sps:$4 sm:$0xff]   ;;  %v9939_v6 = vld [vmem:[#allocation6 + $0x34c] ss:$12 sps:$4 sm:$0xff]  }
 0x30a   :  { %8576 = vmatprep.subr.bf16.mxu1 %v9875_v3  ;;  %v9932_v1 = vld [vmem:[#allocation6 + $0x330] ss:$12 sps:$4 sm:$0xff]   ;;  %v9931_v3 = vld [vmem:[#allocation6 + $0x368] ss:$12 sps:$4 sm:$0xff]  }
 0x30b   :  { %6701 = vmatpush1.bf16.msra.mxu0 %v9877_v7  ;;  %v9935_v7 = vld [vmem:[#allocation6 + $0x440] ss:$12 sps:$4 sm:$0xff]  }
 0x30c   :  { %6702 = vmatprep.subr.bf16.mxu0 %v9884_v8  ;;  %v9937_v8 = vld [vmem:[#allocation6 + $0x348] ss:$12 sps:$4 sm:$0xff]  }
 0x30d   :  { %8577 = vmatpush3.bf16.msra.mxu1 %v9876_v44  ;;  %v743_v44 = vsub.s32 7, %v10575_v12 }
 0x30e   :  { %8578 = vmatprep.subr.bf16.mxu1 %v9880_v11  ;;  %v9936_v11 = vld [vmem:[#allocation6 + $0x380] ss:$12 sps:$4 sm:$0xff]  }
 0x30f   :  { %6703 = vmatpush1.bf16.msra.mxu0 %v9882_v14  ;;  %v9944_v14 = vld [vmem:[#allocation6 + $0x364] ss:$12 sps:$4 sm:$0xff]  }
 0x310   :  { %6704 = vmatprep.subr.bf16.mxu0 %v9889_v16  ;;  %v744_v16 = vrot.slane %v10621_v30, %v743_v44  ;;  %v9995_v44 = vld [vmem:[#allocation6 + $0x46c] ss:$12 sps:$4 sm:$0xff]  }
 0x311   :  { %8579 = vmatpush3.bf16.msra.mxu1 %v9881_v15  ;;  %v9940_v15 = vld [vmem:[#allocation6 + $0x458] ss:$12 sps:$4 sm:$0xff]  }
 0x312   :  { %8580 = vmatprep.subr.bf16.mxu1 %v9885_v29  ;;  %v9942_v29 = vld [vmem:[#allocation6 + $0x360] ss:$12 sps:$4 sm:$0xff]  }
 0x313   :  { %6705 = vmatpush1.bf16.msra.mxu0 %v9887_v17  ;;  %v9941_v17 = vld [vmem:[#allocation6 + $0x398] ss:$12 sps:$4 sm:$0xff]  }
 0x314   :  { %6706 = vmatprep.subr.bf16.mxu0 %v9894_v22  ;;  %v9945_v22 = vld [vmem:[#allocation6 + $0x470] ss:$12 sps:$4 sm:$0xff]  }
 0x315   :  { %8581 = vmatpush3.bf16.msra.mxu1 %v9886_v20  ;;  %v9949_v20 = vld [vmem:[#allocation6 + $0x37c] ss:$12 sps:$4 sm:$0xff]  }
 0x316   :  { %8582 = vmatprep.subr.bf16.mxu1 %v9890_v23  ;;  %v8804_v23 = vadd.f32 %v10642_v0, %v744_v16  ;;  %v9955_v0 = vld [vmem:[#allocation6 + $0x560] ss:$12 sps:$4 sm:$0xff]  }
 0x317   :  { %6707 = vmatpush1.bf16.msra.mxu0 %v9892_v51  ;;  %v9947_v51 = vld [vmem:[#allocation6 + $0x378] ss:$12 sps:$4 sm:$0xff]   ;;  %v10002_v16 = vld [vmem:[#allocation6 + $0x620] ss:$12 sps:$4 sm:$0xff]  }
 0x318   :  { %6708 = vmatprep.subr.bf16.mxu0 %v9899_v27  ;;  %v9954_v27 = vld [vmem:[#allocation6 + $0x394] ss:$12 sps:$4 sm:$0xff]  }
 0x319   :  { %8583 = vmatpush3.bf16.msra.mxu1 %v9891_v26  ;;  %v9946_v26 = vld [vmem:[#allocation6 + $0x3b0] ss:$12 sps:$4 sm:$0xff]  }
 0x31a   :  { %8584 = vmatprep.subr.bf16.mxu1 %v9895_v55  ;;  %v4705_v55 = vmul.f32 %v10626_v36, %v10626_v36  ;;  %v9956_v36 = vld [vmem:[#allocation6 + $0x4a0] ss:$12 sps:$4 sm:$0xff]  }
 0x31b   :  { %6709 = vmatpush1.bf16.msra.mxu0 %v9897_v31  ;;  %v9950_v31 = vld [vmem:[#allocation6 + $0x548] ss:$12 sps:$4 sm:$0xff]  }
 0x31c   :  { %6710 = vmatprep.subr.bf16.mxu0 %v9904_v33  ;;  %v9952_v33 = vld [vmem:[#allocation6 + $0x390] ss:$12 sps:$4 sm:$0xff]  }
 0x31d   :  { %8585 = vmatpush3.bf16.msra.mxu1 %v9896_v32  ;;  %v4708_v32 = vmul.f32 %v8804_v23, %v8804_v23  ;;  %v10011_v23 = vld [vmem:[#allocation6 + $0x710] ss:$12 sps:$4 sm:$0xff]  }
 0x31e   :  { %8586 = vmatprep.subr.bf16.mxu1 %v9900_v34  ;;  %v10663_v34 = vpack.c.bf16 %v4705_v55, %v4705_v55  ;;  %v10016_v55 = vld [vmem:[#allocation6 + $0x728] ss:$12 sps:$4 sm:$0xff]  }
 0x31f   :  { %6711 = vmatpush1.bf16.msra.mxu0 %v9902_v35  ;;  %v9959_v35 = vld [vmem:[#allocation6 + $0x3ac] ss:$12 sps:$4 sm:$0xff]  }
 0x320   :  { %6712 = vmatprep.subr.bf16.mxu0 %v9909_v38  ;;  %v9957_v38 = vld [vmem:[#allocation6 + $0x3a8] ss:$12 sps:$4 sm:$0xff]  }
 0x321   :  { %8587 = vmatpush3.bf16.msra.mxu1 %v9901_v37  ;;  %v10665_v37 = vpack.c.bf16 %v4708_v32, %v4708_v32  ;;  %v10015_v32 = vld [vmem:[#allocation6 + $0x4cc] ss:$12 sps:$4 sm:$0xff]  }
 0x322   :  { %8588 = vmatprep.subr.bf16.mxu1 %v9905_v9  ;;  %v9960_v9 = vld [vmem:[#allocation6 + $0x578] ss:$12 sps:$4 sm:$0xff]  }
 0x323   :  { %6713 = vmatpush1.bf16.msra.mxu0 %v9907_v41  ;;  %v9962_v41 = vld [vmem:[#allocation6 + $0x3c0] ss:$12 sps:$4 sm:$0xff]  }
 0x324   :  { %6714 = vmatprep.subr.bf16.mxu0 %v9914_v43  ;;  %v9969_v43 = vld [vmem:[#allocation6 + $0x3dc] ss:$12 sps:$4 sm:$0xff]  }
 0x325   :  { %8589 = vmatpush3.bf16.msra.mxu1 %v9906_v42  ;;  %v9961_v42 = vld [vmem:[#allocation6 + $0x4b8] ss:$12 sps:$4 sm:$0xff]  }
 0x326   :  { %8596 = vmatprep.subr.bf16.mxu1 %v9910_v46  ;;  %v9967_v46 = vld [vmem:[#allocation6 + $0x3d8] ss:$12 sps:$4 sm:$0xff]  }
 0x327   :  { %6715 = vmatpush1.bf16.msra.mxu0 %v9912_v48  ;;  %v9974_v48 = vld [vmem:[#allocation6 + $0x3f4] ss:$12 sps:$4 sm:$0xff]  }
 0x328   :  { %6964 = vmatmul.mubr.bf16.vlgmr.msra.gmra.mrb[28].mxu1 %v4715_v53  ;;  %6716 = vmatprep.subr.bf16.mxu0 %v9919_v50  ;;  %v9979_v50 = vld [vmem:[#allocation6 + $0x40c] ss:$12 sps:$4 sm:$0xff]  }
 0x329   :  { %8597 = vmatpush3.bf16.msra.mxu1 %v9911_v49  ;;  %7003 = vmatprep.mubr.bf16.mxu1 %v4718_v18  ;;  %v9970_v49 = vld [vmem:[#allocation6 + $0x5a8] ss:$12 sps:$4 sm:$0xff]  }
 0x32a   :  { %8598 = vmatprep.subr.bf16.mxu1 %v9915_v57  ;;  %v9971_v57 = vld [vmem:[#allocation6 + $0x4e8] ss:$12 sps:$4 sm:$0xff]  }
 0x32b   :  { %6717 = vmatpush1.bf16.msra.mxu0 %v9917_v2  ;;  %v9975_v2 = vld [vmem:[#allocation6 + $0x5c0] ss:$12 sps:$4 sm:$0xff]  }
 0x32c   :  { %6727 = vmatprep.subr.bf16.mxu0 %v9924_v56  ;;  %v9976_v56 = vld [vmem:[#allocation6 + $0x500] ss:$12 sps:$4 sm:$0xff]  }
 0x32d   :  { %8599 = vmatpush3.bf16.msra.mxu1 %v9916_v52  ;;  %v9977_v52 = vld [vmem:[#allocation6 + $0x408] ss:$12 sps:$4 sm:$0xff]  }
 0x32e   :  { %8600 = vmatprep.subr.bf16.mxu1 %v9920_v54  ;;  %6719 = vmatmul.mubr.bf16.vlgmr.msra.gmra.mrb[12].mxu0 %v4715_v53  ;;  %v9972_v53 = vld [vmem:[#allocation6 + $0x3f0] ss:$12 sps:$4 sm:$0xff]  }
 0x32f   :  { %6728 = vmatpush1.bf16.msra.mxu0 %v9922_v58  ;;  %6759 = vmatprep.mubr.bf16.mxu0 %v4718_v18  ;;  %v739_v18 = vsub.s32 6, %v10575_v12  ;;  %v9984_v54 = vld [vmem:[#allocation6 + $0x424] ss:$12 sps:$4 sm:$0xff]   ;;  %v10096_v12 = vld [vmem:[#allocation6 + $0x694] ss:$12 sps:$4 sm:$0xff]  }
 0x330   :  { %6729 = vmatprep.subr.bf16.mxu0 %v9929_v59  ;;  %v9982_v59 = vld [vmem:[#allocation6 + $0x420] ss:$12 sps:$4 sm:$0xff]  }
 0x331   :  { %8601 = vmatpush3.bf16.msra.mxu1 %v9921_v4  ;;  %v740_v58 = vrot.slane %v10621_v30, %v739_v18  ;;  %v9980_v4 = vld [vmem:[#allocation6 + $0x5d8] ss:$12 sps:$4 sm:$0xff]   ;;  %v9996_v30 = vld [vmem:[#allocation6 + $0x6c8] ss:$12 sps:$4 sm:$0xff]  }
 0x332   :  { %8602 = vmatprep.subr.bf16.mxu1 %v9925_v24  ;;  %v9981_v24 = vld [vmem:[#allocation6 + $0x518] ss:$12 sps:$4 sm:$0xff]  }
 0x333   :  { %6730 = vmatpush1.bf16.msra.mxu0 %v9927_v60  ;;  %v9989_v60 = vld [vmem:[#allocation6 + $0x43c] ss:$12 sps:$4 sm:$0xff]  }
 0x334   :  { %6731 = vmatprep.subr.bf16.mxu0 %v9934_v62  ;;  %v9985_v62 = vld [vmem:[#allocation6 + $0x5f0] ss:$12 sps:$4 sm:$0xff]  }
 0x335   :  { %8603 = vmatpush3.bf16.msra.mxu1 %v9926_v61  ;;  %v8803_v61 = vadd.f32 %v10638_v25, %v740_v58  ;;  %v10001_v25 = vld [vmem:[#allocation6 + $0x6e0] ss:$12 sps:$4 sm:$0xff]  }
 0x336   :  { %8604 = vmatprep.subr.bf16.mxu1 %v9930_v63  ;;  %v9987_v63 = vld [vmem:[#allocation6 + $0x438] ss:$12 sps:$4 sm:$0xff]  }
 0x337   :  { %6732 = vmatpush1.bf16.msra.mxu0 %v9932_v1  ;;  %v9986_v1 = vld [vmem:[#allocation6 + $0x530] ss:$12 sps:$4 sm:$0xff]  }
 0x338   :  { %6733 = vmatprep.subr.bf16.mxu0 %v9939_v6  ;;  %v4707_v6 = vmul.f32 %v8803_v61, %v8803_v61 }
 0x339   :  { %8605 = vmatpush3.bf16.msra.mxu1 %v9931_v3  ;;  %v9992_v3 = vld [vmem:[#allocation6 + $0x454] ss:$12 sps:$4 sm:$0xff]  }
 0x33a   :  { %8606 = vmatprep.subr.bf16.mxu1 %v9935_v7  ;;  %v9990_v7 = vld [vmem:[#allocation6 + $0x450] ss:$12 sps:$4 sm:$0xff]  }
 0x33b   :  { %6734 = vmatpush1.bf16.msra.mxu0 %v9937_v8  ;;  %v9997_v8 = vld [vmem:[#allocation6 + $0x608] ss:$12 sps:$4 sm:$0xff]  }
 0x33c   :  { %6735 = vmatprep.subr.bf16.mxu0 %v9944_v14  ;;  %v9993_v14 = vld [vmem:[#allocation6 + $0x468] ss:$12 sps:$4 sm:$0xff]  }
 0x33d   :  { %8607 = vmatpush3.bf16.msra.mxu1 %v9936_v11  ;;  %v10672_v11 = vpack.c.bf16 %v4707_v6, %v4707_v6  ;;  %v10044_v6 = vld [vmem:[#allocation6 + $0x574] ss:$12 sps:$4 sm:$0xff]  }
 0x33e   :  { %8608 = vmatprep.subr.bf16.mxu1 %v9940_v15  ;;  %v10000_v15 = vld [vmem:[#allocation6 + $0x484] ss:$12 sps:$4 sm:$0xff]  }
 0x33f   :  { %6736 = vmatpush1.bf16.msra.mxu0 %v9942_v29  ;;  %v10006_v29 = vld [vmem:[#allocation6 + $0x6f8] ss:$12 sps:$4 sm:$0xff]  }
 0x340   :  { %6737 = vmatprep.subr.bf16.mxu0 %v9949_v20  ;;  %v10005_v20 = vld [vmem:[#allocation6 + $0x49c] ss:$12 sps:$4 sm:$0xff]  }
 0x341   :  { %8609 = vmatpush3.bf16.msra.mxu1 %v9941_v17  ;;  %v9998_v17 = vld [vmem:[#allocation6 + $0x480] ss:$12 sps:$4 sm:$0xff]  }
 0x342   :  { %8610 = vmatprep.subr.bf16.mxu1 %v9945_v22  ;;  %v10007_v22 = vld [vmem:[#allocation6 + $0x638] ss:$12 sps:$4 sm:$0xff]  }
 0x343   :  { %6738 = vmatpush1.bf16.msra.mxu0 %v9947_v51  ;;  %v10003_v51 = vld [vmem:[#allocation6 + $0x498] ss:$12 sps:$4 sm:$0xff]  }
 0x344   :  { %6739 = vmatprep.subr.bf16.mxu0 %v9954_v27  ;;  %v10012_v27 = vld [vmem:[#allocation6 + $0x650] ss:$12 sps:$4 sm:$0xff]  }
 0x345   :  { %8611 = vmatpush3.bf16.msra.mxu1 %v9946_v26  ;;  %v10010_v26 = vld [vmem:[#allocation6 + $0x4b4] ss:$12 sps:$4 sm:$0xff]  }
 0x346   :  { %8618 = vmatprep.subr.bf16.mxu1 %v9950_v31  ;;  %v10008_v31 = vld [vmem:[#allocation6 + $0x4b0] ss:$12 sps:$4 sm:$0xff]  }
 0x347   :  { %6740 = vmatpush1.bf16.msra.mxu0 %v9952_v33  ;;  %v10017_v33 = vld [vmem:[#allocation6 + $0x668] ss:$12 sps:$4 sm:$0xff]  }
 0x348   :  { %7004 = vmatmul.mubr.bf16.vlgmr.msra.gmra.mrb[32].mxu1 %v10663_v34  ;;  %6741 = vmatprep.subr.bf16.mxu0 %v9959_v35  ;;  %v10022_v35 = vld [vmem:[#allocation6 + $0x680] ss:$12 sps:$4 sm:$0xff]  }
 0x349   :  { %8619 = vmatpush3.bf16.msra.mxu1 %v9951_v10  ;;  %7043 = vmatprep.mubr.bf16.mxu1 %v10665_v37  ;;  %v10021_v10 = vld [vmem:[#allocation6 + $0x740] ss:$12 sps:$4 sm:$0xff]  }
 0x34a   :  { %8620 = vmatprep.subr.bf16.mxu1 %v9955_v0  ;;  %v10020_v0 = vld [vmem:[#allocation6 + $0x4e4] ss:$12 sps:$4 sm:$0xff]  }
 0x34b   :  { %6742 = vmatpush1.bf16.msra.mxu0 %v9957_v38  ;;  %v10018_v38 = vld [vmem:[#allocation6 + $0x4e0] ss:$12 sps:$4 sm:$0xff]  }
 0x34c   :  { %6743 = vmatprep.subr.bf16.mxu0 %v9964_v40  ;;  %v10025_v40 = vld [vmem:[#allocation6 + $0x4fc] ss:$12 sps:$4 sm:$0xff]  }
 0x34d   :  { %8621 = vmatpush3.bf16.msra.mxu1 %v9956_v36  ;;  %v10677_v36 = vld [vmem:[#allocation4 + $0x8] sm:$0xf] }
 0x34e   :  { %8622 = vmatprep.subr.bf16.mxu1 %v9960_v9  ;;  %v10027_v9 = vld [vmem:[#allocation6 + $0x698] ss:$12 sps:$4 sm:$0xff]  }
 0x34f   :  { %6744 = vmatpush1.bf16.msra.mxu0 %v9962_v41  ;;  %v10031_v41 = vld [vmem:[#allocation6 + $0x770] ss:$12 sps:$4 sm:$0xff]  }
 0x350   :  { %6745 = vmatprep.subr.bf16.mxu0 %v9969_v43  ;;  %v752_v43 = vrot.slane %v10677_v36, %v719_v21  ;;  %v10035_v21 = vld [vmem:[#allocation6 + $0x52c] ss:$12 sps:$4 sm:$0xff]  }
 0x351   :  { %8623 = vmatpush3.bf16.msra.mxu1 %v9961_v42  ;;  %v748_v42 = vrot.slane %v10677_v36, %v715_v19 }
 0x352   :  { %8624 = vmatprep.subr.bf16.mxu1 %v9965_v45  ;;  %v10023_v45 = vld [vmem:[#allocation6 + $0x4f8] ss:$12 sps:$4 sm:$0xff]  }
 0x353   :  { %6746 = vmatpush1.bf16.msra.mxu0 %v9967_v46  ;;  %v10030_v46 = vld [vmem:[#allocation6 + $0x514] ss:$12 sps:$4 sm:$0xff]  }
 0x354   :  { %6747 = vmatprep.subr.bf16.mxu0 %v9974_v48 }
 0x355   :  { %8625 = vmatpush3.bf16.msra.mxu1 %v9966_v47  ;;  %v10032_v47 = vld [vmem:[#allocation6 + $0x6b0] ss:$12 sps:$4 sm:$0xff]  }
 0x356   :  { %8626 = vmatprep.subr.bf16.mxu1 %v9970_v49  ;;  %v10051_v49 = vld [vmem:[#allocation6 + $0x848] ss:$12 sps:$4 sm:$0xff]  }
 0x357   :  { %6748 = vmatpush1.bf16.msra.mxu0 %v9972_v53 }
 0x358   :  { %6749 = vmatprep.subr.bf16.mxu0 %v9979_v50 }
 0x359   :  { %8627 = vmatpush3.bf16.msra.mxu1 %v9971_v57 }
 0x35a   :  { %8628 = vmatprep.subr.bf16.mxu1 %v9975_v2  ;;  %v10028_v2 = vld [vmem:[#allocation6 + $0x510] ss:$12 sps:$4 sm:$0xff]  }
 0x35b   :  { %6750 = vmatpush1.bf16.msra.mxu0 %v9977_v52 }
 0x35c   :  { %6751 = vmatprep.subr.bf16.mxu0 %v9984_v54 }
 0x35d   :  { %8629 = vmatpush3.bf16.msra.mxu1 %v9976_v56 }
 0x35e   :  { %8630 = vmatprep.subr.bf16.mxu1 %v9980_v4  ;;  %v10033_v4 = vld [vmem:[#allocation6 + $0x528] ss:$12 sps:$4 sm:$0xff]  }
 0x35f   :  { %6752 = vmatpush1.bf16.msra.mxu0 %v9982_v59  ;;  %v10038_v59 = vld [vmem:[#allocation6 + $0x544] ss:$12 sps:$4 sm:$0xff]  }
 0x360   :  { %6753 = vmatprep.subr.bf16.mxu0 %v9989_v60  ;;  %v10052_v60 = vld [vmem:[#allocation6 + $0x788] ss:$12 sps:$4 sm:$0xff]  }
 0x361   :  { %8631 = vmatpush3.bf16.msra.mxu1 %v9981_v24 }
 0x362   :  { %8632 = vmatprep.subr.bf16.mxu1 %v9985_v62  ;;  %v10056_v62 = vld [vmem:[#allocation6 + $0x860] ss:$12 sps:$4 sm:$0xff]  }
 0x363   :  { %6754 = vmatpush1.bf16.msra.mxu0 %v9987_v63  ;;  %v10057_v63 = vld [vmem:[#allocation6 + $0x7a0] ss:$12 sps:$4 sm:$0xff]  }
 0x364   :  { %6755 = vmatprep.subr.bf16.mxu0 %v9992_v3  ;;  %v10039_v3 = vld [vmem:[#allocation6 + $0x558] ss:$12 sps:$4 sm:$0xff]  }
 0x365   :  { %8633 = vmatpush3.bf16.msra.mxu1 %v9986_v1  ;;  %v10061_v1 = vld [vmem:[#allocation6 + $0x878] ss:$12 sps:$4 sm:$0xff]  }
 0x366   :  { %8640 = vmatprep.subr.bf16.mxu1 %v9996_v30  ;;  %v10062_v30 = vld [vmem:[#allocation6 + $0x7b8] ss:$12 sps:$4 sm:$0xff]  }
 0x367   :  { %6756 = vmatpush1.bf16.msra.mxu0 %v9990_v7  ;;  %v10066_v7 = vld [vmem:[#allocation6 + $0x890] ss:$12 sps:$4 sm:$0xff]  }
 0x368   :  { %7044 = vmatmul.mubr.bf16.vlgmr.msra.gmra.mrb[36].mxu1 %v10672_v11  ;;  %6757 = vmatprep.subr.bf16.mxu0 %v9995_v44  ;;  %v10042_v44 = vld [vmem:[#allocation6 + $0x570] ss:$12 sps:$4 sm:$0xff]  }
 0x369   :  { %8641 = vmatpush3.bf16.msra.mxu1 %v9997_v8  ;;  %v10047_v8 = vld [vmem:[#allocation6 + $0x58c] ss:$12 sps:$4 sm:$0xff]  }
 0x36a   :  { %8642 = vmatprep.subr.bf16.mxu1 %v10001_v25  ;;  %v10067_v25 = vld [vmem:[#allocation6 + $0x7d0] ss:$12 sps:$4 sm:$0xff]  }
 0x36b   :  { %6758 = vmatpush1.bf16.msra.mxu0 %v9993_v14  ;;  %v10071_v14 = vld [vmem:[#allocation6 + $0x8a8] ss:$12 sps:$4 sm:$0xff]  }
 0x36c   :  { %6768 = vmatprep.subr.bf16.mxu0 %v10000_v15  ;;  %v10045_v15 = vld [vmem:[#allocation6 + $0x588] ss:$12 sps:$4 sm:$0xff]  }
 0x36d   :  { %8643 = vmatpush3.bf16.msra.mxu1 %v10002_v16  ;;  %v10050_v16 = vld [vmem:[#allocation6 + $0x5a4] ss:$12 sps:$4 sm:$0xff]  }
 0x36e   :  { %8644 = vmatprep.subr.bf16.mxu1 %v10006_v29  ;;  %6760 = vmatmul.mubr.bf16.vlgmr.msra.gmra.mrb[12].mxu0 %v10663_v34  ;;  %v10013_v34 = vld [vmem:[#allocation6 + $0x4c8] ss:$12 sps:$4 sm:$0xff]  }
 0x36f   :  { %6769 = vmatpush1.bf16.msra.mxu0 %v9998_v17  ;;  %6800 = vmatprep.mubr.bf16.mxu0 %v10665_v37  ;;  %v10026_v37 = vld [vmem:[#allocation6 + $0x758] ss:$12 sps:$4 sm:$0xff]   ;;  %v10072_v29 = vld [vmem:[#allocation6 + $0x7e8] ss:$12 sps:$4 sm:$0xff]   ;;  %v10076_v17 = vld [vmem:[#allocation6 + $0x8c0] ss:$12 sps:$4 sm:$0xff]  }
 0x370   :  { %6770 = vmatprep.subr.bf16.mxu0 %v10005_v20  ;;  %v10048_v20 = vld [vmem:[#allocation6 + $0x5a0] ss:$12 sps:$4 sm:$0xff]  }
 0x371   :  { %8645 = vmatpush3.bf16.msra.mxu1 %v10007_v22  ;;  %v10055_v22 = vld [vmem:[#allocation6 + $0x5bc] ss:$12 sps:$4 sm:$0xff]  }
 0x372   :  { %8646 = vmatprep.subr.bf16.mxu1 %v10011_v23  ;;  %v10077_v23 = vld [vmem:[#allocation6 + $0x800] ss:$12 sps:$4 sm:$0xff]  }
 0x373   :  { %6771 = vmatpush1.bf16.msra.mxu0 %v10003_v51  ;;  %v10081_v51 = vld [vmem:[#allocation6 + $0x8d8] ss:$12 sps:$4 sm:$0xff]  }
 0x374   :  { %6772 = vmatprep.subr.bf16.mxu0 %v10010_v26  ;;  %v10053_v26 = vld [vmem:[#allocation6 + $0x5b8] ss:$12 sps:$4 sm:$0xff]  }
 0x375   :  { %8647 = vmatpush3.bf16.msra.mxu1 %v10012_v27  ;;  %v10060_v27 = vld [vmem:[#allocation6 + $0x5d4] ss:$12 sps:$4 sm:$0xff]  }
 0x376   :  { %8648 = vmatprep.subr.bf16.mxu1 %v10016_v55  ;;  %v10082_v55 = vld [vmem:[#allocation6 + $0x818] ss:$12 sps:$4 sm:$0xff]  }
 0x377   :  { %6773 = vmatpush1.bf16.msra.mxu0 %v10008_v31  ;;  %v10086_v31 = vld [vmem:[#allocation6 + $0x8f0] ss:$12 sps:$4 sm:$0xff]  }
 0x378   :  { %6774 = vmatprep.subr.bf16.mxu0 %v10015_v32  ;;  %v10058_v32 = vld [vmem:[#allocation6 + $0x5d0] ss:$12 sps:$4 sm:$0xff]  }
 0x379   :  { %8649 = vmatpush3.bf16.msra.mxu1 %v10017_v33  ;;  %v10065_v33 = vld [vmem:[#allocation6 + $0x5ec] ss:$12 sps:$4 sm:$0xff]  }
 0x37a   :  { %8650 = vmatprep.subr.bf16.mxu1 %v10021_v10  ;;  %v10087_v10 = vld [vmem:[#allocation6 + $0x830] ss:$12 sps:$4 sm:$0xff]  }
 0x37b   :  { %6775 = vmatpush1.bf16.msra.mxu0 %v10013_v34  ;;  %v10063_v34 = vld [vmem:[#allocation6 + $0x5e8] ss:$12 sps:$4 sm:$0xff]  }
 0x37c   :  { %6776 = vmatprep.subr.bf16.mxu0 %v10020_v0  ;;  %v10070_v0 = vld [vmem:[#allocation6 + $0x604] ss:$12 sps:$4 sm:$0xff]  }
 0x37d   :  { %8651 = vmatpush3.bf16.msra.mxu1 %v10022_v35  ;;  %v10068_v35 = vld [vmem:[#allocation6 + $0x600] ss:$12 sps:$4 sm:$0xff]  }
 0x37e   :  { %8652 = vmatprep.subr.bf16.mxu1 %v10026_v37  ;;  %v10075_v37 = vld [vmem:[#allocation6 + $0x61c] ss:$12 sps:$4 sm:$0xff]  }
 0x37f   :  { %6777 = vmatpush1.bf16.msra.mxu0 %v10018_v38  ;;  %v10073_v38 = vld [vmem:[#allocation6 + $0x618] ss:$12 sps:$4 sm:$0xff]  }
 0x380   :  { %6778 = vmatprep.subr.bf16.mxu0 %v10025_v40  ;;  %v10080_v40 = vld [vmem:[#allocation6 + $0x634] ss:$12 sps:$4 sm:$0xff]  }
 0x381   :  { %8653 = vmatpush3.bf16.msra.mxu1 %v10027_v9  ;;  %v4489_v48 = vpop.f32.mrb[8].mxu0  ;;  %v10078_v9 = vld [vmem:[#allocation6 + $0x630] ss:$12 sps:$4 sm:$0xff]  }
 0x382   :  { %8654 = vmatprep.subr.bf16.mxu1 %v10031_v41  ;;  %v8805_v53 = vadd.f32 %v4489_v48, %v748_v42  ;;  %v4491_v57 = vpop.f32.mrb[9].mxu0  ;;  %v10085_v41 = vld [vmem:[#allocation6 + $0x64c] ss:$12 sps:$4 sm:$0xff]   ;;  %v756_v42 = vrot.slane %v10677_v36, %v723_v28 }
 0x383   :  { %v8807_v50 = vadd.f32 %v4491_v57, %v752_v43  ;;  %v4493_v18 = vpop.f32.mrb[10].mxu0  ;;  %6779 = vmatpush1.bf16.msra.mxu0 %v10023_v45  ;;  %v10083_v43 = vld [vmem:[#allocation6 + $0x648] ss:$12 sps:$4 sm:$0xff]   ;;  %v10090_v45 = vld [vmem:[#allocation6 + $0x664] ss:$12 sps:$4 sm:$0xff]  }
 0x384   :  { %v8806_v19 = vadd.f32 %v8805_v53, %v10647_v5  ;;  %v4494_v52 = vpop.f32.mrb[11].mxu0  ;;  %6780 = vmatprep.subr.bf16.mxu0 %v10030_v46  ;;  %v10036_v5 = vld [vmem:[#allocation6 + $0x540] ss:$12 sps:$4 sm:$0xff]  }
 0x385   :  { %8655 = vmatpush3.bf16.msra.mxu1 %v10032_v47  ;;  %v8808_v56 = vadd.f32 %v8807_v50, %v10649_v39  ;;  %v10041_v39 = vld [vmem:[#allocation6 + $0x55c] ss:$12 sps:$4 sm:$0xff]  }
 0x386   :  { %8662 = vmatprep.subr.bf16.mxu1 %v10051_v49  ;;  %v4709_v54 = vmul.f32 %v8806_v19, %v8806_v19  ;;  %v10088_v49 = vld [vmem:[#allocation6 + $0x660] ss:$12 sps:$4 sm:$0xff]   ;;  %v10093_v50 = vld [vmem:[#allocation6 + $0x67c] ss:$12 sps:$4 sm:$0xff]   ;;  %v10091_v19 = vld [vmem:[#allocation6 + $0x678] ss:$12 sps:$4 sm:$0xff]  }
 0x387   :  { %v4710_v58 = vmul.f32 %v8808_v56, %v8808_v56  ;;  %6781 = vmatpush1.bf16.msra.mxu0 %v10028_v2  ;;  %v10097_v56 = vld [vmem:[#allocation6 + $0x6a8] ss:$12 sps:$4 sm:$0xff]  }
 0x388   :  { %6782 = vmatprep.subr.bf16.mxu0 %v10035_v21  ;;  %v10689_v61 = vpack.c.bf16 %v4709_v54, %v4709_v54  ;;  %v10099_v21 = vld [vmem:[#allocation6 + $0x6ac] ss:$12 sps:$4 sm:$0xff]   ;;  %v10102_v54 = vld [vmem:[#allocation6 + $0x6c4] ss:$12 sps:$4 sm:$0xff]  }
 0x389   :  { %v10687_v24 = vpack.c.bf16 %v4710_v58, %v4710_v58  ;;  %v10100_v58 = vld [vmem:[#allocation6 + $0x6c0] ss:$12 sps:$4 sm:$0xff]  }
 0x38b   :  { %6783 = vmatpush1.bf16.msra.mxu0 %v10033_v4  ;;  %7083 = vmatprep.mubr.bf16.mxu1 %v10687_v24  ;;  %v10105_v4 = vld [vmem:[#allocation6 + $0x6dc] ss:$12 sps:$4 sm:$0xff]  }
 0x38c   :  { %7084 = vmatmul.mubr.bf16.vlgmr.msra.gmra.mrb[40].mxu1 %v10689_v61  ;;  %6784 = vmatprep.subr.bf16.mxu0 %v10038_v59  ;;  %v10103_v59 = vld [vmem:[#allocation6 + $0x6d8] ss:$12 sps:$4 sm:$0xff]  }
 0x38d   :  { %8663 = vmatpush3.bf16.msra.mxu1 %v10052_v60  ;;  %v10106_v60 = vld [vmem:[#allocation6 + $0x6f0] ss:$12 sps:$4 sm:$0xff]  }
 0x38e   :  { %8664 = vmatprep.subr.bf16.mxu1 %v10056_v62  ;;  %v10111_v62 = vld [vmem:[#allocation6 + $0x70c] ss:$12 sps:$4 sm:$0xff]  }
 0x38f   :  { %6785 = vmatpush1.bf16.msra.mxu0 %v10036_v5  ;;  %v10109_v5 = vld [vmem:[#allocation6 + $0x708] ss:$12 sps:$4 sm:$0xff]  }
 0x390   :  { %6786 = vmatprep.subr.bf16.mxu0 %v10041_v39  ;;  %v10114_v39 = vld [vmem:[#allocation6 + $0x724] ss:$12 sps:$4 sm:$0xff]  }
 0x391   :  { %8665 = vmatpush3.bf16.msra.mxu1 %v10057_v63 }
 0x392   :  { %8666 = vmatprep.subr.bf16.mxu1 %v10061_v1 }
 0x393   :  { %6787 = vmatpush1.bf16.msra.mxu0 %v10039_v3  ;;  %v10112_v3 = vld [vmem:[#allocation6 + $0x720] ss:$12 sps:$4 sm:$0xff]  }
 0x394   :  { %6788 = vmatprep.subr.bf16.mxu0 %v10044_v6 }
 0x395   :  { %8667 = vmatpush3.bf16.msra.mxu1 %v10062_v30 }
 0x396   :  { %8668 = vmatprep.subr.bf16.mxu1 %v10066_v7  ;;  %v10117_v7 = vld [vmem:[#allocation6 + $0x73c] ss:$12 sps:$4 sm:$0xff]  }
 0x397   :  { %6789 = vmatpush1.bf16.msra.mxu0 %v10042_v44 }
 0x398   :  { %6790 = vmatprep.subr.bf16.mxu0 %v10047_v8  ;;  %v10115_v8 = vld [vmem:[#allocation6 + $0x738] ss:$12 sps:$4 sm:$0xff]  }
 0x399   :  { %8669 = vmatpush3.bf16.msra.mxu1 %v10067_v25  ;;  %v10120_v25 = vld [vmem:[#allocation6 + $0x754] ss:$12 sps:$4 sm:$0xff]  }
 0x39a   :  { %8670 = vmatprep.subr.bf16.mxu1 %v10071_v14  ;;  %v10118_v14 = vld [vmem:[#allocation6 + $0x750] ss:$12 sps:$4 sm:$0xff]  }
 0x39b   :  { %6791 = vmatpush1.bf16.msra.mxu0 %v10045_v15  ;;  %v10123_v15 = vld [vmem:[#allocation6 + $0x76c] ss:$12 sps:$4 sm:$0xff]  }
 0x39c   :  { %6792 = vmatprep.subr.bf16.mxu0 %v10050_v16  ;;  %v10121_v16 = vld [vmem:[#allocation6 + $0x768] ss:$12 sps:$4 sm:$0xff]  }
 0x39d   :  { %8671 = vmatpush3.bf16.msra.mxu1 %v10072_v29  ;;  %v10126_v29 = vld [vmem:[#allocation6 + $0x784] ss:$12 sps:$4 sm:$0xff]  }
 0x39e   :  { %8672 = vmatprep.subr.bf16.mxu1 %v10076_v17  ;;  %v10124_v17 = vld [vmem:[#allocation6 + $0x780] ss:$12 sps:$4 sm:$0xff]  }
 0x39f   :  { %6793 = vmatpush1.bf16.msra.mxu0 %v10048_v20  ;;  %v10129_v20 = vld [vmem:[#allocation6 + $0x79c] ss:$12 sps:$4 sm:$0xff]  }
 0x3a0   :  { %6794 = vmatprep.subr.bf16.mxu0 %v10055_v22  ;;  %v10127_v22 = vld [vmem:[#allocation6 + $0x798] ss:$12 sps:$4 sm:$0xff]  }
 0x3a1   :  { %8673 = vmatpush3.bf16.msra.mxu1 %v10077_v23  ;;  %v10132_v23 = vld [vmem:[#allocation6 + $0x7b4] ss:$12 sps:$4 sm:$0xff]  }
 0x3a2   :  { %8674 = vmatprep.subr.bf16.mxu1 %v10081_v51  ;;  %v10130_v51 = vld [vmem:[#allocation6 + $0x7b0] ss:$12 sps:$4 sm:$0xff]  }
 0x3a3   :  { %6795 = vmatpush1.bf16.msra.mxu0 %v10053_v26  ;;  %v10135_v26 = vld [vmem:[#allocation6 + $0x7cc] ss:$12 sps:$4 sm:$0xff]  }
 0x3a4   :  { %6796 = vmatprep.subr.bf16.mxu0 %v10060_v27  ;;  %v10133_v27 = vld [vmem:[#allocation6 + $0x7c8] ss:$12 sps:$4 sm:$0xff]  }
 0x3a5   :  { %8675 = vmatpush3.bf16.msra.mxu1 %v10082_v55  ;;  %v10138_v55 = vld [vmem:[#allocation6 + $0x7e4] ss:$12 sps:$4 sm:$0xff]  }
 0x3a6   :  { %8676 = vmatprep.subr.bf16.mxu1 %v10086_v31 }
 0x3a7   :  { %6797 = vmatpush1.bf16.msra.mxu0 %v10058_v32 }
 0x3a8   :  { %6798 = vmatprep.subr.bf16.mxu0 %v10065_v33  ;;  %v10136_v33 = vld [vmem:[#allocation6 + $0x7e0] ss:$12 sps:$4 sm:$0xff]  }
 0x3a9   :  { %8677 = vmatpush3.bf16.msra.mxu1 %v10087_v10 }
 0x3ab   :  { %6799 = vmatpush1.bf16.msra.mxu0 %v10063_v34 }
 0x3ac   :  { %6809 = vmatprep.subr.bf16.mxu0 %v10070_v0 }
 0x3ae   :  { %6801 = vmatmul.mubr.bf16.vlgmr.msra.gmra.mrb[12].mxu0 %v10672_v11  ;;  %v760_v11 = vrot.slane %v10677_v36, %v727_v13  ;;  %v10094_v36 = vld [vmem:[#allocation6 + $0x690] ss:$12 sps:$4 sm:$0xff]  }
 0x3af   :  { %6810 = vmatpush1.bf16.msra.mxu0 %v10068_v35  ;;  %6841 = vmatprep.mubr.bf16.mxu0 %v10687_v24  ;;  %v10108_v24 = vld [vmem:[#allocation6 + $0x6f4] ss:$12 sps:$4 sm:$0xff]  }
 0x3b0   :  { %6811 = vmatprep.subr.bf16.mxu0 %v10075_v37  ;;  %v10139_v37 = vld [vmem:[#allocation6 + $0x7f8] ss:$12 sps:$4 sm:$0xff]  }
 0x3b3   :  { %6812 = vmatpush1.bf16.msra.mxu0 %v10073_v38  ;;  %v10144_v38 = vld [vmem:[#allocation6 + $0x814] ss:$12 sps:$4 sm:$0xff]  }
 0x3b4   :  { %6813 = vmatprep.subr.bf16.mxu0 %v10080_v40  ;;  %v10142_v40 = vld [vmem:[#allocation6 + $0x810] ss:$12 sps:$4 sm:$0xff]  }
 0x3b7   :  { %6814 = vmatpush1.bf16.msra.mxu0 %v10078_v9  ;;  %v10147_v9 = vld [vmem:[#allocation6 + $0x82c] ss:$12 sps:$4 sm:$0xff]  }
 0x3b8   :  { %6815 = vmatprep.subr.bf16.mxu0 %v10085_v41  ;;  %v10145_v41 = vld [vmem:[#allocation6 + $0x828] ss:$12 sps:$4 sm:$0xff]  }
 0x3bb   :  { %v4694_v46 = vpop.f32.mrb[20].mxu1  ;;  %6816 = vmatpush1.bf16.msra.mxu0 %v10083_v43  ;;  %v10148_v43 = vld [vmem:[#allocation6 + $0x840] ss:$12 sps:$4 sm:$0xff]  }
 0x3bc   :  { %v8809_v47 = vadd.f32 %v4694_v46, %v756_v42  ;;  %v4696_v48 = vpop.f32.mrb[21].mxu1  ;;  %6817 = vmatprep.subr.bf16.mxu0 %v10090_v45  ;;  %v10150_v42 = vld [vmem:[#allocation6 + $0x844] ss:$12 sps:$4 sm:$0xff]   ;;  %v10156_v46 = vld [vmem:[#allocation6 + $0x874] ss:$12 sps:$4 sm:$0xff]  }
 0x3bd   :  { %v8810_v53 = vadd.f32 %v4696_v48, %v760_v11  ;;  %v4698_v57 = vpop.f32.mrb[22].mxu1  ;;  %v10153_v11 = vld [vmem:[#allocation6 + $0x85c] ss:$12 sps:$4 sm:$0xff]   ;;  %v10151_v45 = vld [vmem:[#allocation6 + $0x858] ss:$12 sps:$4 sm:$0xff]  }
 0x3be   :  { %v4711_v18 = vmul.f32 %v8809_v47, %v8809_v47  ;;  %v4699_v2 = vpop.f32.mrb[23].mxu1  ;;  %v10154_v47 = vld [vmem:[#allocation6 + $0x870] ss:$12 sps:$4 sm:$0xff]   ;;  %v10159_v48 = vld [vmem:[#allocation6 + $0x88c] ss:$12 sps:$4 sm:$0xff]  }
 0x3bf   :  { %v4712_v28 = vmul.f32 %v8810_v53, %v8810_v53  ;;  %6818 = vmatpush1.bf16.msra.mxu0 %v10088_v49  ;;  %v10157_v49 = vld [vmem:[#allocation6 + $0x888] ss:$12 sps:$4 sm:$0xff]   ;;  %v10162_v53 = vld [vmem:[#allocation6 + $0x8a4] ss:$12 sps:$4 sm:$0xff]  }
 0x3c0   :  { %6819 = vmatprep.subr.bf16.mxu0 %v10093_v50  ;;  %v10701_v13 = vpack.c.bf16 %v4711_v18, %v4711_v18  ;;  %v10160_v18 = vld [vmem:[#allocation6 + $0x8a0] ss:$12 sps:$4 sm:$0xff]  }
 0x3c1   :  { %v4724_v52 = vpack.c.bf16 %v4712_v28, %v4712_v28 }
 0x3c3   :  { %7123 = vmatprep.mubr.bf16.mxu1 %v4724_v52  ;;  %6820 = vmatpush1.bf16.msra.mxu0 %v10091_v19  ;;  %v10165_v19 = vld [vmem:[#allocation6 + $0x8bc] ss:$12 sps:$4 sm:$0xff]  }
 0x3c4   :  { %7124 = vmatmul.mubr.bf16.vlgmr.msra.gmra.mrb[44].mxu1 %v10701_v13  ;;  %6821 = vmatprep.subr.bf16.mxu0 %v10096_v12 }
 0x3c7   :  { %6822 = vmatpush1.bf16.msra.mxu0 %v10094_v36  ;;  %v10172_v36 = vld [vmem:[#allocation7 + $0x40] sm:$0xff]  }
 0x3c8   :  { %6823 = vmatprep.subr.bf16.mxu0 %v10099_v21  ;;  %v10173_v21 = vld [vmem:[#allocation7] sm:$0xff]   ;;  %8684 = vmatprep.subr.bf16.mxu1 %v10172_v36  ;;  %v10202_v36 = vld [vmem:[#allocation9 + $0x30] sm:$0xff]  }
 0x3c9   :  { %8685 = vmatpush3.bf16.msra.mxu1 %v10173_v21  ;;  %v10203_v21 = vld [vmem:[#allocation9 + $0x38] sm:$0xff]  }
 0x3cb   :  { %6824 = vmatpush1.bf16.msra.mxu0 %v10097_v56  ;;  %v10174_v56 = vld [vmem:[#allocation7 + $0x48] sm:$0xff]  }
 0x3cc   :  { %6825 = vmatprep.subr.bf16.mxu0 %v10102_v54  ;;  %v10163_v54 = vld [vmem:[#allocation6 + $0x8b8] ss:$12 sps:$4 sm:$0xff]   ;;  %8686 = vmatprep.subr.bf16.mxu1 %v10174_v56 }
 0x3cf   :  { %6826 = vmatpush1.bf16.msra.mxu0 %v10100_v58  ;;  %v10168_v58 = vld [vmem:[#allocation6 + $0x8d4] ss:$12 sps:$4 sm:$0xff]  }
 0x3d0   :  { %6827 = vmatprep.subr.bf16.mxu0 %v10105_v4  ;;  %v10175_v4 = vld [vmem:[#allocation7 + $0x8] sm:$0xff]  }
 0x3d1   :  { %8687 = vmatpush3.bf16.msra.mxu1 %v10175_v4 }
 0x3d3   :  { %6828 = vmatpush1.bf16.msra.mxu0 %v10103_v59  ;;  %v10176_v59 = vld [vmem:[#allocation7 + $0x50] sm:$0xff]  }
 0x3d4   :  { %6829 = vmatprep.subr.bf16.mxu0 %v10108_v24  ;;  %v10166_v24 = vld [vmem:[#allocation6 + $0x8d0] ss:$12 sps:$4 sm:$0xff]   ;;  %8688 = vmatprep.subr.bf16.mxu1 %v10176_v59 }
 0x3d7   :  { %6830 = vmatpush1.bf16.msra.mxu0 %v10106_v60  ;;  %v10171_v60 = vld [vmem:[#allocation6 + $0x8ec] ss:$12 sps:$4 sm:$0xff]  }
 0x3d8   :  { %6831 = vmatprep.subr.bf16.mxu0 %v10111_v62  ;;  %v10177_v62 = vld [vmem:[#allocation7 + $0x10] sm:$0xff]  }
 0x3d9   :  { %8689 = vmatpush3.bf16.msra.mxu1 %v10177_v62 }
 0x3db   :  { %v8568_v63 = vpop.f32.mrb[24].mxu1  ;;  %6832 = vmatpush1.bf16.msra.mxu0 %v10109_v5  ;;  %v10178_v5 = vld [vmem:[#allocation7 + $0x58] sm:$0xff]  }
 0x3dc   :  { %v8569_v1 = vpop.f32.mrb[25].mxu1  ;;  %6833 = vmatprep.subr.bf16.mxu0 %v10114_v39  ;;  %v10169_v39 = vld [vmem:[#allocation6 + $0x8e8] ss:$12 sps:$4 sm:$0xff]   ;;  %8690 = vmatprep.subr.bf16.mxu1 %v10178_v5 }
 0x3dd   :  { %v8570_v6 = vadd.f32 %v8569_v1, %v8568_v63  ;;  %v8571_v30 = vpop.f32.mrb[26].mxu1  ;;  %v10179_v63 = vld [vmem:[#allocation7 + $0x18] sm:$0xff]   ;;  %v10180_v1 = vld [vmem:[#allocation7 + $0x60] sm:$0xff]  }
 0x3de   :  { %v8572_v44 = vpop.f32.mrb[27].mxu1  ;;  %8691 = vmatpush3.bf16.msra.mxu1 %v10179_v63  ;;  %v10183_v30 = vld [vmem:[#allocation7 + $0x28] sm:$0xff]  }
 0x3df   :  { %6834 = vmatpush1.bf16.msra.mxu0 %v10112_v3  ;;  %v10181_v3 = vld [vmem:[#allocation7 + $0x20] sm:$0xff]   ;;  %8692 = vmatprep.subr.bf16.mxu1 %v10180_v1  ;;  %v10185_v44 = vld [vmem:[#allocation7 + $0x30] sm:$0xff]  }
 0x3e0   :  { %6835 = vmatprep.subr.bf16.mxu0 %v10117_v7  ;;  %v10184_v7 = vld [vmem:[#allocation7 + $0x70] sm:$0xff]   ;;  %v10204_v1 = vld [vmem:[#allocation10] sm:$0xff]  }
 0x3e2   :  { %8693 = vmatpush3.bf16.msra.mxu1 %v10181_v3 }
 0x3e3   :  { %6836 = vmatpush1.bf16.msra.mxu0 %v10115_v8 }
 0x3e4   :  { %6837 = vmatprep.subr.bf16.mxu0 %v10120_v25 }
 0x3e7   :  { %6838 = vmatpush1.bf16.msra.mxu0 %v10118_v14 }
 0x3e8   :  { %6839 = vmatprep.subr.bf16.mxu0 %v10123_v15 }
 0x3eb   :  { %6840 = vmatpush1.bf16.msra.mxu0 %v10121_v16 }
 0x3ec   :  { %6850 = vmatprep.subr.bf16.mxu0 %v10126_v29 }
 0x3ee   :  { %6842 = vmatmul.mubr.bf16.vlgmr.msra.gmra.mrb[12].mxu0 %v10689_v61  ;;  %v10141_v61 = vld [vmem:[#allocation6 + $0x7fc] ss:$12 sps:$4 sm:$0xff]  }
 0x3ef   :  { %6851 = vmatpush1.bf16.msra.mxu0 %v10124_v17  ;;  %6882 = vmatprep.mubr.bf16.mxu0 %v4724_v52 }
 0x3f0   :  { %6852 = vmatprep.subr.bf16.mxu0 %v10129_v20 }
 0x3f3   :  { %6853 = vmatpush1.bf16.msra.mxu0 %v10127_v22 }
 0x3f4   :  { %6854 = vmatprep.subr.bf16.mxu0 %v10132_v23 }
 0x3f7   :  { %6855 = vmatpush1.bf16.msra.mxu0 %v10130_v51 }
 0x3f8   :  { %6856 = vmatprep.subr.bf16.mxu0 %v10135_v26  ;;  %v10186_v26 = vld [vmem:[#allocation7 + $0x78] sm:$0xff]  }
 0x3fb   :  { %v8590_v31 = vpop.f32.mrb[28].mxu1  ;;  %6857 = vmatpush1.bf16.msra.mxu0 %v10133_v27  ;;  %v10187_v27 = vld [vmem:[#allocation7 + $0x38] sm:$0xff]  }
 0x3fc   :  { %v8591_v32 = vpop.f32.mrb[29].mxu1  ;;  %6858 = vmatprep.subr.bf16.mxu0 %v10138_v55  ;;  %v10366_v55 = vmov 0.0  }
 0x3fd   :  { %v8592_v10 = vadd.f32 %v8591_v32, %v8590_v31  ;;  %v8593_v34 = vpop.f32.mrb[30].mxu1 }
 0x3fe   :  { %v8594_v0 = vpop.f32.mrb[31].mxu1 }
 0x3ff   :  { %v6966_v35 = vadd.f32 %v8592_v10, %v8570_v6  ;;  %6859 = vmatpush1.bf16.msra.mxu0 %v10136_v33  ;;  %v10182_v6 = vld [vmem:[#allocation7 + $0x68] sm:$0xff]  }
 0x400   :  { %6860 = vmatprep.subr.bf16.mxu0 %v10141_v61  ;;  %8694 = vmatprep.subr.bf16.mxu1 %v10182_v6  ;;  %v10205_v6 = vld [vmem:[#allocation10 + $0x8] sm:$0xff]  }
 0x401   :  { %8695 = vmatpush3.bf16.msra.mxu1 %v10183_v30  ;;  %v10206_v30 = vld [vmem:[#allocation10 + $0x10] sm:$0xff]  }
 0x402   :  { %8696 = vmatprep.subr.bf16.mxu1 %v10184_v7  ;;  %v10207_v7 = vld [vmem:[#allocation10 + $0x18] sm:$0xff]  }
 0x403   :  { %6861 = vmatpush1.bf16.msra.mxu0 %v10139_v37 }
 0x404   :  { %6862 = vmatprep.subr.bf16.mxu0 %v10144_v38 }
 0x405   :  { %8697 = vmatpush3.bf16.msra.mxu1 %v10185_v44  ;;  %v10208_v44 = vld [vmem:[#allocation10 + $0x20] sm:$0xff]  }
 0x406   :  { %8698 = vmatprep.subr.bf16.mxu1 %v10186_v26 }
 0x407   :  { %6863 = vmatpush1.bf16.msra.mxu0 %v10142_v40 }
 0x408   :  { %6864 = vmatprep.subr.bf16.mxu0 %v10147_v9 }
 0x409   :  { %8699 = vmatpush3.bf16.msra.mxu1 %v10187_v27 }
 0x40a   :  { %8733 = vmatprep.subr.bf16.mxu1 %v10366_v55 }
 0x40b   :  { %6865 = vmatpush1.bf16.msra.mxu0 %v10145_v41 }
 0x40c   :  { %6866 = vmatprep.subr.bf16.mxu0 %v10150_v42  ;;  %v10188_v42 = vld [vmem:[#allocation7 + $0x80] sm:$0xff]  }
 0x40f   :  { %6867 = vmatpush1.bf16.msra.mxu0 %v10148_v43 }
 0x410   :  { %6868 = vmatprep.subr.bf16.mxu0 %v10153_v11  ;;  %v10189_v11 = vld [vmem:[#allocation7 + $0x88] sm:$0xff]  }
 0x413   :  { %6869 = vmatpush1.bf16.msra.mxu0 %v10151_v45  ;;  %v10190_v45 = vld [vmem:[#allocation7 + $0x90] sm:$0xff]  }
 0x414   :  { %6870 = vmatprep.subr.bf16.mxu0 %v10156_v46  ;;  %v10191_v46 = vld [vmem:[#allocation7 + $0x98] sm:$0xff]  }
 0x417   :  { %6871 = vmatpush1.bf16.msra.mxu0 %v10154_v47  ;;  %v10192_v47 = vld [vmem:[#allocation7 + $0xa0] sm:$0xff]  }
 0x418   :  { %6872 = vmatprep.subr.bf16.mxu0 %v10159_v48  ;;  %v10193_v48 = vld [vmem:[#allocation7 + $0xa8] sm:$0xff]  }
 0x41b   :  { %v8612_v57 = vpop.f32.mrb[32].mxu1  ;;  %6873 = vmatpush1.bf16.msra.mxu0 %v10157_v49  ;;  %v10194_v49 = vld [vmem:[#allocation7 + $0xb0] sm:$0xff]  }
 0x41c   :  { %v8613_v50 = vpop.f32.mrb[33].mxu1  ;;  %6874 = vmatprep.subr.bf16.mxu0 %v10162_v53  ;;  %v10195_v53 = vld [vmem:[#allocation7 + $0xb8] sm:$0xff]  }
 0x41d   :  { %v8614_v2 = vadd.f32 %v8613_v50, %v8612_v57  ;;  %v8615_v28 = vpop.f32.mrb[34].mxu1 }
 0x41e   :  { %v8616_v52 = vpop.f32.mrb[35].mxu1  ;;  %v10198_v28 = vld [vmem:[#allocation9 + $0x10] sm:$0xff]  }
 0x41f   :  { %v7006_v12 = vadd.f32 %v8614_v2, %v6966_v35  ;;  %6875 = vmatpush1.bf16.msra.mxu0 %v10160_v18  ;;  %v10196_v18 = vld [vmem:[#allocation9] sm:$0xff]   ;;  %v10197_v2 = vld [vmem:[#allocation9 + $0x8] sm:$0xff]  }
 0x420   :  { %6876 = vmatprep.subr.bf16.mxu0 %v10165_v19  ;;  %v10199_v19 = vld [vmem:[#allocation9 + $0x18] sm:$0xff]   ;;  %v10200_v52 = vld [vmem:[#allocation9 + $0x20] sm:$0xff]  }
 0x423   :  { %6877 = vmatpush1.bf16.msra.mxu0 %v10163_v54 }
 0x424   :  { %6878 = vmatprep.subr.bf16.mxu0 %v10168_v58 }
 0x427   :  { %6879 = vmatpush1.bf16.msra.mxu0 %v10166_v24 }
 0x428   :  { %6880 = vmatprep.subr.bf16.mxu0 %v10171_v60 }
 0x42b   :  { %6881 = vmatpush1.bf16.msra.mxu0 %v10169_v39 }
 0x42e   :  { %6883 = vmatmul.mubr.bf16.vlgmr.msra.gmra.mrb[12].mxu0 %v10701_v13 }
 0x43b   :  { %v8634_v8 = vpop.f32.mrb[36].mxu1 }
 0x43c   :  { %v8635_v25 = vpop.f32.mrb[37].mxu1 }
 0x43d   :  { %v8636_v14 = vadd.f32 %v8635_v25, %v8634_v8  ;;  %v8637_v15 = vpop.f32.mrb[38].mxu1  ;;  %v10209_v8 = vld [vmem:[#allocation10 + $0x28] sm:$0xff]   ;;  %v10210_v25 = vld [vmem:[#allocation10 + $0x30] sm:$0xff]  }
 0x43e   :  { %v8638_v16 = vpop.f32.mrb[39].mxu1 }
 0x43f   :  { %v7046_v29 = vadd.f32 %v8636_v14, %v7006_v12  ;;  %v10201_v12 = vld [vmem:[#allocation9 + $0x28] sm:$0xff]   ;;  %v10211_v14 = vld [vmem:[#allocation10 + $0x38] sm:$0xff]  }
 0x45f   :  { %v8656_v17 = vpop.f32.mrb[40].mxu1 }
 0x460   :  { %v8657_v20 = vpop.f32.mrb[41].mxu1 }
 0x461   :  { %v8658_v22 = vadd.f32 %v8657_v20, %v8656_v17  ;;  %v8659_v13 = vpop.f32.mrb[42].mxu1 }
 0x462   :  { %v8660_v23 = vpop.f32.mrb[43].mxu1 }
 0x463   :  { %v7086_v51 = vadd.f32 %v8658_v22, %v7046_v29 }
 0x497   :  { %v8678_v31 = vpop.f32.mrb[44].mxu1 }
 0x498   :  { %v8679_v32 = vpop.f32.mrb[45].mxu1 }
 0x499   :  { %v8680_v33 = vadd.f32 %v8679_v32, %v8678_v31  ;;  %v8681_v10 = vpop.f32.mrb[46].mxu1 }
 0x49a   :  { %v8682_v34 = vpop.f32.mrb[47].mxu1 }
 0x49b   :  { %v7126_v61 = vadd.f32 %v8680_v33, %v7086_v51 }
 0x49d   :  { %v7133_v57 = vmul.f32 %v7126_v61, %v7126_v61 }
 0x49f   :  { %v7136_v50 = vpack.c.bf16 %v7133_v57, %v7133_v57 }
 0x501   :  { %v6884_v0 = vpop.f32.mrb[12].mxu0 }
 0x502   :  { %v7131_v35 = vmul.f32 %v6884_v0, %v6884_v0  ;;  %v6886_v37 = vpop.f32.mrb[13].mxu0 }
 0x503   :  { %v7132_v38 = vmul.f32 %v6886_v37, %v6886_v37  ;;  %v6888_v40 = vpop.f32.mrb[14].mxu0 }
 0x504   :  { %v6889_v9 = vpop.f32.mrb[15].mxu0  ;;  %v7134_v43 = vpack.c.bf16 %v7131_v35, %v7131_v35 }
 0x505   :  { %v7135_v41 = vpack.c.bf16 %v7132_v38, %v7132_v38 }
 0x507   :  { %7361 = vmatprep.mubr.bf16.mxu1 %v7135_v41 }
 0x508   :  { %7362 = vmatmul.mubr.bf16.vlgmr.msra.gmra.mrb[48].mxu1 %v7134_v43 }
 0x509   :  { %8734 = vmatpush3.bf16.msra.mxu1 %v10188_v42  ;;  %8749 = vmatprep.mubr.msk.bf16.mxu1 %vm10367_vm1, %v10366_v55 }
 0x50a   :  { %8735 = vmatprep.subr.bf16.mxu1 %v10366_v55 }
 0x50d   :  { %8736 = vmatpush3.bf16.msra.mxu1 %v10189_v11 }
 0x50e   :  { %8737 = vmatprep.subr.bf16.mxu1 %v10366_v55 }
 0x511   :  { %8738 = vmatpush3.bf16.msra.mxu1 %v10190_v45 }
 0x512   :  { %8739 = vmatprep.subr.bf16.mxu1 %v10366_v55 }
 0x515   :  { %8740 = vmatpush3.bf16.msra.mxu1 %v10191_v46 }
 0x516   :  { %8741 = vmatprep.subr.bf16.mxu1 %v10366_v55 }
 0x519   :  { %8742 = vmatpush3.bf16.msra.mxu1 %v10192_v47 }
 0x51a   :  { %8743 = vmatprep.subr.bf16.mxu1 %v10366_v55 }
 0x51d   :  { %8744 = vmatpush3.bf16.msra.mxu1 %v10193_v48 }
 0x51e   :  { %8745 = vmatprep.subr.bf16.mxu1 %v10366_v55 }
 0x521   :  { %8746 = vmatpush3.bf16.msra.mxu1 %v10194_v49 }
 0x522   :  { %8747 = vmatprep.subr.bf16.mxu1 %v10366_v55 }
 0x525   :  { %8748 = vmatpush3.bf16.msra.mxu1 %v10195_v53 }
 0x526   :  { %8753 = vmatprep.subr.bf16.mxu1 %v10366_v55 }
 0x528   :  { %8750 = vmatmul.mubr.bf16.vlgmr.msra.gmra.mrb[52].mxu1 %v7136_v50 }
 0x529   :  { %8769 = vmatprep.mubr.msk.bf16.mxu1 %vm10367_vm1, %v10366_v55  ;;  %8754 = vmatpush3.bf16.msra.mxu1 %v10196_v18 }
 0x52a   :  { %8755 = vmatprep.subr.bf16.mxu1 %v10366_v55 }
 0x52d   :  { %8756 = vmatpush3.bf16.msra.mxu1 %v10197_v2 }
 0x52e   :  { %8757 = vmatprep.subr.bf16.mxu1 %v10366_v55 }
 0x531   :  { %8758 = vmatpush3.bf16.msra.mxu1 %v10198_v28 }
 0x532   :  { %8759 = vmatprep.subr.bf16.mxu1 %v10366_v55 }
 0x535   :  { %8760 = vmatpush3.bf16.msra.mxu1 %v10199_v19 }
 0x536   :  { %8761 = vmatprep.subr.bf16.mxu1 %v10366_v55 }
 0x539   :  { %8762 = vmatpush3.bf16.msra.mxu1 %v10200_v52 }
 0x53a   :  { %8763 = vmatprep.subr.bf16.mxu1 %v10366_v55 }
 0x53d   :  { %8764 = vmatpush3.bf16.msra.mxu1 %v10201_v12 }
 0x53e   :  { %8765 = vmatprep.subr.bf16.mxu1 %v10366_v55 }
 0x541   :  { %8766 = vmatpush3.bf16.msra.mxu1 %v10202_v36 }
 0x542   :  { %8767 = vmatprep.subr.bf16.mxu1 %v10366_v55 }
 0x545   :  { %8768 = vmatpush3.bf16.msra.mxu1 %v10203_v21 }
 0x546   :  { %8773 = vmatprep.subr.bf16.mxu1 %v10366_v55 }
 0x5db   :  { %v8700_v56 = vpop.f32.mrb[48].mxu1 }
 0x5dc   :  { %v8701_v54 = vpop.f32.mrb[49].mxu1 }
 0x5dd   :  { %v8702_v58 = vadd.f32 %v8701_v54, %v8700_v56  ;;  %v8703_v4 = vpop.f32.mrb[50].mxu1 }
 0x5de   :  { %v8704_v59 = vpop.f32.mrb[51].mxu1 }
 0x5fb   :  { %v7403_v24 = vpop.f32.mrb[52].mxu1 }
 0x5fc   :  { %v7404_v60 = vadd.f32 %v8702_v58, %v7403_v24  ;;  %v8751_v62 = vpop.f32.mrb[53].mxu1 }
 0x5fd   :  { %v7406_v5 = vpop.f32.mrb[54].mxu1 }
 0x5fe   :  { %v7409_v39 = vmax.f32 %v7404_v60, 0.0  ;;  %v8752_v63 = vpop.f32.mrb[55].mxu1 }
 0x600   :  { %v7410_v3 = vpack.c.bf16 %v7409_v39, %v7409_v39 }
 0x602   :  { %8770 = vmatmul.mubr.bf16.vlgmr.msra.gmra.mrb[56].mxu1 %v7410_v3 }
 0x603   :  { %8774 = vmatpush3.bf16.msra.mxu1 %v10204_v1  ;;  %8789 = vmatprep.mubr.msk.bf16.mxu1 %vm10367_vm1, %v10366_v55 }
 0x604   :  { %8775 = vmatprep.subr.bf16.mxu1 %v10366_v55 }
 0x607   :  { %8776 = vmatpush3.bf16.msra.mxu1 %v10205_v6 }
 0x608   :  { %8777 = vmatprep.subr.bf16.mxu1 %v10366_v55 }
 0x60b   :  { %8778 = vmatpush3.bf16.msra.mxu1 %v10206_v30 }
 0x60c   :  { %8779 = vmatprep.subr.bf16.mxu1 %v10366_v55 }
 0x60f   :  { %8780 = vmatpush3.bf16.msra.mxu1 %v10207_v7 }
 0x610   :  { %8781 = vmatprep.subr.bf16.mxu1 %v10366_v55 }
 0x613   :  { %8782 = vmatpush3.bf16.msra.mxu1 %v10208_v44 }
 0x614   :  { %8783 = vmatprep.subr.bf16.mxu1 %v10366_v55 }
 0x617   :  { %8784 = vmatpush3.bf16.msra.mxu1 %v10209_v8 }
 0x618   :  { %8785 = vmatprep.subr.bf16.mxu1 %v10366_v55 }
 0x61b   :  { %8786 = vmatpush3.bf16.msra.mxu1 %v10210_v25 }
 0x61c   :  { %8787 = vmatprep.subr.bf16.mxu1 %v10366_v55 }
 0x61f   :  { %8788 = vmatpush3.bf16.msra.mxu1 %v10211_v14 }
 0x6d5   :  { %v7509_v15 = vpop.f32.mrb[56].mxu1 }
 0x6d6   :  { %v7515_v16 = vmax.f32 %v7509_v15, 0.0  ;;  %v8771_v29 = vpop.f32.mrb[57].mxu1 }
 0x6d7   :  { %v7512_v17 = vpop.f32.mrb[58].mxu1 }
 0x6d8   :  { %v7516_v20 = vpack.c.bf16 %v7515_v16, %v7515_v16  ;;  %v8772_v22 = vpop.f32.mrb[59].mxu1 }
 0x6da   :  { %8790 = vmatmul.mubr.bf16.vlgmr.msra.gmra.mrb[60].mxu1 %v7516_v20 }
 0x7ad   :  { %v7615_v13 = vpop.f32.mrb[60].mxu1 }
 0x7ae   :  { %7621 = vst [vmem:[%s10746_s7] sm:$0xff] %v7615_v13  ;;  %v8791_v23 = vpop.f32.mrb[61].mxu1 }
 0x7af   :  { %v7618_v51 = vpop.f32.mrb[62].mxu1 }
 0x7b0   :  { %v8792_v26 = vpop.f32.mrb[63].mxu1 }
 0x7b1   :  { %7626 = vsyncpa [#allocation3], 1 }
 0x7b2   :  { %7627 = vsyncpa [#allocation5], 1 }
 0x7b3   :  { %7628 = vsyncpa [#allocation8], 1 }
 0x7b4   :  { %7629 = vsyncpa [#allocation11], 1 }

</bundles_post_ra>
